<compile_context>
chip_gen: v7x
topology: tpu7x:2x2x1
jax: 0.10.0
libtpu: 0.0.40
codegen_flags: <defaults>
</compile_context>

<pallas_src>
import math
import functools

import jax
import jax.numpy as jnp
from jax.experimental import pallas as pl
from jax.experimental.pallas import tpu as pltpu

# Hyper-parameters (match the PyTorch module).
VOCAB_SIZE = 100
VOCAB_PAD = 128            # vocab padded to lane width for the one-hot gather matmul
EMBED_DIM = 256
FF_DIM = 512
NUM_HEADS = 8
NUM_LAYERS = 3
HEAD_DIM = EMBED_DIM // NUM_HEADS
LN_EPS = 1e-5
MAX_POS = 128


# ----------------------------- fused Pallas kernel -----------------------------

def _layernorm(z, g, b):
    mean = jnp.mean(z, axis=-1, keepdims=True)
    cent = z - mean
    var = jnp.mean(cent * cent, axis=-1, keepdims=True)
    return cent * jax.lax.rsqrt(var + LN_EPS) * g + b


def _encoder_kernel(tok_ref, emb_ref, pos_ref, seg_ref, segt_ref,
                    wqkv_ref, bqkv_ref, wo_ref, bo_ref,
                    ln1w_ref, ln1b_ref, w1_ref, b1_ref, w2_ref, b2_ref,
                    ln2w_ref, ln2b_ref, o_ref, *, B, S):
    E = EMBED_DIM
    scale = 1.0 / math.sqrt(HEAD_DIM)

    # ---- embedding gather via one-hot matmul (vocab padded to 128) + pos add ----
    tok = tok_ref[...]                                                  # (B*S, 1) int32
    vocab_iota = jax.lax.broadcasted_iota(jnp.int32, (B * S, VOCAB_PAD), 1)
    onehot = (tok == vocab_iota).astype(jnp.float32)                    # (B*S, 128)
    x = jnp.dot(onehot, emb_ref[...], preferred_element_type=jnp.float32)  # (B*S, E)
    x = x + jnp.tile(pos_ref[...], (B, 1))                              # pos broadcast over B

    seg = seg_ref[...]                                                  # (E, H)  d//hd == h
    segt = segt_ref[...]                                                # (H, E)

    # ---- NUM_LAYERS post-norm encoder layers, statically unrolled -------------
    # TODO(synk): dropout inside the encoder layers is treated as identity (eval mode).
    for li in range(NUM_LAYERS):
        # fused QKV projection (bf16 MXU inputs, f32 accumulate)
        qkv = jnp.dot(x.astype(jnp.bfloat16), wqkv_ref[li],
                      preferred_element_type=jnp.float32) + bqkv_ref[li]     # (B*S, 3E)
        q = qkv[:, 0:E]
        k = qkv[:, E:2 * E]
        v = qkv[:, 2 * E:3 * E]

        # Multi-head attention over the first tensor axis (length B,
        # batch_first=False semantics).  Rows [l*S:(l+1)*S] share attention
        # position l; per-head lane reductions / expansions use the block-
        # diagonal segment matrices so all tiles stay (S, E) lane-dense.
        q_blk = [q[l * S:(l + 1) * S, :] for l in range(B)]
        k_blk = [k[l * S:(l + 1) * S, :] for l in range(B)]
        v_blk = [v[l * S:(l + 1) * S, :] for l in range(B)]

        out_blk = []
        for l in range(B):
            scores = [jnp.dot(q_blk[l] * k_blk[m], seg,
                              preferred_element_type=jnp.float32) * scale
                      for m in range(B)]                                     # each (S, H)
            mx = scores[0]
            for m in range(1, B):
                mx = jnp.maximum(mx, scores[m])
            exps = [jnp.exp(s - mx) for s in scores]
            den = exps[0]
            for m in range(1, B):
                den = den + exps[m]
            inv = pl.reciprocal(den, approx=True)                            # (S, H)
            o = None
            for m in range(B):
                w = jnp.dot(exps[m] * inv, segt,
                            preferred_element_type=jnp.float32)              # (S, E) probs
                term = w * v_blk[m]
                o = term if o is None else o + term
            out_blk.append(o)
        attn = jnp.concatenate(out_blk, axis=0)                              # (B*S, E)

        attn = jnp.dot(attn.astype(jnp.bfloat16), wo_ref[li],
                       preferred_element_type=jnp.float32) + bo_ref[li]
        x = _layernorm(x + attn, ln1w_ref[li], ln1b_ref[li])

        h = jnp.dot(x.astype(jnp.bfloat16), w1_ref[li],
                    preferred_element_type=jnp.float32) + b1_ref[li]
        h = jnp.maximum(h, 0.0)                                              # ReLU
        h = jnp.dot(h.astype(jnp.bfloat16), w2_ref[li],
                    preferred_element_type=jnp.float32) + b2_ref[li]
        x = _layernorm(x + h, ln2w_ref[li], ln2b_ref[li])

    o_ref[...] = x


# ------------------------------- forward wrapper -------------------------------

@jax.jit
def transformer_encoder_forward(tokens, params):
    B, S = tokens.shape
    tok2 = tokens.reshape(B * S, 1).astype(jnp.int32)
    pos = params["pos"][:S, :]                                   # (S, E)
    n_inputs = 17
    out = pl.pallas_call(
        functools.partial(_encoder_kernel, B=B, S=S),
        out_shape=jax.ShapeDtypeStruct((B * S, EMBED_DIM), jnp.float32),
        in_specs=[pl.BlockSpec(memory_space=pltpu.MemorySpace.VMEM)] * n_inputs,
        out_specs=pl.BlockSpec(memory_space=pltpu.MemorySpace.VMEM),
        compiler_params=pltpu.CompilerParams(vmem_limit_bytes=64 * 1024 * 1024),
    )(tok2, params["emb"], pos, params["seg"], params["segt"],
      params["wqkv"], params["bqkv"], params["wo"], params["bo"],
      params["ln1w"], params["ln1b"], params["w1"], params["b1"],
      params["w2"], params["b2"], params["ln2w"], params["ln2b"])
    return out.reshape(B, S, EMBED_DIM)


# ---------------------------------- params ------------------------------------

def init_params(key):
    keys = jax.random.split(key, 1 + NUM_LAYERS)
    emb = jax.random.normal(keys[0], (VOCAB_SIZE, EMBED_DIM), jnp.float32)
    emb_padded = jnp.zeros((VOCAB_PAD, EMBED_DIM), jnp.float32).at[:VOCAB_SIZE, :].set(emb)

    d = jnp.arange(EMBED_DIM)
    h = jnp.arange(NUM_HEADS)
    seg = (d[:, None] // HEAD_DIM == h[None, :]).astype(jnp.float32)     # (E, H)

    scale = 0.02
    names = ["wqkv", "bqkv", "wo", "bo", "ln1w", "ln1b",
             "w1", "b1", "w2", "b2", "ln2w", "ln2b"]
    stacks = {n: [] for n in names}
    for li in range(NUM_LAYERS):
        k = jax.random.split(keys[1 + li], 4)
        stacks["wqkv"].append(jnp.transpose(
            scale * jax.random.normal(k[0], (3 * EMBED_DIM, EMBED_DIM), jnp.float32)))
        stacks["bqkv"].append(jnp.zeros((3 * EMBED_DIM,), jnp.float32))
        stacks["wo"].append(jnp.transpose(
            scale * jax.random.normal(k[1], (EMBED_DIM, EMBED_DIM), jnp.float32)))
        stacks["bo"].append(jnp.zeros((EMBED_DIM,), jnp.float32))
        stacks["ln1w"].append(jnp.ones((EMBED_DIM,), jnp.float32))
        stacks["ln1b"].append(jnp.zeros((EMBED_DIM,), jnp.float32))
        stacks["w1"].append(jnp.transpose(
            scale * jax.random.normal(k[2], (FF_DIM, EMBED_DIM), jnp.float32)))
        stacks["b1"].append(jnp.zeros((FF_DIM,), jnp.float32))
        stacks["w2"].append(jnp.transpose(
            scale * jax.random.normal(k[3], (EMBED_DIM, FF_DIM), jnp.float32)))
        stacks["b2"].append(jnp.zeros((EMBED_DIM,), jnp.float32))
        stacks["ln2w"].append(jnp.ones((EMBED_DIM,), jnp.float32))
        stacks["ln2b"].append(jnp.zeros((EMBED_DIM,), jnp.float32))

    params = {
        "emb": emb_padded,                                      # (128, E) f32
        "pos": jnp.zeros((MAX_POS, EMBED_DIM), jnp.float32),    # nn.Parameter(zeros(1,128,E))
        "seg": seg,                                             # (E, H) f32
        "segt": jnp.transpose(seg),                             # (H, E) f32
        # matmul weights pre-transposed to (K, N), stored bf16 for the MXU
        "wqkv": jnp.stack(stacks["wqkv"]).astype(jnp.bfloat16),  # (L, E, 3E)
        "wo":   jnp.stack(stacks["wo"]).astype(jnp.bfloat16),    # (L, E, E)
        "w1":   jnp.stack(stacks["w1"]).astype(jnp.bfloat16),    # (L, E, FF)
        "w2":   jnp.stack(stacks["w2"]).astype(jnp.bfloat16),    # (L, FF, E)
        # biases / LN params stay f32, shaped (L, 1, N) for clean broadcast
        "bqkv": jnp.stack(stacks["bqkv"])[:, None, :],
        "bo":   jnp.stack(stacks["bo"])[:, None, :],
        "b1":   jnp.stack(stacks["b1"])[:, None, :],
        "b2":   jnp.stack(stacks["b2"])[:, None, :],
        "ln1w": jnp.stack(stacks["ln1w"])[:, None, :],
        "ln1b": jnp.stack(stacks["ln1b"])[:, None, :],
        "ln2w": jnp.stack(stacks["ln2w"])[:, None, :],
        "ln2b": jnp.stack(stacks["ln2b"])[:, None, :],
    }
    return params


if __name__ == "__main__":
    key = jax.random.PRNGKey(0)
    pkey, tkey = jax.random.split(key)
    params = init_params(pkey)

    # small input: batch=2, seq=8 token ids (B*S and S are sublane multiples)
    tokens = jax.random.randint(tkey, (2, 8), 0, VOCAB_SIZE, dtype=jnp.int32)

    out = transformer_encoder_forward(tokens, params)
    out = jax.block_until_ready(out)
    assert out.shape == (2, 8, EMBED_DIM)
    assert bool(jnp.all(jnp.isfinite(out)))
    print("KERNEL_OK")
</pallas_src>

<mosaic_0001>
module attributes {stable_mosaic.version = 11 : i64} {
  func.func @_encoder_kernel(%arg0: memref<16x1xi32, #tpu.memory_space<vmem>>, %arg1: memref<128x256xf32, #tpu.memory_space<vmem>>, %arg2: memref<8x256xf32, #tpu.memory_space<vmem>>, %arg3: memref<256x8xf32, #tpu.memory_space<vmem>>, %arg4: memref<8x256xf32, #tpu.memory_space<vmem>>, %arg5: memref<3x256x768xbf16, #tpu.memory_space<vmem>>, %arg6: memref<3x1x768xf32, #tpu.memory_space<vmem>>, %arg7: memref<3x256x256xbf16, #tpu.memory_space<vmem>>, %arg8: memref<3x1x256xf32, #tpu.memory_space<vmem>>, %arg9: memref<3x1x256xf32, #tpu.memory_space<vmem>>, %arg10: memref<3x1x256xf32, #tpu.memory_space<vmem>>, %arg11: memref<3x256x512xbf16, #tpu.memory_space<vmem>>, %arg12: memref<3x1x512xf32, #tpu.memory_space<vmem>>, %arg13: memref<3x512x256xbf16, #tpu.memory_space<vmem>>, %arg14: memref<3x1x256xf32, #tpu.memory_space<vmem>>, %arg15: memref<3x1x256xf32, #tpu.memory_space<vmem>>, %arg16: memref<3x1x256xf32, #tpu.memory_space<vmem>>, %arg17: memref<16x256xf32, #tpu.memory_space<vmem>>) attributes {dimension_semantics = [], scalar_prefetch = 0 : i64, scratch_operands = 0 : i64, tpu.core_type = #tpu.core_type<tc>} {
    %c0 = arith.constant 0 : index
    %c0_0 = arith.constant 0 : index
    %0 = vector.load %arg0[%c0, %c0_0] : memref<16x1xi32, #tpu.memory_space<vmem>>, vector<16x1xi32>
    %1 = tpu.iota {dimensions = array<i32: 1>} : vector<16x128xi32>
    %2 = vector.broadcast %0 : vector<16x1xi32> to vector<16x128xi32>
    %3 = arith.cmpi eq, %2, %1 : vector<16x128xi32>
    %4 = arith.extui %3 : vector<16x128xi1> to vector<16x128xi32>
    %5 = arith.sitofp %4 : vector<16x128xi32> to vector<16x128xf32>
    %c0_1 = arith.constant 0 : index
    %c0_2 = arith.constant 0 : index
    %6 = vector.load %arg1[%c0_1, %c0_2] : memref<128x256xf32, #tpu.memory_space<vmem>>, vector<128x256xf32>
    %cst = arith.constant dense<0.000000e+00> : vector<16x256xf32>
    %7 = tpu.matmul %5, %6, %cst {dimension_numbers = #tpu.dot_dimension_numbers<[1], [0], [0], [1], [0, 0, 1, 1], [], []>} : vector<16x128xf32>, vector<128x256xf32>, vector<16x256xf32> -> vector<16x256xf32>
    %c0_3 = arith.constant 0 : index
    %c0_4 = arith.constant 0 : index
    %8 = vector.load %arg2[%c0_3, %c0_4] : memref<8x256xf32, #tpu.memory_space<vmem>>, vector<8x256xf32>
    %9 = tpu.concatenate %8, %8 in 0 : vector<8x256xf32>, vector<8x256xf32> -> vector<16x256xf32>
    %10 = arith.addf %7, %9 : vector<16x256xf32>
    %c0_5 = arith.constant 0 : index
    %c0_6 = arith.constant 0 : index
    %11 = vector.load %arg3[%c0_5, %c0_6] : memref<256x8xf32, #tpu.memory_space<vmem>>, vector<256x8xf32>
    %c0_7 = arith.constant 0 : index
    %c0_8 = arith.constant 0 : index
    %12 = vector.load %arg4[%c0_7, %c0_8] : memref<8x256xf32, #tpu.memory_space<vmem>>, vector<8x256xf32>
    %13 = arith.truncf %10 : vector<16x256xf32> to vector<16x256xbf16>
    %c0_9 = arith.constant 0 : index
    %c0_10 = arith.constant 0 : index
    %c0_11 = arith.constant 0 : index
    %14 = vector.load %arg5[%c0_9, %c0_10, %c0_11] : memref<3x256x768xbf16, #tpu.memory_space<vmem>>, vector<1x256x768xbf16>
    %15 = vector.shape_cast %14 : vector<1x256x768xbf16> to vector<256x768xbf16>
    %cst_12 = arith.constant dense<0.000000e+00> : vector<16x768xf32>
    %16 = tpu.matmul %13, %15, %cst_12 {dimension_numbers = #tpu.dot_dimension_numbers<[1], [0], [0], [1], [0, 0, 1, 1], [], []>} : vector<16x256xbf16>, vector<256x768xbf16>, vector<16x768xf32> -> vector<16x768xf32>
    %c0_13 = arith.constant 0 : index
    %c0_14 = arith.constant 0 : index
    %c0_15 = arith.constant 0 : index
    %17 = vector.load %arg6[%c0_13, %c0_14, %c0_15] : memref<3x1x768xf32, #tpu.memory_space<vmem>>, vector<1x1x768xf32>
    %18 = vector.shape_cast %17 : vector<1x1x768xf32> to vector<1x768xf32>
    %19 = vector.broadcast %18 : vector<1x768xf32> to vector<16x768xf32>
    %20 = arith.addf %16, %19 : vector<16x768xf32>
    %21 = vector.extract_strided_slice %20 {offsets = [0, 0], sizes = [16, 256], strides = [1, 1]} : vector<16x768xf32> to vector<16x256xf32>
    %22 = vector.extract_strided_slice %20 {offsets = [0, 256], sizes = [16, 256], strides = [1, 1]} : vector<16x768xf32> to vector<16x256xf32>
    %23 = vector.extract_strided_slice %20 {offsets = [0, 512], sizes = [16, 256], strides = [1, 1]} : vector<16x768xf32> to vector<16x256xf32>
    %24 = vector.extract_strided_slice %21 {offsets = [0, 0], sizes = [8, 256], strides = [1, 1]} : vector<16x256xf32> to vector<8x256xf32>
    %25 = vector.extract_strided_slice %21 {offsets = [8, 0], sizes = [8, 256], strides = [1, 1]} : vector<16x256xf32> to vector<8x256xf32>
    %26 = vector.extract_strided_slice %22 {offsets = [0, 0], sizes = [8, 256], strides = [1, 1]} : vector<16x256xf32> to vector<8x256xf32>
    %27 = vector.extract_strided_slice %22 {offsets = [8, 0], sizes = [8, 256], strides = [1, 1]} : vector<16x256xf32> to vector<8x256xf32>
    %28 = vector.extract_strided_slice %23 {offsets = [0, 0], sizes = [8, 256], strides = [1, 1]} : vector<16x256xf32> to vector<8x256xf32>
    %29 = vector.extract_strided_slice %23 {offsets = [8, 0], sizes = [8, 256], strides = [1, 1]} : vector<16x256xf32> to vector<8x256xf32>
    %30 = arith.mulf %24, %26 : vector<8x256xf32>
    %cst_16 = arith.constant dense<0.000000e+00> : vector<8x8xf32>
    %31 = tpu.matmul %30, %11, %cst_16 {dimension_numbers = #tpu.dot_dimension_numbers<[1], [0], [0], [1], [0, 0, 1, 1], [], []>} : vector<8x256xf32>, vector<256x8xf32>, vector<8x8xf32> -> vector<8x8xf32>
    %cst_17 = arith.constant 0.176776692 : f32
    %32 = vector.broadcast %cst_17 : f32 to vector<8x8xf32>
    %33 = arith.mulf %31, %32 : vector<8x8xf32>
    %34 = arith.mulf %24, %27 : vector<8x256xf32>
    %cst_18 = arith.constant dense<0.000000e+00> : vector<8x8xf32>
    %35 = tpu.matmul %34, %11, %cst_18 {dimension_numbers = #tpu.dot_dimension_numbers<[1], [0], [0], [1], [0, 0, 1, 1], [], []>} : vector<8x256xf32>, vector<256x8xf32>, vector<8x8xf32> -> vector<8x8xf32>
    %cst_19 = arith.constant 0.176776692 : f32
    %36 = vector.broadcast %cst_19 : f32 to vector<8x8xf32>
    %37 = arith.mulf %35, %36 : vector<8x8xf32>
    %38 = arith.maximumf %33, %37 : vector<8x8xf32>
    %39 = arith.subf %33, %38 : vector<8x8xf32>
    %40 = math.exp %39 : vector<8x8xf32>
    %41 = arith.subf %37, %38 : vector<8x8xf32>
    %42 = math.exp %41 : vector<8x8xf32>
    %43 = arith.addf %40, %42 : vector<8x8xf32>
    %44 = tpu.reciprocal %43 {approx = true} : vector<8x8xf32> -> vector<8x8xf32>
    %45 = arith.mulf %40, %44 : vector<8x8xf32>
    %cst_20 = arith.constant dense<0.000000e+00> : vector<8x256xf32>
    %46 = tpu.matmul %45, %12, %cst_20 {dimension_numbers = #tpu.dot_dimension_numbers<[1], [0], [0], [1], [0, 0, 1, 1], [], []>} : vector<8x8xf32>, vector<8x256xf32>, vector<8x256xf32> -> vector<8x256xf32>
    %47 = arith.mulf %46, %28 : vector<8x256xf32>
    %48 = arith.mulf %42, %44 : vector<8x8xf32>
    %cst_21 = arith.constant dense<0.000000e+00> : vector<8x256xf32>
    %49 = tpu.matmul %48, %12, %cst_21 {dimension_numbers = #tpu.dot_dimension_numbers<[1], [0], [0], [1], [0, 0, 1, 1], [], []>} : vector<8x8xf32>, vector<8x256xf32>, vector<8x256xf32> -> vector<8x256xf32>
    %50 = arith.mulf %49, %29 : vector<8x256xf32>
    %51 = arith.addf %47, %50 : vector<8x256xf32>
    %52 = arith.mulf %25, %26 : vector<8x256xf32>
    %cst_22 = arith.constant dense<0.000000e+00> : vector<8x8xf32>
    %53 = tpu.matmul %52, %11, %cst_22 {dimension_numbers = #tpu.dot_dimension_numbers<[1], [0], [0], [1], [0, 0, 1, 1], [], []>} : vector<8x256xf32>, vector<256x8xf32>, vector<8x8xf32> -> vector<8x8xf32>
    %cst_23 = arith.constant 0.176776692 : f32
    %54 = vector.broadcast %cst_23 : f32 to vector<8x8xf32>
    %55 = arith.mulf %53, %54 : vector<8x8xf32>
    %56 = arith.mulf %25, %27 : vector<8x256xf32>
    %cst_24 = arith.constant dense<0.000000e+00> : vector<8x8xf32>
    %57 = tpu.matmul %56, %11, %cst_24 {dimension_numbers = #tpu.dot_dimension_numbers<[1], [0], [0], [1], [0, 0, 1, 1], [], []>} : vector<8x256xf32>, vector<256x8xf32>, vector<8x8xf32> -> vector<8x8xf32>
    %cst_25 = arith.constant 0.176776692 : f32
    %58 = vector.broadcast %cst_25 : f32 to vector<8x8xf32>
    %59 = arith.mulf %57, %58 : vector<8x8xf32>
    %60 = arith.maximumf %55, %59 : vector<8x8xf32>
    %61 = arith.subf %55, %60 : vector<8x8xf32>
    %62 = math.exp %61 : vector<8x8xf32>
    %63 = arith.subf %59, %60 : vector<8x8xf32>
    %64 = math.exp %63 : vector<8x8xf32>
    %65 = arith.addf %62, %64 : vector<8x8xf32>
    %66 = tpu.reciprocal %65 {approx = true} : vector<8x8xf32> -> vector<8x8xf32>
    %67 = arith.mulf %62, %66 : vector<8x8xf32>
    %cst_26 = arith.constant dense<0.000000e+00> : vector<8x256xf32>
    %68 = tpu.matmul %67, %12, %cst_26 {dimension_numbers = #tpu.dot_dimension_numbers<[1], [0], [0], [1], [0, 0, 1, 1], [], []>} : vector<8x8xf32>, vector<8x256xf32>, vector<8x256xf32> -> vector<8x256xf32>
    %69 = arith.mulf %68, %28 : vector<8x256xf32>
    %70 = arith.mulf %64, %66 : vector<8x8xf32>
    %cst_27 = arith.constant dense<0.000000e+00> : vector<8x256xf32>
    %71 = tpu.matmul %70, %12, %cst_27 {dimension_numbers = #tpu.dot_dimension_numbers<[1], [0], [0], [1], [0, 0, 1, 1], [], []>} : vector<8x8xf32>, vector<8x256xf32>, vector<8x256xf32> -> vector<8x256xf32>
    %72 = arith.mulf %71, %29 : vector<8x256xf32>
    %73 = arith.addf %69, %72 : vector<8x256xf32>
    %74 = tpu.concatenate %51, %73 in 0 : vector<8x256xf32>, vector<8x256xf32> -> vector<16x256xf32>
    %75 = arith.truncf %74 : vector<16x256xf32> to vector<16x256xbf16>
    %c0_28 = arith.constant 0 : index
    %c0_29 = arith.constant 0 : index
    %c0_30 = arith.constant 0 : index
    %76 = vector.load %arg7[%c0_28, %c0_29, %c0_30] : memref<3x256x256xbf16, #tpu.memory_space<vmem>>, vector<1x256x256xbf16>
    %77 = vector.shape_cast %76 : vector<1x256x256xbf16> to vector<256x256xbf16>
    %cst_31 = arith.constant dense<0.000000e+00> : vector<16x256xf32>
    %78 = tpu.matmul %75, %77, %cst_31 {dimension_numbers = #tpu.dot_dimension_numbers<[1], [0], [0], [1], [0, 0, 1, 1], [], []>} : vector<16x256xbf16>, vector<256x256xbf16>, vector<16x256xf32> -> vector<16x256xf32>
    %c0_32 = arith.constant 0 : index
    %c0_33 = arith.constant 0 : index
    %c0_34 = arith.constant 0 : index
    %79 = vector.load %arg8[%c0_32, %c0_33, %c0_34] : memref<3x1x256xf32, #tpu.memory_space<vmem>>, vector<1x1x256xf32>
    %80 = vector.shape_cast %79 : vector<1x1x256xf32> to vector<1x256xf32>
    %81 = vector.broadcast %80 : vector<1x256xf32> to vector<16x256xf32>
    %82 = arith.addf %78, %81 : vector<16x256xf32>
    %83 = arith.addf %10, %82 : vector<16x256xf32>
    %c0_35 = arith.constant 0 : index
    %c0_36 = arith.constant 0 : index
    %c0_37 = arith.constant 0 : index
    %84 = vector.load %arg9[%c0_35, %c0_36, %c0_37] : memref<3x1x256xf32, #tpu.memory_space<vmem>>, vector<1x1x256xf32>
    %85 = vector.shape_cast %84 : vector<1x1x256xf32> to vector<1x256xf32>
    %c0_38 = arith.constant 0 : index
    %c0_39 = arith.constant 0 : index
    %c0_40 = arith.constant 0 : index
    %86 = vector.load %arg10[%c0_38, %c0_39, %c0_40] : memref<3x1x256xf32, #tpu.memory_space<vmem>>, vector<1x1x256xf32>
    %87 = vector.shape_cast %86 : vector<1x1x256xf32> to vector<1x256xf32>
    %cst_41 = arith.constant dense<0.000000e+00> : vector<16xf32>
    %88 = vector.multi_reduction <add>, %83, %cst_41 [1] : vector<16x256xf32> to vector<16xf32>
    %89 = vector.shape_cast %88 : vector<16xf32> to vector<16x1xf32>
    %cst_42 = arith.constant 2.560000e+02 : f32
    %90 = vector.broadcast %cst_42 : f32 to vector<16x1xf32>
    %91 = arith.divf %89, %90 : vector<16x1xf32>
    %92 = vector.broadcast %91 : vector<16x1xf32> to vector<16x256xf32>
    %93 = arith.subf %83, %92 : vector<16x256xf32>
    %94 = arith.mulf %93, %93 : vector<16x256xf32>
    %cst_43 = arith.constant dense<0.000000e+00> : vector<16xf32>
    %95 = vector.multi_reduction <add>, %94, %cst_43 [1] : vector<16x256xf32> to vector<16xf32>
    %96 = vector.shape_cast %95 : vector<16xf32> to vector<16x1xf32>
    %cst_44 = arith.constant 2.560000e+02 : f32
    %97 = vector.broadcast %cst_44 : f32 to vector<16x1xf32>
    %98 = arith.divf %96, %97 : vector<16x1xf32>
    %cst_45 = arith.constant 9.99999974E-6 : f32
    %99 = vector.broadcast %cst_45 : f32 to vector<16x1xf32>
    %100 = arith.addf %98, %99 : vector<16x1xf32>
    %101 = math.rsqrt %100 : vector<16x1xf32>
    %102 = vector.broadcast %101 : vector<16x1xf32> to vector<16x256xf32>
    %103 = arith.mulf %93, %102 : vector<16x256xf32>
    %104 = vector.broadcast %85 : vector<1x256xf32> to vector<16x256xf32>
    %105 = arith.mulf %103, %104 : vector<16x256xf32>
    %106 = vector.broadcast %87 : vector<1x256xf32> to vector<16x256xf32>
    %107 = arith.addf %105, %106 : vector<16x256xf32>
    %108 = arith.truncf %107 : vector<16x256xf32> to vector<16x256xbf16>
    %c0_46 = arith.constant 0 : index
    %c0_47 = arith.constant 0 : index
    %c0_48 = arith.constant 0 : index
    %109 = vector.load %arg11[%c0_46, %c0_47, %c0_48] : memref<3x256x512xbf16, #tpu.memory_space<vmem>>, vector<1x256x512xbf16>
    %110 = vector.shape_cast %109 : vector<1x256x512xbf16> to vector<256x512xbf16>
    %cst_49 = arith.constant dense<0.000000e+00> : vector<16x512xf32>
    %111 = tpu.matmul %108, %110, %cst_49 {dimension_numbers = #tpu.dot_dimension_numbers<[1], [0], [0], [1], [0, 0, 1, 1], [], []>} : vector<16x256xbf16>, vector<256x512xbf16>, vector<16x512xf32> -> vector<16x512xf32>
    %c0_50 = arith.constant 0 : index
    %c0_51 = arith.constant 0 : index
    %c0_52 = arith.constant 0 : index
    %112 = vector.load %arg12[%c0_50, %c0_51, %c0_52] : memref<3x1x512xf32, #tpu.memory_space<vmem>>, vector<1x1x512xf32>
    %113 = vector.shape_cast %112 : vector<1x1x512xf32> to vector<1x512xf32>
    %114 = vector.broadcast %113 : vector<1x512xf32> to vector<16x512xf32>
    %115 = arith.addf %111, %114 : vector<16x512xf32>
    %cst_53 = arith.constant 0.000000e+00 : f32
    %116 = vector.broadcast %cst_53 : f32 to vector<16x512xf32>
    %117 = arith.maximumf %115, %116 : vector<16x512xf32>
    %118 = arith.truncf %117 : vector<16x512xf32> to vector<16x512xbf16>
    %c0_54 = arith.constant 0 : index
    %c0_55 = arith.constant 0 : index
    %c0_56 = arith.constant 0 : index
    %119 = vector.load %arg13[%c0_54, %c0_55, %c0_56] : memref<3x512x256xbf16, #tpu.memory_space<vmem>>, vector<1x512x256xbf16>
    %120 = vector.shape_cast %119 : vector<1x512x256xbf16> to vector<512x256xbf16>
    %cst_57 = arith.constant dense<0.000000e+00> : vector<16x256xf32>
    %121 = tpu.matmul %118, %120, %cst_57 {dimension_numbers = #tpu.dot_dimension_numbers<[1], [0], [0], [1], [0, 0, 1, 1], [], []>} : vector<16x512xbf16>, vector<512x256xbf16>, vector<16x256xf32> -> vector<16x256xf32>
    %c0_58 = arith.constant 0 : index
    %c0_59 = arith.constant 0 : index
    %c0_60 = arith.constant 0 : index
    %122 = vector.load %arg14[%c0_58, %c0_59, %c0_60] : memref<3x1x256xf32, #tpu.memory_space<vmem>>, vector<1x1x256xf32>
    %123 = vector.shape_cast %122 : vector<1x1x256xf32> to vector<1x256xf32>
    %124 = vector.broadcast %123 : vector<1x256xf32> to vector<16x256xf32>
    %125 = arith.addf %121, %124 : vector<16x256xf32>
    %126 = arith.addf %107, %125 : vector<16x256xf32>
    %c0_61 = arith.constant 0 : index
    %c0_62 = arith.constant 0 : index
    %c0_63 = arith.constant 0 : index
    %127 = vector.load %arg15[%c0_61, %c0_62, %c0_63] : memref<3x1x256xf32, #tpu.memory_space<vmem>>, vector<1x1x256xf32>
    %128 = vector.shape_cast %127 : vector<1x1x256xf32> to vector<1x256xf32>
    %c0_64 = arith.constant 0 : index
    %c0_65 = arith.constant 0 : index
    %c0_66 = arith.constant 0 : index
    %129 = vector.load %arg16[%c0_64, %c0_65, %c0_66] : memref<3x1x256xf32, #tpu.memory_space<vmem>>, vector<1x1x256xf32>
    %130 = vector.shape_cast %129 : vector<1x1x256xf32> to vector<1x256xf32>
    %cst_67 = arith.constant dense<0.000000e+00> : vector<16xf32>
    %131 = vector.multi_reduction <add>, %126, %cst_67 [1] : vector<16x256xf32> to vector<16xf32>
    %132 = vector.shape_cast %131 : vector<16xf32> to vector<16x1xf32>
    %cst_68 = arith.constant 2.560000e+02 : f32
    %133 = vector.broadcast %cst_68 : f32 to vector<16x1xf32>
    %134 = arith.divf %132, %133 : vector<16x1xf32>
    %135 = vector.broadcast %134 : vector<16x1xf32> to vector<16x256xf32>
    %136 = arith.subf %126, %135 : vector<16x256xf32>
    %137 = arith.mulf %136, %136 : vector<16x256xf32>
    %cst_69 = arith.constant dense<0.000000e+00> : vector<16xf32>
    %138 = vector.multi_reduction <add>, %137, %cst_69 [1] : vector<16x256xf32> to vector<16xf32>
    %139 = vector.shape_cast %138 : vector<16xf32> to vector<16x1xf32>
    %cst_70 = arith.constant 2.560000e+02 : f32
    %140 = vector.broadcast %cst_70 : f32 to vector<16x1xf32>
    %141 = arith.divf %139, %140 : vector<16x1xf32>
    %cst_71 = arith.constant 9.99999974E-6 : f32
    %142 = vector.broadcast %cst_71 : f32 to vector<16x1xf32>
    %143 = arith.addf %141, %142 : vector<16x1xf32>
    %144 = math.rsqrt %143 : vector<16x1xf32>
    %145 = vector.broadcast %144 : vector<16x1xf32> to vector<16x256xf32>
    %146 = arith.mulf %136, %145 : vector<16x256xf32>
    %147 = vector.broadcast %128 : vector<1x256xf32> to vector<16x256xf32>
    %148 = arith.mulf %146, %147 : vector<16x256xf32>
    %149 = vector.broadcast %130 : vector<1x256xf32> to vector<16x256xf32>
    %150 = arith.addf %148, %149 : vector<16x256xf32>
    %151 = arith.truncf %150 : vector<16x256xf32> to vector<16x256xbf16>
    %c1 = arith.constant 1 : index
    %c0_72 = arith.constant 0 : index
    %c0_73 = arith.constant 0 : index
    %152 = vector.load %arg5[%c1, %c0_72, %c0_73] : memref<3x256x768xbf16, #tpu.memory_space<vmem>>, vector<1x256x768xbf16>
    %153 = vector.shape_cast %152 : vector<1x256x768xbf16> to vector<256x768xbf16>
    %cst_74 = arith.constant dense<0.000000e+00> : vector<16x768xf32>
    %154 = tpu.matmul %151, %153, %cst_74 {dimension_numbers = #tpu.dot_dimension_numbers<[1], [0], [0], [1], [0, 0, 1, 1], [], []>} : vector<16x256xbf16>, vector<256x768xbf16>, vector<16x768xf32> -> vector<16x768xf32>
    %c1_75 = arith.constant 1 : index
    %c0_76 = arith.constant 0 : index
    %c0_77 = arith.constant 0 : index
    %155 = vector.load %arg6[%c1_75, %c0_76, %c0_77] : memref<3x1x768xf32, #tpu.memory_space<vmem>>, vector<1x1x768xf32>
    %156 = vector.shape_cast %155 : vector<1x1x768xf32> to vector<1x768xf32>
    %157 = vector.broadcast %156 : vector<1x768xf32> to vector<16x768xf32>
    %158 = arith.addf %154, %157 : vector<16x768xf32>
    %159 = vector.extract_strided_slice %158 {offsets = [0, 0], sizes = [16, 256], strides = [1, 1]} : vector<16x768xf32> to vector<16x256xf32>
    %160 = vector.extract_strided_slice %158 {offsets = [0, 256], sizes = [16, 256], strides = [1, 1]} : vector<16x768xf32> to vector<16x256xf32>
    %161 = vector.extract_strided_slice %158 {offsets = [0, 512], sizes = [16, 256], strides = [1, 1]} : vector<16x768xf32> to vector<16x256xf32>
    %162 = vector.extract_strided_slice %159 {offsets = [0, 0], sizes = [8, 256], strides = [1, 1]} : vector<16x256xf32> to vector<8x256xf32>
    %163 = vector.extract_strided_slice %159 {offsets = [8, 0], sizes = [8, 256], strides = [1, 1]} : vector<16x256xf32> to vector<8x256xf32>
    %164 = vector.extract_strided_slice %160 {offsets = [0, 0], sizes = [8, 256], strides = [1, 1]} : vector<16x256xf32> to vector<8x256xf32>
    %165 = vector.extract_strided_slice %160 {offsets = [8, 0], sizes = [8, 256], strides = [1, 1]} : vector<16x256xf32> to vector<8x256xf32>
    %166 = vector.extract_strided_slice %161 {offsets = [0, 0], sizes = [8, 256], strides = [1, 1]} : vector<16x256xf32> to vector<8x256xf32>
    %167 = vector.extract_strided_slice %161 {offsets = [8, 0], sizes = [8, 256], strides = [1, 1]} : vector<16x256xf32> to vector<8x256xf32>
    %168 = arith.mulf %162, %164 : vector<8x256xf32>
    %cst_78 = arith.constant dense<0.000000e+00> : vector<8x8xf32>
    %169 = tpu.matmul %168, %11, %cst_78 {dimension_numbers = #tpu.dot_dimension_numbers<[1], [0], [0], [1], [0, 0, 1, 1], [], []>} : vector<8x256xf32>, vector<256x8xf32>, vector<8x8xf32> -> vector<8x8xf32>
    %cst_79 = arith.constant 0.176776692 : f32
    %170 = vector.broadcast %cst_79 : f32 to vector<8x8xf32>
    %171 = arith.mulf %169, %170 : vector<8x8xf32>
    %172 = arith.mulf %162, %165 : vector<8x256xf32>
    %cst_80 = arith.constant dense<0.000000e+00> : vector<8x8xf32>
    %173 = tpu.matmul %172, %11, %cst_80 {dimension_numbers = #tpu.dot_dimension_numbers<[1], [0], [0], [1], [0, 0, 1, 1], [], []>} : vector<8x256xf32>, vector<256x8xf32>, vector<8x8xf32> -> vector<8x8xf32>
    %cst_81 = arith.constant 0.176776692 : f32
    %174 = vector.broadcast %cst_81 : f32 to vector<8x8xf32>
    %175 = arith.mulf %173, %174 : vector<8x8xf32>
    %176 = arith.maximumf %171, %175 : vector<8x8xf32>
    %177 = arith.subf %171, %176 : vector<8x8xf32>
    %178 = math.exp %177 : vector<8x8xf32>
    %179 = arith.subf %175, %176 : vector<8x8xf32>
    %180 = math.exp %179 : vector<8x8xf32>
    %181 = arith.addf %178, %180 : vector<8x8xf32>
    %182 = tpu.reciprocal %181 {approx = true} : vector<8x8xf32> -> vector<8x8xf32>
    %183 = arith.mulf %178, %182 : vector<8x8xf32>
    %cst_82 = arith.constant dense<0.000000e+00> : vector<8x256xf32>
    %184 = tpu.matmul %183, %12, %cst_82 {dimension_numbers = #tpu.dot_dimension_numbers<[1], [0], [0], [1], [0, 0, 1, 1], [], []>} : vector<8x8xf32>, vector<8x256xf32>, vector<8x256xf32> -> vector<8x256xf32>
    %185 = arith.mulf %184, %166 : vector<8x256xf32>
    %186 = arith.mulf %180, %182 : vector<8x8xf32>
    %cst_83 = arith.constant dense<0.000000e+00> : vector<8x256xf32>
    %187 = tpu.matmul %186, %12, %cst_83 {dimension_numbers = #tpu.dot_dimension_numbers<[1], [0], [0], [1], [0, 0, 1, 1], [], []>} : vector<8x8xf32>, vector<8x256xf32>, vector<8x256xf32> -> vector<8x256xf32>
    %188 = arith.mulf %187, %167 : vector<8x256xf32>
    %189 = arith.addf %185, %188 : vector<8x256xf32>
    %190 = arith.mulf %163, %164 : vector<8x256xf32>
    %cst_84 = arith.constant dense<0.000000e+00> : vector<8x8xf32>
    %191 = tpu.matmul %190, %11, %cst_84 {dimension_numbers = #tpu.dot_dimension_numbers<[1], [0], [0], [1], [0, 0, 1, 1], [], []>} : vector<8x256xf32>, vector<256x8xf32>, vector<8x8xf32> -> vector<8x8xf32>
    %cst_85 = arith.constant 0.176776692 : f32
    %192 = vector.broadcast %cst_85 : f32 to vector<8x8xf32>
    %193 = arith.mulf %191, %192 : vector<8x8xf32>
    %194 = arith.mulf %163, %165 : vector<8x256xf32>
    %cst_86 = arith.constant dense<0.000000e+00> : vector<8x8xf32>
    %195 = tpu.matmul %194, %11, %cst_86 {dimension_numbers = #tpu.dot_dimension_numbers<[1], [0], [0], [1], [0, 0, 1, 1], [], []>} : vector<8x256xf32>, vector<256x8xf32>, vector<8x8xf32> -> vector<8x8xf32>
    %cst_87 = arith.constant 0.176776692 : f32
    %196 = vector.broadcast %cst_87 : f32 to vector<8x8xf32>
    %197 = arith.mulf %195, %196 : vector<8x8xf32>
    %198 = arith.maximumf %193, %197 : vector<8x8xf32>
    %199 = arith.subf %193, %198 : vector<8x8xf32>
    %200 = math.exp %199 : vector<8x8xf32>
    %201 = arith.subf %197, %198 : vector<8x8xf32>
    %202 = math.exp %201 : vector<8x8xf32>
    %203 = arith.addf %200, %202 : vector<8x8xf32>
    %204 = tpu.reciprocal %203 {approx = true} : vector<8x8xf32> -> vector<8x8xf32>
    %205 = arith.mulf %200, %204 : vector<8x8xf32>
    %cst_88 = arith.constant dense<0.000000e+00> : vector<8x256xf32>
    %206 = tpu.matmul %205, %12, %cst_88 {dimension_numbers = #tpu.dot_dimension_numbers<[1], [0], [0], [1], [0, 0, 1, 1], [], []>} : vector<8x8xf32>, vector<8x256xf32>, vector<8x256xf32> -> vector<8x256xf32>
    %207 = arith.mulf %206, %166 : vector<8x256xf32>
    %208 = arith.mulf %202, %204 : vector<8x8xf32>
    %cst_89 = arith.constant dense<0.000000e+00> : vector<8x256xf32>
    %209 = tpu.matmul %208, %12, %cst_89 {dimension_numbers = #tpu.dot_dimension_numbers<[1], [0], [0], [1], [0, 0, 1, 1], [], []>} : vector<8x8xf32>, vector<8x256xf32>, vector<8x256xf32> -> vector<8x256xf32>
    %210 = arith.mulf %209, %167 : vector<8x256xf32>
    %211 = arith.addf %207, %210 : vector<8x256xf32>
    %212 = tpu.concatenate %189, %211 in 0 : vector<8x256xf32>, vector<8x256xf32> -> vector<16x256xf32>
    %213 = arith.truncf %212 : vector<16x256xf32> to vector<16x256xbf16>
    %c1_90 = arith.constant 1 : index
    %c0_91 = arith.constant 0 : index
    %c0_92 = arith.constant 0 : index
    %214 = vector.load %arg7[%c1_90, %c0_91, %c0_92] : memref<3x256x256xbf16, #tpu.memory_space<vmem>>, vector<1x256x256xbf16>
    %215 = vector.shape_cast %214 : vector<1x256x256xbf16> to vector<256x256xbf16>
    %cst_93 = arith.constant dense<0.000000e+00> : vector<16x256xf32>
    %216 = tpu.matmul %213, %215, %cst_93 {dimension_numbers = #tpu.dot_dimension_numbers<[1], [0], [0], [1], [0, 0, 1, 1], [], []>} : vector<16x256xbf16>, vector<256x256xbf16>, vector<16x256xf32> -> vector<16x256xf32>
    %c1_94 = arith.constant 1 : index
    %c0_95 = arith.constant 0 : index
    %c0_96 = arith.constant 0 : index
    %217 = vector.load %arg8[%c1_94, %c0_95, %c0_96] : memref<3x1x256xf32, #tpu.memory_space<vmem>>, vector<1x1x256xf32>
    %218 = vector.shape_cast %217 : vector<1x1x256xf32> to vector<1x256xf32>
    %219 = vector.broadcast %218 : vector<1x256xf32> to vector<16x256xf32>
    %220 = arith.addf %216, %219 : vector<16x256xf32>
    %221 = arith.addf %150, %220 : vector<16x256xf32>
    %c1_97 = arith.constant 1 : index
    %c0_98 = arith.constant 0 : index
    %c0_99 = arith.constant 0 : index
    %222 = vector.load %arg9[%c1_97, %c0_98, %c0_99] : memref<3x1x256xf32, #tpu.memory_space<vmem>>, vector<1x1x256xf32>
    %223 = vector.shape_cast %222 : vector<1x1x256xf32> to vector<1x256xf32>
    %c1_100 = arith.constant 1 : index
    %c0_101 = arith.constant 0 : index
    %c0_102 = arith.constant 0 : index
    %224 = vector.load %arg10[%c1_100, %c0_101, %c0_102] : memref<3x1x256xf32, #tpu.memory_space<vmem>>, vector<1x1x256xf32>
    %225 = vector.shape_cast %224 : vector<1x1x256xf32> to vector<1x256xf32>
    %cst_103 = arith.constant dense<0.000000e+00> : vector<16xf32>
    %226 = vector.multi_reduction <add>, %221, %cst_103 [1] : vector<16x256xf32> to vector<16xf32>
    %227 = vector.shape_cast %226 : vector<16xf32> to vector<16x1xf32>
    %cst_104 = arith.constant 2.560000e+02 : f32
    %228 = vector.broadcast %cst_104 : f32 to vector<16x1xf32>
    %229 = arith.divf %227, %228 : vector<16x1xf32>
    %230 = vector.broadcast %229 : vector<16x1xf32> to vector<16x256xf32>
    %231 = arith.subf %221, %230 : vector<16x256xf32>
    %232 = arith.mulf %231, %231 : vector<16x256xf32>
    %cst_105 = arith.constant dense<0.000000e+00> : vector<16xf32>
    %233 = vector.multi_reduction <add>, %232, %cst_105 [1] : vector<16x256xf32> to vector<16xf32>
    %234 = vector.shape_cast %233 : vector<16xf32> to vector<16x1xf32>
    %cst_106 = arith.constant 2.560000e+02 : f32
    %235 = vector.broadcast %cst_106 : f32 to vector<16x1xf32>
    %236 = arith.divf %234, %235 : vector<16x1xf32>
    %cst_107 = arith.constant 9.99999974E-6 : f32
    %237 = vector.broadcast %cst_107 : f32 to vector<16x1xf32>
    %238 = arith.addf %236, %237 : vector<16x1xf32>
    %239 = math.rsqrt %238 : vector<16x1xf32>
    %240 = vector.broadcast %239 : vector<16x1xf32> to vector<16x256xf32>
    %241 = arith.mulf %231, %240 : vector<16x256xf32>
    %242 = vector.broadcast %223 : vector<1x256xf32> to vector<16x256xf32>
    %243 = arith.mulf %241, %242 : vector<16x256xf32>
    %244 = vector.broadcast %225 : vector<1x256xf32> to vector<16x256xf32>
    %245 = arith.addf %243, %244 : vector<16x256xf32>
    %246 = arith.truncf %245 : vector<16x256xf32> to vector<16x256xbf16>
    %c1_108 = arith.constant 1 : index
    %c0_109 = arith.constant 0 : index
    %c0_110 = arith.constant 0 : index
    %247 = vector.load %arg11[%c1_108, %c0_109, %c0_110] : memref<3x256x512xbf16, #tpu.memory_space<vmem>>, vector<1x256x512xbf16>
    %248 = vector.shape_cast %247 : vector<1x256x512xbf16> to vector<256x512xbf16>
    %cst_111 = arith.constant dense<0.000000e+00> : vector<16x512xf32>
    %249 = tpu.matmul %246, %248, %cst_111 {dimension_numbers = #tpu.dot_dimension_numbers<[1], [0], [0], [1], [0, 0, 1, 1], [], []>} : vector<16x256xbf16>, vector<256x512xbf16>, vector<16x512xf32> -> vector<16x512xf32>
    %c1_112 = arith.constant 1 : index
    %c0_113 = arith.constant 0 : index
    %c0_114 = arith.constant 0 : index
    %250 = vector.load %arg12[%c1_112, %c0_113, %c0_114] : memref<3x1x512xf32, #tpu.memory_space<vmem>>, vector<1x1x512xf32>
    %251 = vector.shape_cast %250 : vector<1x1x512xf32> to vector<1x512xf32>
    %252 = vector.broadcast %251 : vector<1x512xf32> to vector<16x512xf32>
    %253 = arith.addf %249, %252 : vector<16x512xf32>
    %cst_115 = arith.constant 0.000000e+00 : f32
    %254 = vector.broadcast %cst_115 : f32 to vector<16x512xf32>
    %255 = arith.maximumf %253, %254 : vector<16x512xf32>
    %256 = arith.truncf %255 : vector<16x512xf32> to vector<16x512xbf16>
    %c1_116 = arith.constant 1 : index
    %c0_117 = arith.constant 0 : index
    %c0_118 = arith.constant 0 : index
    %257 = vector.load %arg13[%c1_116, %c0_117, %c0_118] : memref<3x512x256xbf16, #tpu.memory_space<vmem>>, vector<1x512x256xbf16>
    %258 = vector.shape_cast %257 : vector<1x512x256xbf16> to vector<512x256xbf16>
    %cst_119 = arith.constant dense<0.000000e+00> : vector<16x256xf32>
    %259 = tpu.matmul %256, %258, %cst_119 {dimension_numbers = #tpu.dot_dimension_numbers<[1], [0], [0], [1], [0, 0, 1, 1], [], []>} : vector<16x512xbf16>, vector<512x256xbf16>, vector<16x256xf32> -> vector<16x256xf32>
    %c1_120 = arith.constant 1 : index
    %c0_121 = arith.constant 0 : index
    %c0_122 = arith.constant 0 : index
    %260 = vector.load %arg14[%c1_120, %c0_121, %c0_122] : memref<3x1x256xf32, #tpu.memory_space<vmem>>, vector<1x1x256xf32>
    %261 = vector.shape_cast %260 : vector<1x1x256xf32> to vector<1x256xf32>
    %262 = vector.broadcast %261 : vector<1x256xf32> to vector<16x256xf32>
    %263 = arith.addf %259, %262 : vector<16x256xf32>
    %264 = arith.addf %245, %263 : vector<16x256xf32>
    %c1_123 = arith.constant 1 : index
    %c0_124 = arith.constant 0 : index
    %c0_125 = arith.constant 0 : index
    %265 = vector.load %arg15[%c1_123, %c0_124, %c0_125] : memref<3x1x256xf32, #tpu.memory_space<vmem>>, vector<1x1x256xf32>
    %266 = vector.shape_cast %265 : vector<1x1x256xf32> to vector<1x256xf32>
    %c1_126 = arith.constant 1 : index
    %c0_127 = arith.constant 0 : index
    %c0_128 = arith.constant 0 : index
    %267 = vector.load %arg16[%c1_126, %c0_127, %c0_128] : memref<3x1x256xf32, #tpu.memory_space<vmem>>, vector<1x1x256xf32>
    %268 = vector.shape_cast %267 : vector<1x1x256xf32> to vector<1x256xf32>
    %cst_129 = arith.constant dense<0.000000e+00> : vector<16xf32>
    %269 = vector.multi_reduction <add>, %264, %cst_129 [1] : vector<16x256xf32> to vector<16xf32>
    %270 = vector.shape_cast %269 : vector<16xf32> to vector<16x1xf32>
    %cst_130 = arith.constant 2.560000e+02 : f32
    %271 = vector.broadcast %cst_130 : f32 to vector<16x1xf32>
    %272 = arith.divf %270, %271 : vector<16x1xf32>
    %273 = vector.broadcast %272 : vector<16x1xf32> to vector<16x256xf32>
    %274 = arith.subf %264, %273 : vector<16x256xf32>
    %275 = arith.mulf %274, %274 : vector<16x256xf32>
    %cst_131 = arith.constant dense<0.000000e+00> : vector<16xf32>
    %276 = vector.multi_reduction <add>, %275, %cst_131 [1] : vector<16x256xf32> to vector<16xf32>
    %277 = vector.shape_cast %276 : vector<16xf32> to vector<16x1xf32>
    %cst_132 = arith.constant 2.560000e+02 : f32
    %278 = vector.broadcast %cst_132 : f32 to vector<16x1xf32>
    %279 = arith.divf %277, %278 : vector<16x1xf32>
    %cst_133 = arith.constant 9.99999974E-6 : f32
    %280 = vector.broadcast %cst_133 : f32 to vector<16x1xf32>
    %281 = arith.addf %279, %280 : vector<16x1xf32>
    %282 = math.rsqrt %281 : vector<16x1xf32>
    %283 = vector.broadcast %282 : vector<16x1xf32> to vector<16x256xf32>
    %284 = arith.mulf %274, %283 : vector<16x256xf32>
    %285 = vector.broadcast %266 : vector<1x256xf32> to vector<16x256xf32>
    %286 = arith.mulf %284, %285 : vector<16x256xf32>
    %287 = vector.broadcast %268 : vector<1x256xf32> to vector<16x256xf32>
    %288 = arith.addf %286, %287 : vector<16x256xf32>
    %289 = arith.truncf %288 : vector<16x256xf32> to vector<16x256xbf16>
    %c2 = arith.constant 2 : index
    %c0_134 = arith.constant 0 : index
    %c0_135 = arith.constant 0 : index
    %290 = vector.load %arg5[%c2, %c0_134, %c0_135] : memref<3x256x768xbf16, #tpu.memory_space<vmem>>, vector<1x256x768xbf16>
    %291 = vector.shape_cast %290 : vector<1x256x768xbf16> to vector<256x768xbf16>
    %cst_136 = arith.constant dense<0.000000e+00> : vector<16x768xf32>
    %292 = tpu.matmul %289, %291, %cst_136 {dimension_numbers = #tpu.dot_dimension_numbers<[1], [0], [0], [1], [0, 0, 1, 1], [], []>} : vector<16x256xbf16>, vector<256x768xbf16>, vector<16x768xf32> -> vector<16x768xf32>
    %c2_137 = arith.constant 2 : index
    %c0_138 = arith.constant 0 : index
    %c0_139 = arith.constant 0 : index
    %293 = vector.load %arg6[%c2_137, %c0_138, %c0_139] : memref<3x1x768xf32, #tpu.memory_space<vmem>>, vector<1x1x768xf32>
    %294 = vector.shape_cast %293 : vector<1x1x768xf32> to vector<1x768xf32>
    %295 = vector.broadcast %294 : vector<1x768xf32> to vector<16x768xf32>
    %296 = arith.addf %292, %295 : vector<16x768xf32>
    %297 = vector.extract_strided_slice %296 {offsets = [0, 0], sizes = [16, 256], strides = [1, 1]} : vector<16x768xf32> to vector<16x256xf32>
    %298 = vector.extract_strided_slice %296 {offsets = [0, 256], sizes = [16, 256], strides = [1, 1]} : vector<16x768xf32> to vector<16x256xf32>
    %299 = vector.extract_strided_slice %296 {offsets = [0, 512], sizes = [16, 256], strides = [1, 1]} : vector<16x768xf32> to vector<16x256xf32>
    %300 = vector.extract_strided_slice %297 {offsets = [0, 0], sizes = [8, 256], strides = [1, 1]} : vector<16x256xf32> to vector<8x256xf32>
    %301 = vector.extract_strided_slice %297 {offsets = [8, 0], sizes = [8, 256], strides = [1, 1]} : vector<16x256xf32> to vector<8x256xf32>
    %302 = vector.extract_strided_slice %298 {offsets = [0, 0], sizes = [8, 256], strides = [1, 1]} : vector<16x256xf32> to vector<8x256xf32>
    %303 = vector.extract_strided_slice %298 {offsets = [8, 0], sizes = [8, 256], strides = [1, 1]} : vector<16x256xf32> to vector<8x256xf32>
    %304 = vector.extract_strided_slice %299 {offsets = [0, 0], sizes = [8, 256], strides = [1, 1]} : vector<16x256xf32> to vector<8x256xf32>
    %305 = vector.extract_strided_slice %299 {offsets = [8, 0], sizes = [8, 256], strides = [1, 1]} : vector<16x256xf32> to vector<8x256xf32>
    %306 = arith.mulf %300, %302 : vector<8x256xf32>
    %cst_140 = arith.constant dense<0.000000e+00> : vector<8x8xf32>
    %307 = tpu.matmul %306, %11, %cst_140 {dimension_numbers = #tpu.dot_dimension_numbers<[1], [0], [0], [1], [0, 0, 1, 1], [], []>} : vector<8x256xf32>, vector<256x8xf32>, vector<8x8xf32> -> vector<8x8xf32>
    %cst_141 = arith.constant 0.176776692 : f32
    %308 = vector.broadcast %cst_141 : f32 to vector<8x8xf32>
    %309 = arith.mulf %307, %308 : vector<8x8xf32>
    %310 = arith.mulf %300, %303 : vector<8x256xf32>
    %cst_142 = arith.constant dense<0.000000e+00> : vector<8x8xf32>
    %311 = tpu.matmul %310, %11, %cst_142 {dimension_numbers = #tpu.dot_dimension_numbers<[1], [0], [0], [1], [0, 0, 1, 1], [], []>} : vector<8x256xf32>, vector<256x8xf32>, vector<8x8xf32> -> vector<8x8xf32>
    %cst_143 = arith.constant 0.176776692 : f32
    %312 = vector.broadcast %cst_143 : f32 to vector<8x8xf32>
    %313 = arith.mulf %311, %312 : vector<8x8xf32>
    %314 = arith.maximumf %309, %313 : vector<8x8xf32>
    %315 = arith.subf %309, %314 : vector<8x8xf32>
    %316 = math.exp %315 : vector<8x8xf32>
    %317 = arith.subf %313, %314 : vector<8x8xf32>
    %318 = math.exp %317 : vector<8x8xf32>
    %319 = arith.addf %316, %318 : vector<8x8xf32>
    %320 = tpu.reciprocal %319 {approx = true} : vector<8x8xf32> -> vector<8x8xf32>
    %321 = arith.mulf %316, %320 : vector<8x8xf32>
    %cst_144 = arith.constant dense<0.000000e+00> : vector<8x256xf32>
    %322 = tpu.matmul %321, %12, %cst_144 {dimension_numbers = #tpu.dot_dimension_numbers<[1], [0], [0], [1], [0, 0, 1, 1], [], []>} : vector<8x8xf32>, vector<8x256xf32>, vector<8x256xf32> -> vector<8x256xf32>
    %323 = arith.mulf %322, %304 : vector<8x256xf32>
    %324 = arith.mulf %318, %320 : vector<8x8xf32>
    %cst_145 = arith.constant dense<0.000000e+00> : vector<8x256xf32>
    %325 = tpu.matmul %324, %12, %cst_145 {dimension_numbers = #tpu.dot_dimension_numbers<[1], [0], [0], [1], [0, 0, 1, 1], [], []>} : vector<8x8xf32>, vector<8x256xf32>, vector<8x256xf32> -> vector<8x256xf32>
    %326 = arith.mulf %325, %305 : vector<8x256xf32>
    %327 = arith.addf %323, %326 : vector<8x256xf32>
    %328 = arith.mulf %301, %302 : vector<8x256xf32>
    %cst_146 = arith.constant dense<0.000000e+00> : vector<8x8xf32>
    %329 = tpu.matmul %328, %11, %cst_146 {dimension_numbers = #tpu.dot_dimension_numbers<[1], [0], [0], [1], [0, 0, 1, 1], [], []>} : vector<8x256xf32>, vector<256x8xf32>, vector<8x8xf32> -> vector<8x8xf32>
    %cst_147 = arith.constant 0.176776692 : f32
    %330 = vector.broadcast %cst_147 : f32 to vector<8x8xf32>
    %331 = arith.mulf %329, %330 : vector<8x8xf32>
    %332 = arith.mulf %301, %303 : vector<8x256xf32>
    %cst_148 = arith.constant dense<0.000000e+00> : vector<8x8xf32>
    %333 = tpu.matmul %332, %11, %cst_148 {dimension_numbers = #tpu.dot_dimension_numbers<[1], [0], [0], [1], [0, 0, 1, 1], [], []>} : vector<8x256xf32>, vector<256x8xf32>, vector<8x8xf32> -> vector<8x8xf32>
    %cst_149 = arith.constant 0.176776692 : f32
    %334 = vector.broadcast %cst_149 : f32 to vector<8x8xf32>
    %335 = arith.mulf %333, %334 : vector<8x8xf32>
    %336 = arith.maximumf %331, %335 : vector<8x8xf32>
    %337 = arith.subf %331, %336 : vector<8x8xf32>
    %338 = math.exp %337 : vector<8x8xf32>
    %339 = arith.subf %335, %336 : vector<8x8xf32>
    %340 = math.exp %339 : vector<8x8xf32>
    %341 = arith.addf %338, %340 : vector<8x8xf32>
    %342 = tpu.reciprocal %341 {approx = true} : vector<8x8xf32> -> vector<8x8xf32>
    %343 = arith.mulf %338, %342 : vector<8x8xf32>
    %cst_150 = arith.constant dense<0.000000e+00> : vector<8x256xf32>
    %344 = tpu.matmul %343, %12, %cst_150 {dimension_numbers = #tpu.dot_dimension_numbers<[1], [0], [0], [1], [0, 0, 1, 1], [], []>} : vector<8x8xf32>, vector<8x256xf32>, vector<8x256xf32> -> vector<8x256xf32>
    %345 = arith.mulf %344, %304 : vector<8x256xf32>
    %346 = arith.mulf %340, %342 : vector<8x8xf32>
    %cst_151 = arith.constant dense<0.000000e+00> : vector<8x256xf32>
    %347 = tpu.matmul %346, %12, %cst_151 {dimension_numbers = #tpu.dot_dimension_numbers<[1], [0], [0], [1], [0, 0, 1, 1], [], []>} : vector<8x8xf32>, vector<8x256xf32>, vector<8x256xf32> -> vector<8x256xf32>
    %348 = arith.mulf %347, %305 : vector<8x256xf32>
    %349 = arith.addf %345, %348 : vector<8x256xf32>
    %350 = tpu.concatenate %327, %349 in 0 : vector<8x256xf32>, vector<8x256xf32> -> vector<16x256xf32>
    %351 = arith.truncf %350 : vector<16x256xf32> to vector<16x256xbf16>
    %c2_152 = arith.constant 2 : index
    %c0_153 = arith.constant 0 : index
    %c0_154 = arith.constant 0 : index
    %352 = vector.load %arg7[%c2_152, %c0_153, %c0_154] : memref<3x256x256xbf16, #tpu.memory_space<vmem>>, vector<1x256x256xbf16>
    %353 = vector.shape_cast %352 : vector<1x256x256xbf16> to vector<256x256xbf16>
    %cst_155 = arith.constant dense<0.000000e+00> : vector<16x256xf32>
    %354 = tpu.matmul %351, %353, %cst_155 {dimension_numbers = #tpu.dot_dimension_numbers<[1], [0], [0], [1], [0, 0, 1, 1], [], []>} : vector<16x256xbf16>, vector<256x256xbf16>, vector<16x256xf32> -> vector<16x256xf32>
    %c2_156 = arith.constant 2 : index
    %c0_157 = arith.constant 0 : index
    %c0_158 = arith.constant 0 : index
    %355 = vector.load %arg8[%c2_156, %c0_157, %c0_158] : memref<3x1x256xf32, #tpu.memory_space<vmem>>, vector<1x1x256xf32>
    %356 = vector.shape_cast %355 : vector<1x1x256xf32> to vector<1x256xf32>
    %357 = vector.broadcast %356 : vector<1x256xf32> to vector<16x256xf32>
    %358 = arith.addf %354, %357 : vector<16x256xf32>
    %359 = arith.addf %288, %358 : vector<16x256xf32>
    %c2_159 = arith.constant 2 : index
    %c0_160 = arith.constant 0 : index
    %c0_161 = arith.constant 0 : index
    %360 = vector.load %arg9[%c2_159, %c0_160, %c0_161] : memref<3x1x256xf32, #tpu.memory_space<vmem>>, vector<1x1x256xf32>
    %361 = vector.shape_cast %360 : vector<1x1x256xf32> to vector<1x256xf32>
    %c2_162 = arith.constant 2 : index
    %c0_163 = arith.constant 0 : index
    %c0_164 = arith.constant 0 : index
    %362 = vector.load %arg10[%c2_162, %c0_163, %c0_164] : memref<3x1x256xf32, #tpu.memory_space<vmem>>, vector<1x1x256xf32>
    %363 = vector.shape_cast %362 : vector<1x1x256xf32> to vector<1x256xf32>
    %cst_165 = arith.constant dense<0.000000e+00> : vector<16xf32>
    %364 = vector.multi_reduction <add>, %359, %cst_165 [1] : vector<16x256xf32> to vector<16xf32>
    %365 = vector.shape_cast %364 : vector<16xf32> to vector<16x1xf32>
    %cst_166 = arith.constant 2.560000e+02 : f32
    %366 = vector.broadcast %cst_166 : f32 to vector<16x1xf32>
    %367 = arith.divf %365, %366 : vector<16x1xf32>
    %368 = vector.broadcast %367 : vector<16x1xf32> to vector<16x256xf32>
    %369 = arith.subf %359, %368 : vector<16x256xf32>
    %370 = arith.mulf %369, %369 : vector<16x256xf32>
    %cst_167 = arith.constant dense<0.000000e+00> : vector<16xf32>
    %371 = vector.multi_reduction <add>, %370, %cst_167 [1] : vector<16x256xf32> to vector<16xf32>
    %372 = vector.shape_cast %371 : vector<16xf32> to vector<16x1xf32>
    %cst_168 = arith.constant 2.560000e+02 : f32
    %373 = vector.broadcast %cst_168 : f32 to vector<16x1xf32>
    %374 = arith.divf %372, %373 : vector<16x1xf32>
    %cst_169 = arith.constant 9.99999974E-6 : f32
    %375 = vector.broadcast %cst_169 : f32 to vector<16x1xf32>
    %376 = arith.addf %374, %375 : vector<16x1xf32>
    %377 = math.rsqrt %376 : vector<16x1xf32>
    %378 = vector.broadcast %377 : vector<16x1xf32> to vector<16x256xf32>
    %379 = arith.mulf %369, %378 : vector<16x256xf32>
    %380 = vector.broadcast %361 : vector<1x256xf32> to vector<16x256xf32>
    %381 = arith.mulf %379, %380 : vector<16x256xf32>
    %382 = vector.broadcast %363 : vector<1x256xf32> to vector<16x256xf32>
    %383 = arith.addf %381, %382 : vector<16x256xf32>
    %384 = arith.truncf %383 : vector<16x256xf32> to vector<16x256xbf16>
    %c2_170 = arith.constant 2 : index
    %c0_171 = arith.constant 0 : index
    %c0_172 = arith.constant 0 : index
    %385 = vector.load %arg11[%c2_170, %c0_171, %c0_172] : memref<3x256x512xbf16, #tpu.memory_space<vmem>>, vector<1x256x512xbf16>
    %386 = vector.shape_cast %385 : vector<1x256x512xbf16> to vector<256x512xbf16>
    %cst_173 = arith.constant dense<0.000000e+00> : vector<16x512xf32>
    %387 = tpu.matmul %384, %386, %cst_173 {dimension_numbers = #tpu.dot_dimension_numbers<[1], [0], [0], [1], [0, 0, 1, 1], [], []>} : vector<16x256xbf16>, vector<256x512xbf16>, vector<16x512xf32> -> vector<16x512xf32>
    %c2_174 = arith.constant 2 : index
    %c0_175 = arith.constant 0 : index
    %c0_176 = arith.constant 0 : index
    %388 = vector.load %arg12[%c2_174, %c0_175, %c0_176] : memref<3x1x512xf32, #tpu.memory_space<vmem>>, vector<1x1x512xf32>
    %389 = vector.shape_cast %388 : vector<1x1x512xf32> to vector<1x512xf32>
    %390 = vector.broadcast %389 : vector<1x512xf32> to vector<16x512xf32>
    %391 = arith.addf %387, %390 : vector<16x512xf32>
    %cst_177 = arith.constant 0.000000e+00 : f32
    %392 = vector.broadcast %cst_177 : f32 to vector<16x512xf32>
    %393 = arith.maximumf %391, %392 : vector<16x512xf32>
    %394 = arith.truncf %393 : vector<16x512xf32> to vector<16x512xbf16>
    %c2_178 = arith.constant 2 : index
    %c0_179 = arith.constant 0 : index
    %c0_180 = arith.constant 0 : index
    %395 = vector.load %arg13[%c2_178, %c0_179, %c0_180] : memref<3x512x256xbf16, #tpu.memory_space<vmem>>, vector<1x512x256xbf16>
    %396 = vector.shape_cast %395 : vector<1x512x256xbf16> to vector<512x256xbf16>
    %cst_181 = arith.constant dense<0.000000e+00> : vector<16x256xf32>
    %397 = tpu.matmul %394, %396, %cst_181 {dimension_numbers = #tpu.dot_dimension_numbers<[1], [0], [0], [1], [0, 0, 1, 1], [], []>} : vector<16x512xbf16>, vector<512x256xbf16>, vector<16x256xf32> -> vector<16x256xf32>
    %c2_182 = arith.constant 2 : index
    %c0_183 = arith.constant 0 : index
    %c0_184 = arith.constant 0 : index
    %398 = vector.load %arg14[%c2_182, %c0_183, %c0_184] : memref<3x1x256xf32, #tpu.memory_space<vmem>>, vector<1x1x256xf32>
    %399 = vector.shape_cast %398 : vector<1x1x256xf32> to vector<1x256xf32>
    %400 = vector.broadcast %399 : vector<1x256xf32> to vector<16x256xf32>
    %401 = arith.addf %397, %400 : vector<16x256xf32>
    %402 = arith.addf %383, %401 : vector<16x256xf32>
    %c2_185 = arith.constant 2 : index
    %c0_186 = arith.constant 0 : index
    %c0_187 = arith.constant 0 : index
    %403 = vector.load %arg15[%c2_185, %c0_186, %c0_187] : memref<3x1x256xf32, #tpu.memory_space<vmem>>, vector<1x1x256xf32>
    %404 = vector.shape_cast %403 : vector<1x1x256xf32> to vector<1x256xf32>
    %c2_188 = arith.constant 2 : index
    %c0_189 = arith.constant 0 : index
    %c0_190 = arith.constant 0 : index
    %405 = vector.load %arg16[%c2_188, %c0_189, %c0_190] : memref<3x1x256xf32, #tpu.memory_space<vmem>>, vector<1x1x256xf32>
    %406 = vector.shape_cast %405 : vector<1x1x256xf32> to vector<1x256xf32>
    %cst_191 = arith.constant dense<0.000000e+00> : vector<16xf32>
    %407 = vector.multi_reduction <add>, %402, %cst_191 [1] : vector<16x256xf32> to vector<16xf32>
    %408 = vector.shape_cast %407 : vector<16xf32> to vector<16x1xf32>
    %cst_192 = arith.constant 2.560000e+02 : f32
    %409 = vector.broadcast %cst_192 : f32 to vector<16x1xf32>
    %410 = arith.divf %408, %409 : vector<16x1xf32>
    %411 = vector.broadcast %410 : vector<16x1xf32> to vector<16x256xf32>
    %412 = arith.subf %402, %411 : vector<16x256xf32>
    %413 = arith.mulf %412, %412 : vector<16x256xf32>
    %cst_193 = arith.constant dense<0.000000e+00> : vector<16xf32>
    %414 = vector.multi_reduction <add>, %413, %cst_193 [1] : vector<16x256xf32> to vector<16xf32>
    %415 = vector.shape_cast %414 : vector<16xf32> to vector<16x1xf32>
    %cst_194 = arith.constant 2.560000e+02 : f32
    %416 = vector.broadcast %cst_194 : f32 to vector<16x1xf32>
    %417 = arith.divf %415, %416 : vector<16x1xf32>
    %cst_195 = arith.constant 9.99999974E-6 : f32
    %418 = vector.broadcast %cst_195 : f32 to vector<16x1xf32>
    %419 = arith.addf %417, %418 : vector<16x1xf32>
    %420 = math.rsqrt %419 : vector<16x1xf32>
    %421 = vector.broadcast %420 : vector<16x1xf32> to vector<16x256xf32>
    %422 = arith.mulf %412, %421 : vector<16x256xf32>
    %423 = vector.broadcast %404 : vector<1x256xf32> to vector<16x256xf32>
    %424 = arith.mulf %422, %423 : vector<16x256xf32>
    %425 = vector.broadcast %406 : vector<1x256xf32> to vector<16x256xf32>
    %426 = arith.addf %424, %425 : vector<16x256xf32>
    %c0_196 = arith.constant 0 : index
    %c0_197 = arith.constant 0 : index
    %427 = vector.load %arg17[%c0_196, %c0_197] : memref<16x256xf32, #tpu.memory_space<vmem>>, vector<16x256xf32>
    tpu.vector_store %arg17[%c0_196, %c0_197], %426 {strides = array<i32>} : memref<16x256xf32, #tpu.memory_space<vmem>>, vector<16x256xf32>,
    return
  }
}

</mosaic_0001>

<bundles_post_ra>
// kernel: transformer_encoder_forward.1
= control target key start
LH: loop header
LB: loop body
LE: loop exit
PB: predicated region body
PF: predicated region fallthrough
CT: control target
= control target key end

     0   :  { %s13229_s0 = inlined_call_operand.hbm [shape: s32[16,1], index: 0, kind: input, shape index: {}]   ;;  %s13230_s1 = inlined_call_operand.hbm [shape: f32[128,256], index: 1, kind: input, shape index: {}]   ;;  %s13231_s2 = inlined_call_operand.hbm [shape: f32[8,256], index: 2, kind: input, shape index: {}]   ;;  %s13232_s3 = inlined_call_operand.hbm [shape: f32[256,8], index: 3, kind: input, shape index: {}]   ;;  %s13233_s4 = inlined_call_operand.hbm [shape: f32[8,256], index: 4, kind: input, shape index: {}]   ;;  %s13234_s5 = inlined_call_operand.hbm [shape: bf16[3,256,768], index: 5, kind: input, shape index: {}]   ;;  %s13235_s6 = inlined_call_operand.hbm [shape: f32[3,1,768], index: 6, kind: input, shape index: {}]   ;;  %s13236_s7 = inlined_call_operand.hbm [shape: bf16[3,256,256], index: 7, kind: input, shape index: {}]   ;;  %s13237_s8 = inlined_call_operand.hbm [shape: f32[3,1,256], index: 8, kind: input, shape index: {}]   ;;  %s13238_s9 = inlined_call_operand.hbm [shape: f32[3,1,256], index: 9, kind: input, shape index: {}]   ;;  %s13239_s10 = inlined_call_operand.hbm [shape: f32[3,1,256], index: 10, kind: input, shape index: {}]   ;;  %s13240_s11 = inlined_call_operand.hbm [shape: bf16[3,256,512], index: 11, kind: input, shape index: {}]   ;;  %s13241_s12 = inlined_call_operand.hbm [shape: f32[3,1,512], index: 12, kind: input, shape index: {}]   ;;  %s13242_s13 = inlined_call_operand.hbm [shape: bf16[3,512,256], index: 13, kind: input, shape index: {}]   ;;  %s13243_s14 = inlined_call_operand.hbm [shape: f32[3,1,256], index: 14, kind: input, shape index: {}]   ;;  %s13244_s15 = inlined_call_operand.hbm [shape: f32[3,1,256], index: 15, kind: input, shape index: {}]   ;;  %s13245_s16 = inlined_call_operand.hbm [shape: f32[3,1,256], index: 16, kind: input, shape index: {}]   ;;  %s13246_s17 = inlined_call_operand.hbm [shape: f32[16,256], index: 17, kind: output, shape index: {}]  }
   0x1   :  { %13253 = sst [smem:[#allocation40_spill]] %s13229_s0 }
   0x2   :  { %13254 = sst [smem:[#allocation41_spill]] %s13230_s1 }
   0x3   :  { %13255 = sst [smem:[#allocation42_spill]] %s13245_s16 }
   0x4   :  { %13256 = sst [smem:[#allocation43_spill]] %s13246_s17 }
   0x5   :  { %22 = vsyncpa [#allocation3], 0 }
   0x6   :  { %23 = vsyncpa [#allocation6], 0 }
   0x7   :  { %24 = vsyncpa [#allocation9], 0 }
   0x8   :  { %25 = vsyncpa [#allocation12], 0 }
   0x9   :  { %26 = vsyncpa [#allocation15], 0 }
   0xa   :  { %27 = vsyncpa [#allocation18], 0 }
   0xb   :  { %28 = vsyncpa [#allocation21], 0 }
   0xc   :  { %29 = vsyncpa [#allocation24], 0 }
   0xd   :  { %30 = vsyncpa [#allocation27], 0 }
   0xe   :  { %31 = vsyncpa [#allocation4], 0  ;;  %s12011_s24 = smov [#allocation5]   ;;  %s13257_s28 = sld [smem:[#allocation41_spill]] }
   0xf   :  { %s49_s25 = sshll.u32 %s12011_s24, 4  ;;  %s50_s25 = int_to_ptr.vmem [resolvable:$true] %s49_s25 }
  0x14   :  { %s11595_s29 = scalar_lea.hbm %s13257_s28, 4096 }
  0x15   :  { %p11596_p0 = scmp.ne.s32.totalorder %s13257_s28, %s11595_s29  ;;  %p11599_p1 = scmp.lt.u32.totalorder %s11595_s29, %s13257_s28 }
  0x17   :  { %p11601_p2 = pnand %p11599_p1, %p11596_p0 }
  0x19   :  { %11604 = shalt.err (!%p11601_p2)
}
  0x1a   :  { %s11605_s1 = scalar_lea.vmem %s50_s25, 4096  ;;  %p11610_p4 = scmp.lt.s32.totalorder %s50_s25, %s50_s25 }
  0x1b   :  { %p11606_p3 = scmp.ne.s32.totalorder %s50_s25, %s11605_s1  ;;  %p11611_p5 = scmp.lt.s32.totalorder %s11605_s1, %s11605_s1 }
  0x1d   :  { %p11612_p6 = por %p11611_p5, %p11610_p4 }
  0x1f   :  { %p11613_p7 = pnand %p11612_p6, %p11606_p3 }
  0x21   :  { %11616 = shalt.err (!%p11613_p7)
}
  0x22   :  { %s13251_s20 = smov 256   ;;  %s12013_s21 = smov 16  }
  0x23   :  { %55 = dma.hbm_to_vmem [thread:$0]  %s13257_s28, 4096, %s50_s25, [#allocation6], %s13251_s20, %s13251_s20, %s12013_s21  }
  0x24   :  { %s12014_s24 = smov [#allocation8]   ;;  %s12015_s27 = smov [#allocation11]  }
  0x25   :  { %s71_s26 = sshll.u32 %s12014_s24, 4  ;;  %s93_s29 = sshll.u32 %s12015_s27, 4  ;;  %s72_s26 = int_to_ptr.vmem [resolvable:$true] %s71_s26  ;;  %s94_s29 = int_to_ptr.vmem [resolvable:$true] %s93_s29 }
  0x26   :  { %s11617_s18 = scalar_lea.hbm %s13232_s3, 4096 }
  0x27   :  { %p11618_p8 = scmp.ne.s32.totalorder %s13232_s3, %s11617_s18  ;;  %p11621_p9 = scmp.lt.u32.totalorder %s11617_s18, %s13232_s3 }
  0x29   :  { %p11623_p10 = pnand %p11621_p9, %p11618_p8 }
  0x2b   :  { %11626 = shalt.err (!%p11623_p10)
}
  0x2c   :  { %s11627_s25 = scalar_lea.vmem %s72_s26, 4096  ;;  %p11632_p12 = scmp.lt.s32.totalorder %s72_s26, %s72_s26 }
  0x2d   :  { %p11628_p11 = scmp.ne.s32.totalorder %s72_s26, %s11627_s25  ;;  %p11633_p13 = scmp.lt.s32.totalorder %s11627_s25, %s11627_s25 }
  0x2f   :  { %p11634_p0 = por %p11633_p13, %p11632_p12 }
  0x31   :  { %p11635_p1 = pnand %p11634_p0, %p11628_p11 }
  0x33   :  { %11638 = shalt.err (!%p11635_p1)
}
  0x34   :  { %s12016_s28 = smov 128   ;;  %s12017_s22 = smov 8  }
  0x35   :  { %77 = dma.hbm_to_vmem [thread:$0]  %s13232_s3, 4096, %s72_s26, [#allocation9], %s12016_s28, %s12016_s28, %s12017_s22  }
  0x36   :  { %s11639_s27 = scalar_lea.hbm %s13234_s5, 36864 }
  0x37   :  { %p11640_p2 = scmp.ne.s32.totalorder %s13234_s5, %s11639_s27  ;;  %p11643_p3 = scmp.lt.u32.totalorder %s11639_s27, %s13234_s5 }
  0x39   :  { %p11645_p4 = pnand %p11643_p3, %p11640_p2 }
  0x3b   :  { %11648 = shalt.err (!%p11645_p4)
}
  0x3c   :  { %s11649_s1 = scalar_lea.vmem %s94_s29, 36864  ;;  %p11654_p6 = scmp.lt.s32.totalorder %s94_s29, %s94_s29 }
  0x3d   :  { %p11650_p5 = scmp.ne.s32.totalorder %s94_s29, %s11649_s1  ;;  %p11655_p7 = scmp.lt.s32.totalorder %s11649_s1, %s11649_s1 }
  0x3f   :  { %p11656_p8 = por %p11655_p7, %p11654_p6 }
  0x41   :  { %p11657_p9 = pnand %p11656_p8, %p11650_p5 }
  0x43   :  { %11660 = shalt.err (!%p11657_p9)
}
  0x44   :  { %s12018_s3 = smov 384   ;;  %s12019_s26 = smov 24  }
  0x45   :  { %99 = dma.hbm_to_vmem [thread:$0]  %s13234_s5, 36864, %s94_s29, [#allocation12], %s12018_s3, %s12018_s3, %s12019_s26  }
  0x46   :  { %s12020_s24 = smov [#allocation14]   ;;  %s11661_s0 = scalar_lea.hbm %s13236_s7, 12288 }
  0x47   :  { %s117_s16 = sshll.u32 %s12020_s24, 4  ;;  %p11662_p10 = scmp.ne.s32.totalorder %s13236_s7, %s11661_s0  ;;  %s118_s16 = int_to_ptr.vmem [resolvable:$true] %s117_s16 }
  0x48   :  { %p11665_p11 = scmp.lt.u32.totalorder %s11661_s0, %s13236_s7 }
  0x4a   :  { %p11667_p12 = pnand %p11665_p11, %p11662_p10 }
  0x4c   :  { %11670 = shalt.err (!%p11667_p12)
}
  0x4d   :  { %s11671_s20 = scalar_lea.vmem %s118_s16, 12288  ;;  %p11676_p0 = scmp.lt.s32.totalorder %s118_s16, %s118_s16 }
  0x4e   :  { %p11672_p13 = scmp.ne.s32.totalorder %s118_s16, %s11671_s20  ;;  %p11677_p1 = scmp.lt.s32.totalorder %s11671_s20, %s11671_s20 }
  0x50   :  { %p11678_p2 = por %p11677_p1, %p11676_p0 }
  0x52   :  { %p11679_p3 = pnand %p11678_p2, %p11672_p13 }
  0x54   :  { %11682 = shalt.err (!%p11679_p3)
}
  0x55   :  { %123 = dma.hbm_to_vmem [thread:$0]  %s13236_s7, 12288, %s118_s16, [#allocation15], %s12016_s28, %s12016_s28, %s12017_s22  }
  0x56   :  { %s12021_s3 = smov [#allocation17]   ;;  %s12022_s25 = smov [#allocation20]  }
  0x57   :  { %s141_s26 = sshll.u32 %s12021_s3, 4  ;;  %s165_s23 = sshll.u32 %s12022_s25, 4  ;;  %s142_s26 = int_to_ptr.vmem [resolvable:$true] %s141_s26  ;;  %s12191_s23 = int_to_ptr.vmem [resolvable:$true] %s165_s23 }
  0x58   :  { %s11683_s20 = scalar_lea.hbm %s13238_s9, 96 }
  0x59   :  { %p11684_p4 = scmp.ne.s32.totalorder %s13238_s9, %s11683_s20  ;;  %p11687_p5 = scmp.lt.u32.totalorder %s11683_s20, %s13238_s9 }
  0x5b   :  { %p11689_p6 = pnand %p11687_p5, %p11684_p4 }
  0x5d   :  { %11692 = shalt.err (!%p11689_p6)
}
  0x5e   :  { %s11693_s7 = scalar_lea.vmem %s142_s26, 96  ;;  %p11698_p8 = scmp.lt.s32.totalorder %s142_s26, %s142_s26 }
  0x5f   :  { %p11694_p7 = scmp.ne.s32.totalorder %s142_s26, %s11693_s7  ;;  %p11699_p9 = scmp.lt.s32.totalorder %s11693_s7, %s11693_s7 }
  0x61   :  { %p11700_p10 = por %p11699_p9, %p11698_p8 }
  0x63   :  { %p11701_p11 = pnand %p11700_p10, %p11694_p7 }
  0x65   :  { %11704 = shalt.err (!%p11701_p11)
}
  0x66   :  { %s12023_s16 = smov 32   ;;  %s12024_s19 = smov 2  }
  0x67   :  { %147 = dma.hbm_to_vmem [thread:$0]  %s13238_s9, 96, %s142_s26, [#allocation18], %s12023_s16, %s12023_s16, %s12024_s19  }
  0x68   :  { %s11705_s25 = scalar_lea.hbm %s13240_s11, 24576 }
  0x69   :  { %p11706_p12 = scmp.ne.s32.totalorder %s13240_s11, %s11705_s25  ;;  %p11709_p13 = scmp.lt.u32.totalorder %s11705_s25, %s13240_s11 }
  0x6b   :  { %p11711_p0 = pnand %p11709_p13, %p11706_p12 }
  0x6d   :  { %11714 = shalt.err (!%p11711_p0)
}
  0x6e   :  { %s11715_s0 = scalar_lea.vmem %s12191_s23, 24576  ;;  %p11720_p2 = scmp.lt.s32.totalorder %s12191_s23, %s12191_s23 }
  0x6f   :  { %p11716_p1 = scmp.ne.s32.totalorder %s12191_s23, %s11715_s0  ;;  %p11721_p3 = scmp.lt.s32.totalorder %s11715_s0, %s11715_s0 }
  0x71   :  { %p11722_p4 = por %p11721_p3, %p11720_p2 }
  0x73   :  { %p11723_p5 = pnand %p11722_p4, %p11716_p1 }
  0x75   :  { %11726 = shalt.err (!%p11723_p5)
}
  0x76   :  { %s13258_s9 = smov 256   ;;  %s12025_s18 = smov [#allocation23]  }
  0x77   :  { %171 = dma.hbm_to_vmem [thread:$0]  %s13240_s11, 24576, %s12191_s23, [#allocation21], %s13258_s9, %s13258_s9, %s12013_s21  }
  0x78   :  { %s189_s7 = sshll.u32 %s12025_s18, 4  ;;  %s12026_s1 = smov [#allocation26]   ;;  %s190_s7 = int_to_ptr.vmem [resolvable:$true] %s189_s7 }
  0x79   :  { %s213_s5 = sshll.u32 %s12026_s1, 4  ;;  %s11727_s25 = scalar_lea.hbm %s13242_s13, 24576  ;;  %s12228_s5 = int_to_ptr.vmem [resolvable:$true] %s213_s5 }
  0x7a   :  { %p11728_p6 = scmp.ne.s32.totalorder %s13242_s13, %s11727_s25  ;;  %p11731_p7 = scmp.lt.u32.totalorder %s11727_s25, %s13242_s13 }
  0x7c   :  { %p11733_p8 = pnand %p11731_p7, %p11728_p6 }
  0x7e   :  { %11736 = shalt.err (!%p11733_p8)
}
  0x7f   :  { %s11737_s11 = scalar_lea.vmem %s190_s7, 24576  ;;  %p11742_p10 = scmp.lt.s32.totalorder %s190_s7, %s190_s7 }
  0x80   :  { %p11738_p9 = scmp.ne.s32.totalorder %s190_s7, %s11737_s11  ;;  %p11743_p11 = scmp.lt.s32.totalorder %s11737_s11, %s11737_s11 }
  0x82   :  { %p11744_p12 = por %p11743_p11, %p11742_p10 }
  0x84   :  { %p11745_p13 = pnand %p11744_p12, %p11738_p9 }
  0x86   :  { %11748 = shalt.err (!%p11745_p13)
}
  0x87   :  { %195 = dma.hbm_to_vmem [thread:$0]  %s13242_s13, 24576, %s190_s7, [#allocation24], %s12016_s28, %s12016_s28, %s12017_s22  }
  0x88   :  { %s11749_s18 = scalar_lea.hbm %s13244_s15, 96 }
  0x89   :  { %p11750_p0 = scmp.ne.s32.totalorder %s13244_s15, %s11749_s18  ;;  %p11753_p1 = scmp.lt.u32.totalorder %s11749_s18, %s13244_s15 }
  0x8b   :  { %p11755_p2 = pnand %p11753_p1, %p11750_p0 }
  0x8d   :  { %11758 = shalt.err (!%p11755_p2)
}
  0x8e   :  { %s11759_s24 = scalar_lea.vmem %s12228_s5, 96  ;;  %p11764_p4 = scmp.lt.s32.totalorder %s12228_s5, %s12228_s5 }
  0x8f   :  { %p11760_p3 = scmp.ne.s32.totalorder %s12228_s5, %s11759_s24  ;;  %p11765_p5 = scmp.lt.s32.totalorder %s11759_s24, %s11759_s24 }
  0x91   :  { %p11766_p6 = por %p11765_p5, %p11764_p4 }
  0x93   :  { %p11767_p7 = pnand %p11766_p6, %p11760_p3 }
  0x95   :  { %11770 = shalt.err (!%p11767_p7)
}
  0x96   :  { %219 = dma.hbm_to_vmem [thread:$0]  %s13244_s15, 96, %s12228_s5, [#allocation27], %s12023_s16, %s12023_s16, %s12024_s19  }
  0x97   :  { %s12027_s17 = smov [#allocation2]   ;;  %s12028_s27 = smov [#allocation7]  }
  0x98   :  { %s37_s20 = sshll.u32 %s12027_s17, 4  ;;  %s62_s11 = sshll.u32 %s12028_s27, 4  ;;  %s38_s20 = int_to_ptr.vmem [resolvable:$true] %s37_s20  ;;  %s63_s11 = int_to_ptr.vmem [resolvable:$true] %s62_s11 }
  0x99   :  { %s13259_s26 = sld [smem:[#allocation40_spill]] }
  0x9f   :  { %s11771_s30 = scalar_lea.hbm %s13259_s26, 256 }
  0xa0   :  { %p11772_p8 = scmp.ne.s32.totalorder %s13259_s26, %s11771_s30  ;;  %p11775_p9 = scmp.lt.u32.totalorder %s11771_s30, %s13259_s26 }
  0xa2   :  { %p11777_p10 = pnand %p11775_p9, %p11772_p8 }
  0xa4   :  { %11780 = shalt.err (!%p11777_p10)
}
  0xa5   :  { %s11781_s15 = scalar_lea.vmem %s38_s20, 256  ;;  %p11786_p12 = scmp.lt.s32.totalorder %s38_s20, %s38_s20 }
  0xa6   :  { %p11782_p11 = scmp.ne.s32.totalorder %s38_s20, %s11781_s15  ;;  %p11787_p13 = scmp.lt.s32.totalorder %s11781_s15, %s11781_s15 }
  0xa8   :  { %p11788_p0 = por %p11787_p13, %p11786_p12 }
  0xaa   :  { %p11789_p1 = pnand %p11788_p0, %p11782_p11 }
  0xac   :  { %11792 = shalt.err (!%p11789_p1)
}
  0xad   :  { %43 = dma.hbm_to_vmem [thread:$0]  %s13259_s26, 256, %s38_s20, [#allocation3], %s12016_s28, %s12016_s28, %s12017_s22  }
  0xae   :  { %s11793_s7 = scalar_lea.hbm %s13231_s2, 256 }
  0xaf   :  { %p11794_p2 = scmp.ne.s32.totalorder %s13231_s2, %s11793_s7  ;;  %p11797_p3 = scmp.lt.u32.totalorder %s11793_s7, %s13231_s2 }
  0xb1   :  { %p11799_p4 = pnand %p11797_p3, %p11794_p2 }
  0xb3   :  { %11802 = shalt.err (!%p11799_p4)
}
  0xb4   :  { %s11803_s30 = scalar_lea.vmem %s63_s11, 256  ;;  %p11808_p6 = scmp.lt.s32.totalorder %s63_s11, %s63_s11 }
  0xb5   :  { %p11804_p5 = scmp.ne.s32.totalorder %s63_s11, %s11803_s30  ;;  %p11809_p7 = scmp.lt.s32.totalorder %s11803_s30, %s11803_s30 }
  0xb7   :  { %p11810_p8 = por %p11809_p7, %p11808_p6 }
  0xb9   :  { %p11811_p9 = pnand %p11810_p8, %p11804_p5 }
  0xbb   :  { %11814 = shalt.err (!%p11811_p9)
}
  0xbc   :  { %65 = dma.hbm_to_vmem [thread:$0]  %s13231_s2, 256, %s63_s11, [#allocation6]  }
  0xbd   :  { %s12029_s20 = smov [#allocation10]   ;;  %s12030_s18 = smov [#allocation13]  }
  0xbe   :  { %s84_s26 = sshll.u32 %s12029_s20, 4  ;;  %s105_s1 = sshll.u32 %s12030_s18, 4  ;;  %s85_s26 = int_to_ptr.vmem [resolvable:$true] %s84_s26  ;;  %s12292_s1 = int_to_ptr.vmem [resolvable:$true] %s105_s1 }
  0xbf   :  { %s11815_s15 = scalar_lea.hbm %s13233_s4, 256 }
  0xc0   :  { %p11816_p10 = scmp.ne.s32.totalorder %s13233_s4, %s11815_s15  ;;  %p11819_p11 = scmp.lt.u32.totalorder %s11815_s15, %s13233_s4 }
  0xc2   :  { %p11821_p12 = pnand %p11819_p11, %p11816_p10 }
  0xc4   :  { %11824 = shalt.err (!%p11821_p12)
}
  0xc5   :  { %s11825_s2 = scalar_lea.vmem %s85_s26, 256  ;;  %p11830_p0 = scmp.lt.s32.totalorder %s85_s26, %s85_s26 }
  0xc6   :  { %p11826_p13 = scmp.ne.s32.totalorder %s85_s26, %s11825_s2  ;;  %p11831_p1 = scmp.lt.s32.totalorder %s11825_s2, %s11825_s2 }
  0xc8   :  { %p11832_p2 = por %p11831_p1, %p11830_p0 }
  0xca   :  { %p11833_p3 = pnand %p11832_p2, %p11826_p13 }
  0xcc   :  { %11836 = shalt.err (!%p11833_p3)
}
  0xcd   :  { %87 = dma.hbm_to_vmem [thread:$0]  %s13233_s4, 256, %s85_s26, [#allocation9]  }
  0xce   :  { %s11837_s23 = scalar_lea.hbm %s13235_s6, 288 }
  0xcf   :  { %p11838_p4 = scmp.ne.s32.totalorder %s13235_s6, %s11837_s23  ;;  %p11841_p5 = scmp.lt.u32.totalorder %s11837_s23, %s13235_s6 }
  0xd1   :  { %p11843_p6 = pnand %p11841_p5, %p11838_p4 }
  0xd3   :  { %11846 = shalt.err (!%p11843_p6)
}
  0xd4   :  { %s11847_s20 = scalar_lea.vmem %s12292_s1, 288  ;;  %p11852_p8 = scmp.lt.s32.totalorder %s12292_s1, %s12292_s1 }
  0xd5   :  { %p11848_p7 = scmp.ne.s32.totalorder %s12292_s1, %s11847_s20  ;;  %p11853_p9 = scmp.lt.s32.totalorder %s11847_s20, %s11847_s20 }
  0xd7   :  { %p11854_p10 = por %p11853_p9, %p11852_p8 }
  0xd9   :  { %p11855_p11 = pnand %p11854_p10, %p11848_p7 }
  0xdb   :  { %11858 = shalt.err (!%p11855_p11)
}
  0xdc   :  { %s12031_s4 = smov 96   ;;  %s12032_s26 = smov 6  }
  0xdd   :  { %111 = dma.hbm_to_vmem [thread:$0]  %s13235_s6, 288, %s12292_s1, [#allocation12], %s12031_s4, %s12031_s4, %s12032_s26  }
  0xde   :  { %s12033_s3 = smov [#allocation16]   ;;  %s12034_s5 = smov [#allocation19]  }
  0xdf   :  { %s129_s15 = sshll.u32 %s12033_s3, 4  ;;  %s153_s25 = sshll.u32 %s12034_s5, 4  ;;  %s130_s15 = int_to_ptr.vmem [resolvable:$true] %s129_s15  ;;  %s12323_s25 = int_to_ptr.vmem [resolvable:$true] %s153_s25 }
  0xe0   :  { %s11859_s2 = scalar_lea.hbm %s13237_s8, 96 }
  0xe1   :  { %p11860_p12 = scmp.ne.s32.totalorder %s13237_s8, %s11859_s2  ;;  %p11863_p13 = scmp.lt.u32.totalorder %s11859_s2, %s13237_s8 }
  0xe3   :  { %p11865_p0 = pnand %p11863_p13, %p11860_p12 }
  0xe5   :  { %11868 = shalt.err (!%p11865_p0)
}
  0xe6   :  { %s11869_s6 = scalar_lea.vmem %s130_s15, 96  ;;  %p11874_p2 = scmp.lt.s32.totalorder %s130_s15, %s130_s15 }
  0xe7   :  { %p11870_p1 = scmp.ne.s32.totalorder %s130_s15, %s11869_s6  ;;  %p11875_p3 = scmp.lt.s32.totalorder %s11869_s6, %s11869_s6 }
  0xe9   :  { %p11876_p4 = por %p11875_p3, %p11874_p2 }
  0xeb   :  { %p11877_p5 = pnand %p11876_p4, %p11870_p1 }
  0xed   :  { %11880 = shalt.err (!%p11877_p5)
}
  0xee   :  { %135 = dma.hbm_to_vmem [thread:$0]  %s13237_s8, 96, %s130_s15, [#allocation15], %s12023_s16, %s12023_s16, %s12024_s19  }
  0xef   :  { %s11881_s28 = scalar_lea.hbm %s13239_s10, 96 }
  0xf0   :  { %p11882_p6 = scmp.ne.s32.totalorder %s13239_s10, %s11881_s28  ;;  %p11885_p7 = scmp.lt.u32.totalorder %s11881_s28, %s13239_s10 }
  0xf2   :  { %p11887_p8 = pnand %p11885_p7, %p11882_p6 }
  0xf4   :  { %11890 = shalt.err (!%p11887_p8)
}
  0xf5   :  { %s11891_s18 = scalar_lea.vmem %s12323_s25, 96  ;;  %p11896_p10 = scmp.lt.s32.totalorder %s12323_s25, %s12323_s25 }
  0xf6   :  { %p11892_p9 = scmp.ne.s32.totalorder %s12323_s25, %s11891_s18  ;;  %p11897_p11 = scmp.lt.s32.totalorder %s11891_s18, %s11891_s18 }
  0xf8   :  { %p11898_p12 = por %p11897_p11, %p11896_p10 }
  0xfa   :  { %p11899_p13 = pnand %p11898_p12, %p11892_p9 }
  0xfc   :  { %11902 = shalt.err (!%p11899_p13)
}
  0xfd   :  { %159 = dma.hbm_to_vmem [thread:$0]  %s13239_s10, 96, %s12323_s25, [#allocation18], %s12023_s16, %s12023_s16, %s12024_s19  }
  0xfe   :  { %s12035_s3 = smov [#allocation22]   ;;  %s11903_s13 = scalar_lea.hbm %s13241_s12, 192 }
  0xff   :  { %s177_s15 = sshll.u32 %s12035_s3, 4  ;;  %p11904_p0 = scmp.ne.s32.totalorder %s13241_s12, %s11903_s13  ;;  %s178_s15 = int_to_ptr.vmem [resolvable:$true] %s177_s15 }
 0x100   :  { %p11907_p1 = scmp.lt.u32.totalorder %s11903_s13, %s13241_s12 }
 0x102   :  { %p11909_p2 = pnand %p11907_p1, %p11904_p0 }
 0x104   :  { %11912 = shalt.err (!%p11909_p2)
}
 0x105   :  { %s11913_s27 = scalar_lea.vmem %s178_s15, 192  ;;  %p11918_p4 = scmp.lt.s32.totalorder %s178_s15, %s178_s15 }
 0x106   :  { %p11914_p3 = scmp.ne.s32.totalorder %s178_s15, %s11913_s27  ;;  %p11919_p5 = scmp.lt.s32.totalorder %s11913_s27, %s11913_s27 }
 0x108   :  { %p11920_p6 = por %p11919_p5, %p11918_p4 }
 0x10a   :  { %p11921_p7 = pnand %p11920_p6, %p11914_p3 }
 0x10c   :  { %11924 = shalt.err (!%p11921_p7)
}
 0x10d   :  { %s12036_s10 = smov 64   ;;  %s12037_s25 = smov 4  }
 0x10e   :  { %183 = dma.hbm_to_vmem [thread:$0]  %s13241_s12, 192, %s178_s15, [#allocation21], %s12036_s10, %s12036_s10, %s12037_s25  }
 0x10f   :  { %s12038_s23 = smov [#allocation25]   ;;  %s12039_s30 = smov [#allocation28]  }
 0x110   :  { %s201_s0 = sshll.u32 %s12038_s23, 4  ;;  %s225_s28 = sshll.u32 %s12039_s30, 4  ;;  %s202_s0 = int_to_ptr.vmem [resolvable:$true] %s201_s0  ;;  %s226_s28 = int_to_ptr.vmem [resolvable:$true] %s225_s28 }
 0x111   :  { %s11925_s4 = scalar_lea.hbm %s13243_s14, 96 }
 0x112   :  { %p11926_p8 = scmp.ne.s32.totalorder %s13243_s14, %s11925_s4  ;;  %p11929_p9 = scmp.lt.u32.totalorder %s11925_s4, %s13243_s14 }
 0x114   :  { %p11931_p10 = pnand %p11929_p9, %p11926_p8 }
 0x116   :  { %11934 = shalt.err (!%p11931_p10)
}
 0x117   :  { %s11935_s12 = scalar_lea.vmem %s202_s0, 96  ;;  %p11940_p12 = scmp.lt.s32.totalorder %s202_s0, %s202_s0 }
 0x118   :  { %p11936_p11 = scmp.ne.s32.totalorder %s202_s0, %s11935_s12  ;;  %p11941_p13 = scmp.lt.s32.totalorder %s11935_s12, %s11935_s12 }
 0x11a   :  { %p11942_p0 = por %p11941_p13, %p11940_p12 }
 0x11c   :  { %p11943_p1 = pnand %p11942_p0, %p11936_p11 }
 0x11e   :  { %11946 = shalt.err (!%p11943_p1)
}
 0x11f   :  { %207 = dma.hbm_to_vmem [thread:$0]  %s13243_s14, 96, %s202_s0, [#allocation24], %s12023_s16, %s12023_s16, %s12024_s19  }
 0x120   :  { %s13260_s13 = sld [smem:[#allocation42_spill]] }
 0x126   :  { %s11947_s2 = scalar_lea.hbm %s13260_s13, 96 }
 0x127   :  { %p11948_p2 = scmp.ne.s32.totalorder %s13260_s13, %s11947_s2  ;;  %p11951_p3 = scmp.lt.u32.totalorder %s11947_s2, %s13260_s13 }
 0x129   :  { %p11953_p4 = pnand %p11951_p3, %p11948_p2 }
 0x12b   :  { %11956 = shalt.err (!%p11953_p4)
}
 0x12c   :  { %s11957_s10 = scalar_lea.vmem %s226_s28, 96  ;;  %p11962_p6 = scmp.lt.s32.totalorder %s226_s28, %s226_s28 }
 0x12d   :  { %p11958_p5 = scmp.ne.s32.totalorder %s226_s28, %s11957_s10  ;;  %p11963_p7 = scmp.lt.s32.totalorder %s11957_s10, %s11957_s10 }
 0x12f   :  { %p11964_p8 = por %p11963_p7, %p11962_p6 }
 0x131   :  { %p11965_p9 = pnand %p11964_p8, %p11958_p5 }
 0x133   :  { %11968 = shalt.err (!%p11965_p9)
}
 0x134   :  { %231 = dma.hbm_to_vmem [thread:$0]  %s13260_s13, 96, %s226_s28, [#allocation27], %s12023_s16, %s12023_s16, %s12024_s19  }
 0x135   :  { %11991 = dma.done.wait [#allocation3], 256  }
 0x136   :  { %11992 = vsyncadd [#allocation3], 4294967040 }
 0x137   :  { %11993 = dma.done.wait [#allocation6], 4352  }
 0x138   :  { %11994 = vsyncadd [#allocation6], 4294962944 }
 0x139   :  { %11995 = dma.done.wait [#allocation9], 4352  }
 0x13a   :  { %11996 = vsyncadd [#allocation9], 4294962944 }
 0x13b   :  { %11997 = dma.done.wait [#allocation12], 37152  }
 0x13c   :  { %11998 = vsyncadd [#allocation12], 4294930144 }
 0x13d   :  { %11999 = dma.done.wait [#allocation15], 12384  }
 0x13e   :  { %12000 = vsyncadd [#allocation15], 4294954912 }
 0x13f   :  { %12001 = dma.done.wait [#allocation18], 192  }
 0x140   :  { %12002 = vsyncadd [#allocation18], 4294967104 }
 0x141   :  { %12003 = dma.done.wait [#allocation21], 24768  }
 0x142   :  { %12004 = vsyncadd [#allocation21], 4294942528 }
 0x143   :  { %12005 = dma.done.wait [#allocation24], 24672  }
 0x144   :  { %12006 = vsyncadd [#allocation24], 4294942624 }
 0x145   :  { %12007 = dma.done.wait [#allocation27], 192  }
 0x146   :  { %12008 = vsyncadd [#allocation27], 4294967104  ;;  %v12040_v0 = vmov 0   ;;  %v283_v1 = vld [vmem:[#allocation2] sm:$0xff]  ;;  %v284_v2 = vld [vmem:[#allocation2 + $0x8] sm:$0xff]  ;;  %v12041_v7 = vmov 0.0  }
 0x147   :  { %10378 = vset.pattern.permute.xlu0 %v12040_v0  ;;  %v300_v3 = vld [vmem:[#allocation5 + $0x8] sm:$0xff]  ;;  %v302_v4 = vld [vmem:[#allocation5 + $0x18] sm:$0xff]  ;;  %v299_v5 = vld [vmem:[#allocation5] sm:$0xff]  ;;  %397 = vmatprep.mubr.f32.mxu1 %v12041_v7  ;;  %vm1339_vm2 = vcmask 64512   ;;  %s12043_s16 = smov [#allocation29]  }
 0x148   :  { %288 = vperm.xlu0 %10378, %v283_v1   ;;  %v301_v6 = vld [vmem:[#allocation5 + $0x10] sm:$0xff]  ;;  %v9905_v8 = vpack.c.bf16 %v302_v4, %v300_v3  ;;  %v304_v10 = vld [vmem:[#allocation5 + $0x28] sm:$0xff]  ;;  %v306_v11 = vld [vmem:[#allocation5 + $0x38] sm:$0xff]  ;;  %s8681_s19 = sshll.u32 %s12043_s16, 4  ;;  %s8682_s19 = int_to_ptr.vmem [resolvable:$true] %s8681_s19 }
 0x149   :  { %v9907_v9 = vpack.c.bf16 %v301_v6, %v299_v5  ;;  %v303_v12 = vld [vmem:[#allocation5 + $0x20] sm:$0xff]  ;;  %v9909_v13 = vpack.c.bf16 %v306_v11, %v304_v10  ;;  %v305_v14 = vld [vmem:[#allocation5 + $0x30] sm:$0xff]  ;;  %v308_v15 = vld [vmem:[#allocation5 + $0x48] sm:$0xff]  ;;  %s11969_s6 = scalar_lea.vmem %s8682_s19, 512  ;;  %p11974_p11 = scmp.lt.s32.totalorder %s8682_s19, %s8682_s19 }
 0x14a   :  { %v310_v16 = vld [vmem:[#allocation5 + $0x58] sm:$0xff]  ;;  %9906 = vmatprep.subr.bf16.mxu1 %v9905_v8  ;;  %v9911_v17 = vpack.c.bf16 %v305_v14, %v303_v12  ;;  %v307_v19 = vld [vmem:[#allocation5 + $0x40] sm:$0xff]  ;;  %v309_v20 = vld [vmem:[#allocation5 + $0x50] sm:$0xff]  ;;  %p11970_p10 = scmp.ne.s32.totalorder %s8682_s19, %s11969_s6  ;;  %p11975_p12 = scmp.lt.s32.totalorder %s11969_s6, %s11969_s6 }
 0x14b   :  { %9908 = vmatpush1.bf16.msra.mxu1 %v9907_v9  ;;  %v9913_v18 = vpack.c.bf16 %v310_v16, %v308_v15  ;;  %v312_v21 = vld [vmem:[#allocation5 + $0x68] sm:$0xff]  ;;  %v314_v22 = vld [vmem:[#allocation5 + $0x78] sm:$0xff]  ;;  %v9915_v23 = vpack.c.bf16 %v309_v20, %v307_v19  ;;  %v311_v25 = vld [vmem:[#allocation5 + $0x60] sm:$0xff] }
 0x14c   :  { %291 = vperm.xlu0 %10378, %v284_v2   ;;  %9910 = vmatprep.subr.bf16.mxu1 %v9909_v13  ;;  %v9917_v24 = vpack.c.bf16 %v314_v22, %v312_v21  ;;  %v313_v26 = vld [vmem:[#allocation5 + $0x70] sm:$0xff]  ;;  %v316_v27 = vld [vmem:[#allocation5 + $0x88] sm:$0xff]  ;;  %v318_v28 = vld [vmem:[#allocation5 + $0x98] sm:$0xff]  ;;  %p11976_p13 = por %p11975_p12, %p11974_p11 }
 0x14d   :  { %v315_v29 = vld [vmem:[#allocation5 + $0x80] sm:$0xff]  ;;  %v317_v30 = vld [vmem:[#allocation5 + $0x90] sm:$0xff]  ;;  %v9919_v31 = vpack.c.bf16 %v313_v26, %v311_v25  ;;  %v9921_v34 = vpack.c.bf16 %v318_v28, %v316_v27  ;;  %v320_v35 = vld [vmem:[#allocation5 + $0xa8] sm:$0xff] }
 0x14e   :  { %v10382_v32 = vld [vmem:[#allocation11 + $0xc] ss:$24 sps:$4 sm:$0xff]   ;;  %v10384_v33 = vld [vmem:[#allocation11 + $0x8] ss:$24 sps:$4 sm:$0xff]   ;;  %v322_v36 = vld [vmem:[#allocation5 + $0xb8] sm:$0xff]  ;;  %v9923_v40 = vpack.c.bf16 %v317_v30, %v315_v29  ;;  %p11977_p0 = pnand %p11976_p13, %p11970_p10 }
 0x14f   :  { %9912 = vmatpush1.bf16.msra.mxu1 %v9911_v17  ;;  %1097 = vmatprep.subr.bf16.mxu0 %v10382_v32  ;;  %v319_v37 = vld [vmem:[#allocation5 + $0xa0] sm:$0xff]  ;;  %v10388_v38 = vld [vmem:[#allocation11 + $0x3c] ss:$24 sps:$4 sm:$0xff]   ;;  %v10390_v39 = vld [vmem:[#allocation11 + $0x38] ss:$24 sps:$4 sm:$0xff]   ;;  %v9925_v43 = vpack.c.bf16 %v322_v36, %v320_v35  ;;  %v285_v17 = vlaneseq }
 0x150   :  { %9914 = vmatprep.subr.bf16.mxu1 %v9913_v18  ;;  %1098 = vmatpush1.bf16.msra.mxu0 %v10384_v33  ;;  %v321_v41 = vld [vmem:[#allocation5 + $0xb0] sm:$0xff]  ;;  %v324_v42 = vld [vmem:[#allocation5 + $0xc8] sm:$0xff]  ;;  %v326_v45 = vld [vmem:[#allocation5 + $0xd8] sm:$0xff] }
 0x151   :  { %1099 = vmatprep.subr.bf16.mxu0 %v10388_v38  ;;  %v10394_v44 = vld [vmem:[#allocation11 + $0x6c] ss:$24 sps:$4 sm:$0xff]   ;;  %v10396_v47 = vld [vmem:[#allocation11 + $0x68] ss:$24 sps:$4 sm:$0xff]   ;;  %v9927_v48 = vpack.c.bf16 %v321_v41, %v319_v37  ;;  %v325_v49 = vld [vmem:[#allocation5 + $0xd0] sm:$0xff]  ;;  %v9929_v51 = vpack.c.bf16 %v326_v45, %v324_v42  ;;  %v286_v18 = vand.u32 127, %v285_v17 }
 0x152   :  { %v323_v46 = vld [vmem:[#allocation5 + $0xc0] sm:$0xff]  ;;  %v10400_v50 = vld [vmem:[#allocation11 + $0x9c] ss:$24 sps:$4 sm:$0xff]   ;;  %v328_v52 = vld [vmem:[#allocation5 + $0xe8] sm:$0xff] }
 0x153   :  { %9916 = vmatpush1.bf16.msra.mxu1 %v9915_v23  ;;  %v330_v53 = vld [vmem:[#allocation5 + $0xf8] sm:$0xff]  ;;  %v9931_v55 = vpack.c.bf16 %v325_v49, %v323_v46  ;;  %v327_v56 = vld [vmem:[#allocation5 + $0xe0] sm:$0xff]  ;;  %v329_v59 = vld [vmem:[#allocation5 + $0xf0] sm:$0xff]  ;;  %v12042_v23 = vmov 1.0  }
 0x154   :  { %9918 = vmatprep.subr.bf16.mxu1 %v9917_v24  ;;  %1100 = vmatpush1.bf16.msra.mxu0 %v10390_v39  ;;  %v10402_v54 = vld [vmem:[#allocation11 + $0x98] ss:$24 sps:$4 sm:$0xff]   ;;  %v10406_v57 = vld [vmem:[#allocation11 + $0xcc] ss:$24 sps:$4 sm:$0xff]   ;;  %v9933_v58 = vpack.c.bf16 %v330_v53, %v328_v52  ;;  %v10408_v60 = vld [vmem:[#allocation11 + $0xc8] ss:$24 sps:$4 sm:$0xff]   ;;  %v9935_v61 = vpack.c.bf16 %v329_v59, %v327_v56 }
 0x155   :  { %1101 = vmatprep.subr.bf16.mxu0 %v10394_v44  ;;  %v10412_v62 = vld [vmem:[#allocation11 + $0xfc] ss:$24 sps:$4 sm:$0xff]   ;;  %v10414_v0 = vld [vmem:[#allocation11 + $0xf8] ss:$24 sps:$4 sm:$0xff]   ;;  %v10418_v1 = vld [vmem:[#allocation11 + $0x12c] ss:$24 sps:$4 sm:$0xff]  }
 0x156   :  { %v10381_v63 = vld [vmem:[#allocation11 + $0x4] ss:$24 sps:$4 sm:$0xff]   ;;  %v10420_v2 = vld [vmem:[#allocation11 + $0x128] ss:$24 sps:$4 sm:$0xff]   ;;  %v10426_v4 = vld [vmem:[#allocation11 + $0x158] ss:$24 sps:$4 sm:$0xff]  }
 0x157   :  { %9920 = vmatpush1.bf16.msra.mxu1 %v9919_v31  ;;  %v10424_v3 = vld [vmem:[#allocation11 + $0x15c] ss:$24 sps:$4 sm:$0xff]   ;;  %v10430_v5 = vld [vmem:[#allocation11 + $0x18c] ss:$24 sps:$4 sm:$0xff]   ;;  %v10432_v6 = vld [vmem:[#allocation11 + $0x188] ss:$24 sps:$4 sm:$0xff]  }
 0x158   :  { %9922 = vmatprep.subr.bf16.mxu1 %v9921_v34  ;;  %1102 = vmatpush1.bf16.msra.mxu0 %v10396_v47  ;;  %v10436_v8 = vld [vmem:[#allocation11 + $0x1bc] ss:$24 sps:$4 sm:$0xff]   ;;  %v10438_v9 = vld [vmem:[#allocation11 + $0x1b8] ss:$24 sps:$4 sm:$0xff]   ;;  %v10442_v10 = vld [vmem:[#allocation11 + $0x1ec] ss:$24 sps:$4 sm:$0xff]  }
 0x159   :  { %1103 = vmatprep.subr.bf16.mxu0 %v10400_v50  ;;  %v10444_v11 = vld [vmem:[#allocation11 + $0x1e8] ss:$24 sps:$4 sm:$0xff]   ;;  %v10448_v12 = vld [vmem:[#allocation11 + $0x21c] ss:$24 sps:$4 sm:$0xff]   ;;  %v10450_v13 = vld [vmem:[#allocation11 + $0x218] ss:$24 sps:$4 sm:$0xff]  }
 0x15a   :  { %v10454_v14 = vld [vmem:[#allocation11 + $0x24c] ss:$24 sps:$4 sm:$0xff]   ;;  %v10456_v15 = vld [vmem:[#allocation11 + $0x248] ss:$24 sps:$4 sm:$0xff]   ;;  %v10460_v16 = vld [vmem:[#allocation11 + $0x27c] ss:$24 sps:$4 sm:$0xff]  }
 0x15b   :  { %9924 = vmatpush1.bf16.msra.mxu1 %v9923_v40  ;;  %v10379_v19 = vld [vmem:[#allocation11] ss:$24 sps:$4 sm:$0xff]   ;;  %v10387_v20 = vld [vmem:[#allocation11 + $0x34] ss:$24 sps:$4 sm:$0xff]   ;;  %v10385_v22 = vld [vmem:[#allocation11 + $0x30] ss:$24 sps:$4 sm:$0xff]  }
 0x15c   :  { %9926 = vmatprep.subr.bf16.mxu1 %v9925_v43  ;;  %1104 = vmatpush1.bf16.msra.mxu0 %v10402_v54  ;;  %v10393_v24 = vld [vmem:[#allocation11 + $0x64] ss:$24 sps:$4 sm:$0xff]   ;;  %v10391_v26 = vld [vmem:[#allocation11 + $0x60] ss:$24 sps:$4 sm:$0xff]   ;;  %v10399_v27 = vld [vmem:[#allocation11 + $0x94] ss:$24 sps:$4 sm:$0xff]  }
 0x15d   :  { %1105 = vmatprep.subr.bf16.mxu0 %v10406_v57  ;;  %v10397_v28 = vld [vmem:[#allocation11 + $0x90] ss:$24 sps:$4 sm:$0xff]   ;;  %v10405_v29 = vld [vmem:[#allocation11 + $0xc4] ss:$24 sps:$4 sm:$0xff]   ;;  %v10403_v30 = vld [vmem:[#allocation11 + $0xc0] ss:$24 sps:$4 sm:$0xff]  }
 0x15e   :  { %v10411_v31 = vld [vmem:[#allocation11 + $0xf4] ss:$24 sps:$4 sm:$0xff]   ;;  %v10409_v32 = vld [vmem:[#allocation11 + $0xf0] ss:$24 sps:$4 sm:$0xff]   ;;  %v10417_v33 = vld [vmem:[#allocation11 + $0x124] ss:$24 sps:$4 sm:$0xff]  }
 0x15f   :  { %9928 = vmatpush1.bf16.msra.mxu1 %v9927_v48  ;;  %v10415_v34 = vld [vmem:[#allocation11 + $0x120] ss:$24 sps:$4 sm:$0xff]   ;;  %v10423_v35 = vld [vmem:[#allocation11 + $0x154] ss:$24 sps:$4 sm:$0xff]   ;;  %v10421_v36 = vld [vmem:[#allocation11 + $0x150] ss:$24 sps:$4 sm:$0xff]  }
 0x160   :  { %9930 = vmatprep.subr.bf16.mxu1 %v9929_v51  ;;  %1106 = vmatpush1.bf16.msra.mxu0 %v10408_v60  ;;  %v10429_v37 = vld [vmem:[#allocation11 + $0x184] ss:$24 sps:$4 sm:$0xff]   ;;  %v10427_v38 = vld [vmem:[#allocation11 + $0x180] ss:$24 sps:$4 sm:$0xff]   ;;  %v10435_v39 = vld [vmem:[#allocation11 + $0x1b4] ss:$24 sps:$4 sm:$0xff]  }
 0x161   :  { %1107 = vmatprep.subr.bf16.mxu0 %v10412_v62  ;;  %v10433_v40 = vld [vmem:[#allocation11 + $0x1b0] ss:$24 sps:$4 sm:$0xff]   ;;  %v10441_v41 = vld [vmem:[#allocation11 + $0x1e4] ss:$24 sps:$4 sm:$0xff]   ;;  %v10439_v42 = vld [vmem:[#allocation11 + $0x1e0] ss:$24 sps:$4 sm:$0xff]  }
 0x162   :  { %v10447_v43 = vld [vmem:[#allocation11 + $0x214] ss:$24 sps:$4 sm:$0xff]   ;;  %v10445_v44 = vld [vmem:[#allocation11 + $0x210] ss:$24 sps:$4 sm:$0xff]   ;;  %v10453_v45 = vld [vmem:[#allocation11 + $0x244] ss:$24 sps:$4 sm:$0xff]  }
 0x163   :  { %9932 = vmatpush1.bf16.msra.mxu1 %v9931_v55  ;;  %v10451_v46 = vld [vmem:[#allocation11 + $0x240] ss:$24 sps:$4 sm:$0xff]   ;;  %v10459_v47 = vld [vmem:[#allocation11 + $0x274] ss:$24 sps:$4 sm:$0xff]   ;;  %v10457_v48 = vld [vmem:[#allocation11 + $0x270] ss:$24 sps:$4 sm:$0xff]  }
 0x164   :  { %9934 = vmatprep.subr.bf16.mxu1 %v9933_v58  ;;  %1108 = vmatpush1.bf16.msra.mxu0 %v10414_v0  ;;  %v10462_v49 = vld [vmem:[#allocation11 + $0x278] ss:$24 sps:$4 sm:$0xff]   ;;  %v10465_v50 = vld [vmem:[#allocation11 + $0x2a4] ss:$24 sps:$4 sm:$0xff]   ;;  %v10468_v53 = vld [vmem:[#allocation11 + $0x2a8] ss:$24 sps:$4 sm:$0xff]  }
 0x165   :  { %1109 = vmatprep.subr.bf16.mxu0 %v10418_v1  ;;  %v10463_v51 = vld [vmem:[#allocation11 + $0x2a0] ss:$24 sps:$4 sm:$0xff]   ;;  %v10466_v52 = vld [vmem:[#allocation11 + $0x2ac] ss:$24 sps:$4 sm:$0xff]   ;;  %v10469_v55 = vld [vmem:[#allocation11 + $0x2d0] ss:$24 sps:$4 sm:$0xff]  }
 0x166   :  { %v10471_v54 = vld [vmem:[#allocation11 + $0x2d4] ss:$24 sps:$4 sm:$0xff]   ;;  %v10474_v57 = vld [vmem:[#allocation11 + $0x2d8] ss:$24 sps:$4 sm:$0xff]   ;;  %v331_v1 = vld [vmem:[#allocation7] sm:$0xff] }
 0x167   :  { %9936 = vmatpush1.bf16.msra.mxu1 %v9935_v61  ;;  %v10472_v56 = vld [vmem:[#allocation11 + $0x2dc] ss:$24 sps:$4 sm:$0xff]   ;;  %v332_v0 = vld [vmem:[#allocation7 + $0x8] sm:$0xff] }
 0x168   :  { %1054 = vmatprep.subr.bf16.mxu1 %v10381_v63  ;;  %1110 = vmatpush1.bf16.msra.mxu0 %v10420_v2  ;;  %v10477_v58 = vld [vmem:[#allocation11 + $0x14] ss:$24 sps:$4 sm:$0xff]   ;;  %v427_v60 = vld [vmem:[#allocation8 + $0x88] sm:$0xff] }
 0x169   :  { %1111 = vmatprep.subr.bf16.mxu0 %v10424_v3  ;;  %v426_v59 = vld [vmem:[#allocation8 + $0x80] sm:$0xff] }
 0x16a   :  { %v12405_v61 = vpack.c.bf16 %v427_v60, %v426_v59  ;;  %v422_v60 = vld [vmem:[#allocation8 + $0x60] sm:$0xff] }
 0x16c   :  { %1112 = vmatpush1.bf16.msra.mxu0 %v10426_v4 }
 0x16d   :  { %1113 = vmatprep.subr.bf16.mxu0 %v10430_v5 }
 0x170   :  { %1114 = vmatpush1.bf16.msra.mxu0 %v10432_v6 }
 0x171   :  { %1115 = vmatprep.subr.bf16.mxu0 %v10436_v8  ;;  %v410_v8 = vld [vmem:[#allocation8] sm:$0xff] }
 0x174   :  { %1116 = vmatpush1.bf16.msra.mxu0 %v10438_v9  ;;  %v411_v9 = vld [vmem:[#allocation8 + $0x8] sm:$0xff] }
 0x175   :  { %1117 = vmatprep.subr.bf16.mxu0 %v10442_v10 }
 0x178   :  { %1118 = vmatpush1.bf16.msra.mxu0 %v10444_v11  ;;  %v428_v11 = vld [vmem:[#allocation8 + $0x90] sm:$0xff] }
 0x179   :  { %1119 = vmatprep.subr.bf16.mxu0 %v10448_v12  ;;  %v429_v12 = vld [vmem:[#allocation8 + $0x98] sm:$0xff] }
 0x17c   :  { %1120 = vmatpush1.bf16.msra.mxu0 %v10450_v13 }
 0x17d   :  { %1121 = vmatprep.subr.bf16.mxu0 %v10454_v14  ;;  %v10475_v14 = vld [vmem:[#allocation11 + $0x10] ss:$24 sps:$4 sm:$0xff]  }
 0x180   :  { %1122 = vmatpush1.bf16.msra.mxu0 %v10456_v15 }
 0x181   :  { %1123 = vmatprep.subr.bf16.mxu0 %v10460_v16  ;;  %v10480_v16 = vld [vmem:[#allocation11 + $0x44] ss:$24 sps:$4 sm:$0xff]  }
 0x184   :  { %1124 = vmatpush1.bf16.msra.mxu0 %v10462_v49  ;;  %v10492_v49 = vld [vmem:[#allocation11 + $0x104] ss:$24 sps:$4 sm:$0xff]  }
 0x185   :  { %1125 = vmatprep.subr.bf16.mxu0 %v10466_v52  ;;  %v420_v52 = vld [vmem:[#allocation8 + $0x50] sm:$0xff] }
 0x188   :  { %1126 = vmatpush1.bf16.msra.mxu0 %v10468_v53  ;;  %v421_v53 = vld [vmem:[#allocation8 + $0x58] sm:$0xff] }
 0x189   :  { %1127 = vmatprep.subr.bf16.mxu0 %v10472_v56  ;;  %v10490_v56 = vld [vmem:[#allocation11 + $0x100] ss:$24 sps:$4 sm:$0xff]  }
 0x18c   :  { %1128 = vmatpush1.bf16.msra.mxu0 %v10474_v57  ;;  %v10495_v57 = vld [vmem:[#allocation11 + $0x134] ss:$24 sps:$4 sm:$0xff]  }
 0x18d   :  { %9938 = vmatprep.subr.bf16.mxu0 %v12405_v61 }
 0x1c7   :  { %v289_v21 = vpop.permute.xlu0 %288 }
 0x1c8   :  { %vm293_vm0 = vcmp.eq.s32.totalorder %v289_v21, %v286_v18  ;;  %v413_v21 = vld [vmem:[#allocation8 + $0x18] sm:$0xff] }
 0x1c9   :  { %8703 = vmatmul.mubr.msk.f32.vlgmr.msra.gmra.mrb[0].mxu1 %vm293_vm0, %v12042_v23 }
 0x1ca   :  { %403 = vmatprep.mubr.f32.mxu1 %v12041_v7  ;;  %1055 = vmatpush1.bf16.msra.mxu1 %v10379_v19  ;;  %v12424_v19 = vpack.c.bf16 %v429_v12, %v428_v11  ;;  %v10502_v11 = vld [vmem:[#allocation11 + $0x1c0] ss:$24 sps:$4 sm:$0xff]   ;;  %v10507_v12 = vld [vmem:[#allocation11 + $0x1f4] ss:$24 sps:$4 sm:$0xff]  }
 0x1cb   :  { %v292_v25 = vpop.permute.xlu0 %291  ;;  %1056 = vmatprep.subr.bf16.mxu1 %v10387_v20  ;;  %v412_v20 = vld [vmem:[#allocation8 + $0x10] sm:$0xff] }
 0x1cc   :  { %vm294_vm1 = vcmp.eq.s32.totalorder %v292_v25, %v286_v18  ;;  %v12422_v18 = vpack.c.bf16 %v411_v9, %v410_v8  ;;  %v10483_v25 = vld [vmem:[#allocation11 + $0x74] ss:$24 sps:$4 sm:$0xff]   ;;  %v10499_v8 = vld [vmem:[#allocation11 + $0x190] ss:$24 sps:$4 sm:$0xff]   ;;  %v10504_v9 = vld [vmem:[#allocation11 + $0x1c4] ss:$24 sps:$4 sm:$0xff]  }
 0x1cd   :  { %8704 = vmatmul.mubr.msk.f32.gmra.mrb[2].mxu1 %vm294_vm1, %v12042_v23  ;;  %v431_v23 = vld [vmem:[#allocation8 + $0xa8] sm:$0xff] }
 0x1ce   :  { %1057 = vmatpush1.bf16.msra.mxu1 %v10385_v22  ;;  %v430_v22 = vld [vmem:[#allocation8 + $0xa0] sm:$0xff] }
 0x1cf   :  { %1058 = vmatprep.subr.bf16.mxu1 %v10393_v24  ;;  %v10478_v24 = vld [vmem:[#allocation11 + $0x40] ss:$24 sps:$4 sm:$0xff]  }
 0x1d2   :  { %1059 = vmatpush1.bf16.msra.mxu1 %v10391_v26  ;;  %v12429_v26 = vpack.c.bf16 %v413_v21, %v412_v20  ;;  %v10513_v20 = vld [vmem:[#allocation11 + $0x254] ss:$24 sps:$4 sm:$0xff]   ;;  %v10511_v21 = vld [vmem:[#allocation11 + $0x250] ss:$24 sps:$4 sm:$0xff]  }
 0x1d3   :  { %1060 = vmatprep.subr.bf16.mxu1 %v10399_v27  ;;  %v12432_v27 = vpack.c.bf16 %v431_v23, %v430_v22  ;;  %v10516_v22 = vld [vmem:[#allocation11 + $0x284] ss:$24 sps:$4 sm:$0xff]   ;;  %v10514_v23 = vld [vmem:[#allocation11 + $0x280] ss:$24 sps:$4 sm:$0xff]  }
 0x1d6   :  { %1061 = vmatpush1.bf16.msra.mxu1 %v10397_v28  ;;  %v414_v28 = vld [vmem:[#allocation8 + $0x20] sm:$0xff] }
 0x1d7   :  { %1062 = vmatprep.subr.bf16.mxu1 %v10405_v29  ;;  %v415_v29 = vld [vmem:[#allocation8 + $0x28] sm:$0xff] }
 0x1da   :  { %1063 = vmatpush1.bf16.msra.mxu1 %v10403_v30  ;;  %v432_v30 = vld [vmem:[#allocation8 + $0xb0] sm:$0xff] }
 0x1db   :  { %1064 = vmatprep.subr.bf16.mxu1 %v10411_v31  ;;  %v433_v31 = vld [vmem:[#allocation8 + $0xb8] sm:$0xff] }
 0x1de   :  { %1065 = vmatpush1.bf16.msra.mxu1 %v10409_v32  ;;  %v10481_v32 = vld [vmem:[#allocation11 + $0x70] ss:$24 sps:$4 sm:$0xff]  }
 0x1df   :  { %1066 = vmatprep.subr.bf16.mxu1 %v10417_v33  ;;  %v10486_v33 = vld [vmem:[#allocation11 + $0xa4] ss:$24 sps:$4 sm:$0xff]  }
 0x1e2   :  { %1067 = vmatpush1.bf16.msra.mxu1 %v10415_v34  ;;  %v12435_v34 = vpack.c.bf16 %v415_v29, %v414_v28  ;;  %v10522_v28 = vld [vmem:[#allocation11 + $0x2e4] ss:$24 sps:$4 sm:$0xff]   ;;  %v10520_v29 = vld [vmem:[#allocation11 + $0x2e0] ss:$24 sps:$4 sm:$0xff]  }
 0x1e3   :  { %1068 = vmatprep.subr.bf16.mxu1 %v10423_v35  ;;  %v12438_v35 = vpack.c.bf16 %v433_v31, %v432_v30  ;;  %v440_v30 = vld [vmem:[#allocation8 + $0xf0] sm:$0xff]  ;;  %v441_v31 = vld [vmem:[#allocation8 + $0xf8] sm:$0xff] }
 0x1e6   :  { %1069 = vmatpush1.bf16.msra.mxu1 %v10421_v36  ;;  %v416_v36 = vld [vmem:[#allocation8 + $0x30] sm:$0xff] }
 0x1e7   :  { %1070 = vmatprep.subr.bf16.mxu1 %v10429_v37  ;;  %v417_v37 = vld [vmem:[#allocation8 + $0x38] sm:$0xff] }
 0x1ea   :  { %1071 = vmatpush1.bf16.msra.mxu1 %v10427_v38  ;;  %v434_v38 = vld [vmem:[#allocation8 + $0xc0] sm:$0xff] }
 0x1eb   :  { %1072 = vmatprep.subr.bf16.mxu1 %v10435_v39  ;;  %v435_v39 = vld [vmem:[#allocation8 + $0xc8] sm:$0xff] }
 0x1ee   :  { %1073 = vmatpush1.bf16.msra.mxu1 %v10433_v40  ;;  %v10484_v40 = vld [vmem:[#allocation11 + $0xa0] ss:$24 sps:$4 sm:$0xff]  }
 0x1ef   :  { %1074 = vmatprep.subr.bf16.mxu1 %v10441_v41  ;;  %v10489_v41 = vld [vmem:[#allocation11 + $0xd4] ss:$24 sps:$4 sm:$0xff]  }
 0x1f2   :  { %1075 = vmatpush1.bf16.msra.mxu1 %v10439_v42  ;;  %v12441_v42 = vpack.c.bf16 %v417_v37, %v416_v36  ;;  %v425_v36 = vld [vmem:[#allocation8 + $0x78] sm:$0xff] }
 0x1f3   :  { %1076 = vmatprep.subr.bf16.mxu1 %v10447_v43  ;;  %v12444_v43 = vpack.c.bf16 %v435_v39, %v434_v38  ;;  %v12473_v38 = vshrl.u32 %v285_v17, 7 }
 0x1f5   :  { %v12479_v39 = vsub.s32 2, %v12473_v38 }
 0x1f6   :  { %1077 = vmatpush1.bf16.msra.mxu1 %v10445_v44  ;;  %v418_v44 = vld [vmem:[#allocation8 + $0x40] sm:$0xff] }
 0x1f7   :  { %1078 = vmatprep.subr.bf16.mxu1 %v10453_v45  ;;  %v419_v45 = vld [vmem:[#allocation8 + $0x48] sm:$0xff] }
 0x1fa   :  { %1079 = vmatpush1.bf16.msra.mxu1 %v10451_v46  ;;  %v436_v46 = vld [vmem:[#allocation8 + $0xd0] sm:$0xff] }
 0x1fb   :  { %1080 = vmatprep.subr.bf16.mxu1 %v10459_v47  ;;  %v437_v47 = vld [vmem:[#allocation8 + $0xd8] sm:$0xff] }
 0x1fe   :  { %1081 = vmatpush1.bf16.msra.mxu1 %v10457_v48  ;;  %v10487_v48 = vld [vmem:[#allocation11 + $0xd0] ss:$24 sps:$4 sm:$0xff]  }
 0x1ff   :  { %1082 = vmatprep.subr.bf16.mxu1 %v10465_v50  ;;  %v12447_v50 = vpack.c.bf16 %v419_v45, %v418_v44  ;;  %v12487_v44 = vsub.s32 3, %v12473_v38 }
 0x202   :  { %1083 = vmatpush1.bf16.msra.mxu1 %v10463_v51  ;;  %v12450_v51 = vpack.c.bf16 %v437_v47, %v436_v46 }
 0x203   :  { %1084 = vmatprep.subr.bf16.mxu1 %v10471_v54  ;;  %v438_v54 = vld [vmem:[#allocation8 + $0xe0] sm:$0xff] }
 0x206   :  { %1085 = vmatpush1.bf16.msra.mxu1 %v10469_v55  ;;  %v439_v55 = vld [vmem:[#allocation8 + $0xe8] sm:$0xff] }
 0x207   :  { %1140 = vmatprep.subr.bf16.mxu1 %v10477_v58  ;;  %v12453_v58 = vpack.c.bf16 %v421_v53, %v420_v52  ;;  %v12456_v59 = vpack.c.bf16 %v439_v55, %v438_v54 }
 0x29c   :  { %v399_v62 = vpop.f32.mrb[0].mxu1 }
 0x29d   :  { %v401_v63 = vpop.f32.mrb[1].mxu1  ;;  %v12414_v10 = vadd.f32 %v399_v62, %v331_v1  ;;  %v423_v62 = vld [vmem:[#allocation8 + $0x68] sm:$0xff] }
 0x29e   :  { %v12410_v5 = vadd.f32 %v401_v63, %v332_v0  ;;  %v10493_v63 = vld [vmem:[#allocation11 + $0x130] ss:$24 sps:$4 sm:$0xff]  }
 0x2a0   :  { %v405_v2 = vpop.f32.mrb[2].mxu1 }
 0x2a1   :  { %v12408_v3 = vadd.f32 %v405_v2, %v331_v1  ;;  %v407_v4 = vpop.f32.mrb[3].mxu1  ;;  %v12459_v1 = vpack.c.bf16 %v423_v62, %v422_v60  ;;  %v10496_v2 = vld [vmem:[#allocation11 + $0x160] ss:$24 sps:$4 sm:$0xff]  }
 0x2a2   :  { %v12412_v6 = vadd.f32 %v407_v4, %v332_v0  ;;  %v10498_v0 = vld [vmem:[#allocation11 + $0x164] ss:$24 sps:$4 sm:$0xff]   ;;  %v10501_v4 = vld [vmem:[#allocation11 + $0x194] ss:$24 sps:$4 sm:$0xff]  }
 0x2a3   :  { %v12420_v15 = vpack.c.bf16 %v12408_v3, %v12414_v10 }
 0x2a4   :  { %v445_v13 = vpack.c.bf16 %v12412_v6, %v12410_v5 }
 0x2a6   :  { %1086 = vmatprep.mubr.bf16.mxu1 %v445_v13  ;;  %1129 = vmatprep.mubr.bf16.mxu0 %v445_v13 }
 0x2a7   :  { %1087 = vmatmul.mubr.bf16.vlgmr.msra.gmra.mrb[4].mxu1 %v12420_v15  ;;  %1130 = vmatmul.mubr.bf16.vlgmr.msra.gmra.mrb[0].mxu0 %v12420_v15 }
 0x2a8   :  { %1141 = vmatpush1.bf16.msra.mxu1 %v10475_v14  ;;  %1172 = vmatprep.mubr.bf16.mxu1 %v445_v13  ;;  %v10505_v13 = vld [vmem:[#allocation11 + $0x1f0] ss:$24 sps:$4 sm:$0xff]   ;;  %v10510_v14 = vld [vmem:[#allocation11 + $0x224] ss:$24 sps:$4 sm:$0xff]  }
 0x2a9   :  { %1142 = vmatprep.subr.bf16.mxu1 %v10480_v16  ;;  %9940 = vmatpush3.bf16.msra.mxu0 %v12422_v18  ;;  %v10508_v16 = vld [vmem:[#allocation11 + $0x220] ss:$24 sps:$4 sm:$0xff]  }
 0x2aa   :  { %9942 = vmatprep.subr.bf16.mxu0 %v12424_v19 }
 0x2ac   :  { %1143 = vmatpush1.bf16.msra.mxu1 %v10478_v24  ;;  %v10519_v24 = vld [vmem:[#allocation11 + $0x2b4] ss:$24 sps:$4 sm:$0xff]  }
 0x2ad   :  { %1144 = vmatprep.subr.bf16.mxu1 %v10483_v25  ;;  %9944 = vmatpush3.bf16.msra.mxu0 %v12429_v26  ;;  %v10517_v25 = vld [vmem:[#allocation11 + $0x2b0] ss:$24 sps:$4 sm:$0xff]  }
 0x2ae   :  { %9946 = vmatprep.subr.bf16.mxu0 %v12432_v27 }
 0x2b0   :  { %1145 = vmatpush1.bf16.msra.mxu1 %v10481_v32  ;;  %v12465_v32 = vpack.c.bf16 %v441_v31, %v440_v30  ;;  %v12540_v30 = vld [vmem:[#allocation10] sm:$0xff] }
 0x2b1   :  { %1146 = vmatprep.subr.bf16.mxu1 %v10486_v33  ;;  %9948 = vmatpush3.bf16.msra.mxu0 %v12435_v34  ;;  %v424_v33 = vld [vmem:[#allocation8 + $0x70] sm:$0xff] }
 0x2b2   :  { %9950 = vmatprep.subr.bf16.mxu0 %v12438_v35  ;;  %v12467_v37 = vpack.c.bf16 %v425_v36, %v424_v33 }
 0x2b4   :  { %1147 = vmatpush1.bf16.msra.mxu1 %v10484_v40  ;;  %v12482_v40 = vsub.s32 1, %v12473_v38 }
 0x2b5   :  { %1148 = vmatprep.subr.bf16.mxu1 %v10489_v41  ;;  %9952 = vmatpush3.bf16.msra.mxu0 %v12441_v42  ;;  %v12484_v41 = vld [vmem:[#allocation13] sm:$0x3f] }
 0x2b6   :  { %9954 = vmatprep.subr.bf16.mxu0 %v12444_v43  ;;  %v555_v17 = vrot.slane %v12484_v41, %v12479_v39  ;;  %v551_v46 = vrot.slane %v12484_v41, %v12482_v40  ;;  %v559_v47 = vrot.slane %v12484_v41, %v12487_v44 }
 0x2b8   :  { %1149 = vmatpush1.bf16.msra.mxu1 %v10487_v48 }
 0x2b9   :  { %1150 = vmatprep.subr.bf16.mxu1 %v10492_v49  ;;  %9956 = vmatpush3.bf16.msra.mxu0 %v12447_v50 }
 0x2ba   :  { %9958 = vmatprep.subr.bf16.mxu0 %v12450_v51 }
 0x2bc   :  { %1151 = vmatpush1.bf16.msra.mxu1 %v10490_v56 }
 0x2bd   :  { %1152 = vmatprep.subr.bf16.mxu1 %v10495_v57  ;;  %9960 = vmatpush3.bf16.msra.mxu0 %v12453_v58 }
 0x2be   :  { %9962 = vmatprep.subr.bf16.mxu0 %v12456_v59 }
 0x2c0   :  { %1153 = vmatpush1.bf16.msra.mxu1 %v10493_v63 }
 0x2c1   :  { %1154 = vmatprep.subr.bf16.mxu1 %v10498_v0  ;;  %9964 = vmatpush3.bf16.msra.mxu0 %v12459_v1 }
 0x2c2   :  { %9966 = vmatprep.subr.bf16.mxu0 %v12465_v32 }
 0x2c4   :  { %1155 = vmatpush1.bf16.msra.mxu1 %v10496_v2 }
 0x2c5   :  { %1156 = vmatprep.subr.bf16.mxu1 %v10501_v4  ;;  %9968 = vmatpush3.bf16.msra.mxu0 %v12467_v37 }
 0x2c6   :  { %9970 = vmatprep.subr.bf16.mxu0 %v12405_v61 }
 0x2c8   :  { %1157 = vmatpush1.bf16.msra.mxu1 %v10499_v8 }
 0x2c9   :  { %1158 = vmatprep.subr.bf16.mxu1 %v10504_v9 }
 0x2cc   :  { %1159 = vmatpush1.bf16.msra.mxu1 %v10502_v11 }
 0x2cd   :  { %1160 = vmatprep.subr.bf16.mxu1 %v10507_v12 }
 0x2d0   :  { %1161 = vmatpush1.bf16.msra.mxu1 %v10505_v13 }
 0x2d1   :  { %1162 = vmatprep.subr.bf16.mxu1 %v10510_v14 }
 0x2d4   :  { %1163 = vmatpush1.bf16.msra.mxu1 %v10508_v16 }
 0x2d5   :  { %1164 = vmatprep.subr.bf16.mxu1 %v10513_v20 }
 0x2d8   :  { %1165 = vmatpush1.bf16.msra.mxu1 %v10511_v21 }
 0x2d9   :  { %1166 = vmatprep.subr.bf16.mxu1 %v10516_v22 }
 0x2dc   :  { %1167 = vmatpush1.bf16.msra.mxu1 %v10514_v23 }
 0x2dd   :  { %1168 = vmatprep.subr.bf16.mxu1 %v10519_v24 }
 0x2e0   :  { %1169 = vmatpush1.bf16.msra.mxu1 %v10517_v25 }
 0x2e1   :  { %1170 = vmatprep.subr.bf16.mxu1 %v10522_v28 }
 0x2e4   :  { %1171 = vmatpush1.bf16.msra.mxu1 %v10520_v29  ;;  %v443_v29 = vld [vmem:[#allocation10 + $0x8] sm:$0xff] }
 0x2e5   :  { %1343 = vmatprep.subr.mxu1 %v443_v29 }
 0x2e7   :  { %1173 = vmatmul.mubr.bf16.vlgmr.msra.gmra.mrb[8].mxu1 %v12420_v15  ;;  %v12476_v15 = vsub.s32 0, %v12473_v38 }
 0x2e8   :  { %1407 = vmatprep.mubr.f32.mxu1 %v12041_v7  ;;  %1344 = vmatpush1.msra.mxu1 %v12540_v30 }
 0x2e9   :  { %v547_v45 = vrot.slane %v12484_v41, %v12476_v15  ;;  %1420 = vmatprep.subr.mxu1 %v443_v29 }
 0x37a   :  { %v1088_v48 = vpop.f32.mrb[4].mxu1  ;;  %v1131_v49 = vpop.f32.mrb[0].mxu0 }
 0x37b   :  { %v1089_v52 = vadd.f32 %v1088_v48, %v547_v45  ;;  %v1132_v53 = vadd.f32 %v1131_v49, %v555_v17  ;;  %v1090_v54 = vpop.f32.mrb[5].mxu1  ;;  %v1133_v55 = vpop.f32.mrb[1].mxu0 }
 0x37c   :  { %v1091_v56 = vadd.f32 %v1090_v54, %v551_v46  ;;  %v1134_v57 = vadd.f32 %v1133_v55, %v559_v47  ;;  %v1092_v60 = vpop.f32.mrb[6].mxu1  ;;  %v1135_v62 = vpop.f32.mrb[2].mxu0 }
 0x37d   :  { %v1183_v63 = vmul.f32 %v1132_v53, %v1089_v52  ;;  %v1093_v0 = vadd.f32 %v1092_v60, %v547_v45  ;;  %v1136_v2 = vadd.f32 %v1135_v62, %v555_v17  ;;  %v1094_v4 = vpop.f32.mrb[7].mxu1  ;;  %v1137_v8 = vpop.f32.mrb[3].mxu0 }
 0x37e   :  { %v1184_v9 = vmul.f32 %v1134_v57, %v1091_v56  ;;  %v1095_v11 = vadd.f32 %v1094_v4, %v551_v46  ;;  %v1138_v12 = vadd.f32 %v1137_v8, %v559_v47 }
 0x37f   :  { %v12497_v13 = vmul.f32 %v1132_v53, %v1093_v0  ;;  %v1256_v14 = vmul.f32 %v1136_v2, %v1089_v52  ;;  %v1568_v16 = vmul.f32 %v1136_v2, %v1093_v0 }
 0x380   :  { %v12499_v20 = vmul.f32 %v1134_v57, %v1095_v11  ;;  %v1257_v21 = vmul.f32 %v1138_v12, %v1091_v56  ;;  %v1569_v22 = vmul.f32 %v1138_v12, %v1095_v11  ;;  %1249 = vmatprep.mubr.f32.mxu0 %v1184_v9  ;;  %v12568_v9 = vsub.s32 4, %v12473_v38 }
 0x381   :  { %1250 = vmatmul.mubr.f32.vlgmr.msra.gmra.mrb[4].mxu0 %v1183_v63  ;;  %v12571_v11 = vsub.s32 5, %v12473_v38 }
 0x382   :  { %9972 = vmatpush3.bf16.msra.mxu0 %v12422_v18  ;;  %1322 = vmatprep.mubr.f32.mxu0 %v1257_v21  ;;  %v563_v12 = vrot.slane %v12484_v41, %v12568_v9 }
 0x383   :  { %9974 = vmatprep.subr.bf16.mxu0 %v12424_v19 }
 0x386   :  { %9976 = vmatpush3.bf16.msra.mxu0 %v12429_v26 }
 0x387   :  { %9978 = vmatprep.subr.bf16.mxu0 %v12432_v27 }
 0x38a   :  { %9980 = vmatpush3.bf16.msra.mxu0 %v12435_v34 }
 0x38b   :  { %9982 = vmatprep.subr.bf16.mxu0 %v12438_v35 }
 0x38e   :  { %9984 = vmatpush3.bf16.msra.mxu0 %v12441_v42 }
 0x38f   :  { %9986 = vmatprep.subr.bf16.mxu0 %v12444_v43 }
 0x392   :  { %9988 = vmatpush3.bf16.msra.mxu0 %v12447_v50 }
 0x393   :  { %9990 = vmatprep.subr.bf16.mxu0 %v12450_v51 }
 0x396   :  { %9992 = vmatpush3.bf16.msra.mxu0 %v12453_v58 }
 0x397   :  { %9994 = vmatprep.subr.bf16.mxu0 %v12456_v59 }
 0x39a   :  { %9996 = vmatpush3.bf16.msra.mxu0 %v12459_v1 }
 0x39b   :  { %9998 = vmatprep.subr.bf16.mxu0 %v12465_v32 }
 0x39e   :  { %10000 = vmatpush3.bf16.msra.mxu0 %v12467_v37 }
 0x39f   :  { %10034 = vmatprep.subr.bf16.mxu0 %v12405_v61 }
 0x3a1   :  { %1323 = vmatmul.mubr.f32.vlgmr.msra.gmra.mrb[6].mxu0 %v1256_v14  ;;  %v567_v14 = vrot.slane %v12484_v41, %v12571_v11 }
 0x3a2   :  { %10036 = vmatpush3.bf16.msra.mxu0 %v12422_v18  ;;  %1634 = vmatprep.mubr.f32.mxu0 %v1569_v22 }
 0x3a3   :  { %10038 = vmatprep.subr.bf16.mxu0 %v12424_v19 }
 0x3a6   :  { %10040 = vmatpush3.bf16.msra.mxu0 %v12429_v26 }
 0x3a7   :  { %10042 = vmatprep.subr.bf16.mxu0 %v12432_v27 }
 0x3aa   :  { %10044 = vmatpush3.bf16.msra.mxu0 %v12435_v34 }
 0x3ab   :  { %10046 = vmatprep.subr.bf16.mxu0 %v12438_v35 }
 0x3ae   :  { %10048 = vmatpush3.bf16.msra.mxu0 %v12441_v42 }
 0x3af   :  { %10050 = vmatprep.subr.bf16.mxu0 %v12444_v43 }
 0x3b2   :  { %10052 = vmatpush3.bf16.msra.mxu0 %v12447_v50 }
 0x3b3   :  { %10054 = vmatprep.subr.bf16.mxu0 %v12450_v51 }
 0x3b6   :  { %10056 = vmatpush3.bf16.msra.mxu0 %v12453_v58 }
 0x3b7   :  { %10058 = vmatprep.subr.bf16.mxu0 %v12456_v59 }
 0x3ba   :  { %v12529_v23 = vpop.f32.mrb[8].mxu1  ;;  %10060 = vmatpush3.bf16.msra.mxu0 %v12459_v1 }
 0x3bb   :  { %v12532_v24 = vpop.f32.mrb[9].mxu1  ;;  %10062 = vmatprep.subr.bf16.mxu0 %v12465_v32 }
 0x3bc   :  { %v12535_v25 = vpop.f32.mrb[10].mxu1 }
 0x3bd   :  { %v12537_v28 = vpop.f32.mrb[11].mxu1  ;;  %v12586_v38 = vadd.f32 %v12535_v25, %v563_v12 }
 0x3be   :  { %10064 = vmatpush3.bf16.msra.mxu0 %v12467_v37 }
 0x3c1   :  { %1635 = vmatmul.mubr.f32.vlgmr.msra.gmra.mrb[8].mxu0 %v1568_v16  ;;  %v12578_v16 = vadd.f32 %v12529_v23, %v563_v12  ;;  %v10531_v12 = vld [vmem:[#allocation14 + $0x24] ss:$8 sps:$4 sm:$0xff]  }
 0x454   :  { %v9517_v31 = vpop.f32.mrb[4].mxu0 }
 0x455   :  { %v9518_v33 = vpop.f32.mrb[5].mxu0 }
 0x456   :  { %v9519_v36 = vadd.f32 %v9518_v33, %v9517_v31  ;;  %v12589_v31 = vadd.f32 %v12537_v28, %v567_v14 }
 0x458   :  { %v1255_v47 = vmul.f32 0.17677669, %v9519_v36 }
 0x474   :  { %v9552_v45 = vpop.f32.mrb[6].mxu0 }
 0x475   :  { %v9553_v17 = vpop.f32.mrb[7].mxu0 }
 0x476   :  { %v9554_v46 = vadd.f32 %v9553_v17, %v9552_v45 }
 0x478   :  { %v1328_v48 = vmul.f32 0.17677669, %v9554_v46 }
 0x47a   :  { %v1329_v49 = vmax.f32 %v1255_v47, %v1328_v48 }
 0x47c   :  { %v1330_v52 = vsub.f32 %v1255_v47, %v1329_v49  ;;  %v1333_v53 = vsub.f32 %v1328_v48, %v1329_v49 }
 0x47e   :  { %v1331_v54 = vmul.f32 1.442695, %v1330_v52  ;;  %v1334_v55 = vmul.f32 1.442695, %v1333_v53 }
 0x480   :  { %11531 = vpow2.f32 %v1331_v54 }
 0x481   :  { %11533 = vpow2.f32 %v1334_v55 }
 0x48a   :  { %v11532_v56 = vpop.eup %11531 }
 0x48b   :  { %v11534_v57 = vpop.eup %11533 }
 0x48c   :  { %v1336_v60 = vadd.f32 %v11534_v57, %v11532_v56 }
 0x48e   :  { %11535 = vrcp.f32 %v1336_v60 }
 0x494   :  { %v9622_v62 = vpop.f32.mrb[8].mxu0 }
 0x495   :  { %v9623_v63 = vpop.f32.mrb[9].mxu0 }
 0x496   :  { %v9624_v0 = vadd.f32 %v9623_v63, %v9622_v62 }
 0x498   :  { %v11536_v2 = vpop.eup %11535  ;;  %v1640_v48 = vmul.f32 0.17677669, %v9624_v0  ;;  %v10523_v0 = vld [vmem:[#allocation14] ss:$8 sps:$4 sm:$0xff]  }
 0x499   :  { %v1338_v4 = vmul.f32 %v11536_v2, %v11532_v56  ;;  %v1416_v8 = vmul.f32 %v11536_v2, %v11534_v57  ;;  %v10525_v2 = vld [vmem:[#allocation14 + $0x4] ss:$8 sps:$4 sm:$0xff]  }
 0x49b   :  { %8801 = vmatmul.mubr.msk.f32.vlgmr.msra.gmra.mrb[12].mxu1 %vm1339_vm2, %v1338_v4  ;;  %v10528_v4 = vld [vmem:[#allocation14 + $0x14] ss:$8 sps:$4 sm:$0xff]  }
 0x49c   :  { %1421 = vmatpush1.msra.mxu1 %v12540_v30  ;;  %1484 = vmatprep.mubr.f32.mxu1 %v12041_v7 }
 0x49d   :  { %10002 = vmatprep.subr.bf16.mxu1 %v12405_v61 }
 0x49f   :  { %8802 = vmatmul.mubr.msk.f32.vlgmr.msra.gmra.mrb[14].mxu1 %vm1339_vm2, %v1416_v8  ;;  %v10526_v8 = vld [vmem:[#allocation14 + $0x10] ss:$8 sps:$4 sm:$0xff]  }
 0x4a0   :  { %10004 = vmatpush3.bf16.msra.mxu1 %v12422_v18  ;;  %1561 = vmatprep.mubr.f32.mxu1 %v12499_v20 }
 0x4a1   :  { %10006 = vmatprep.subr.bf16.mxu1 %v12424_v19 }
 0x4a4   :  { %10008 = vmatpush3.bf16.msra.mxu1 %v12429_v26 }
 0x4a5   :  { %10010 = vmatprep.subr.bf16.mxu1 %v12432_v27 }
 0x4a8   :  { %10012 = vmatpush3.bf16.msra.mxu1 %v12435_v34 }
 0x4a9   :  { %10014 = vmatprep.subr.bf16.mxu1 %v12438_v35 }
 0x4ac   :  { %10016 = vmatpush3.bf16.msra.mxu1 %v12441_v42 }
 0x4ad   :  { %10018 = vmatprep.subr.bf16.mxu1 %v12444_v43 }
 0x4b0   :  { %10020 = vmatpush3.bf16.msra.mxu1 %v12447_v50 }
 0x4b1   :  { %10022 = vmatprep.subr.bf16.mxu1 %v12450_v51 }
 0x4b4   :  { %10024 = vmatpush3.bf16.msra.mxu1 %v12453_v58 }
 0x4b5   :  { %10026 = vmatprep.subr.bf16.mxu1 %v12456_v59 }
 0x4b8   :  { %10028 = vmatpush3.bf16.msra.mxu1 %v12459_v1 }
 0x4b9   :  { %10030 = vmatprep.subr.bf16.mxu1 %v12465_v32 }
 0x4bc   :  { %10032 = vmatpush3.bf16.msra.mxu1 %v12467_v37 }
 0x4bd   :  { %1654 = vmatprep.subr.mxu1 %v443_v29 }
 0x4bf   :  { %1562 = vmatmul.mubr.f32.vlgmr.msra.gmra.mrb[16].mxu1 %v12497_v13  ;;  %v12581_v13 = vadd.f32 %v12532_v24, %v567_v14  ;;  %v10529_v14 = vld [vmem:[#allocation14 + $0x20] ss:$8 sps:$4 sm:$0xff]  }
 0x4c0   :  { %1655 = vmatpush1.msra.mxu1 %v12540_v30  ;;  %1718 = vmatprep.mubr.f32.mxu1 %v12041_v7 }
 0x4c1   :  { %1731 = vmatprep.subr.mxu1 %v443_v29 }
 0x56e   :  { %v1409_v20 = vpop.f32.mrb[12].mxu1 }
 0x56f   :  { %v1414_v21 = vmul.f32 %v1409_v20, %v12578_v16  ;;  %v1411_v22 = vpop.f32.mrb[13].mxu1  ;;  %v10534_v20 = vld [vmem:[#allocation14 + $0x34] ss:$8 sps:$4 sm:$0xff]  }
 0x570   :  { %v1415_v29 = vmul.f32 %v1411_v22, %v12581_v13  ;;  %v10537_v22 = vld [vmem:[#allocation14 + $0x44] ss:$8 sps:$4 sm:$0xff]  }
 0x572   :  { %v1486_v33 = vpop.f32.mrb[14].mxu1 }
 0x573   :  { %v1491_v41 = vmul.f32 %v1486_v33, %v12586_v38  ;;  %v1488_v23 = vpop.f32.mrb[15].mxu1  ;;  %v10538_v33 = vld [vmem:[#allocation14 + $0x50] ss:$8 sps:$4 sm:$0xff]  }
 0x574   :  { %v1492_v36 = vmul.f32 %v1488_v23, %v12589_v31  ;;  %v10541_v23 = vld [vmem:[#allocation14 + $0x60] ss:$8 sps:$4 sm:$0xff]  }
 0x575   :  { %v12593_v24 = vadd.f32 %v1491_v41, %v1414_v21  ;;  %v10532_v21 = vld [vmem:[#allocation14 + $0x30] ss:$8 sps:$4 sm:$0xff]   ;;  %v10543_v41 = vld [vmem:[#allocation14 + $0x64] ss:$8 sps:$4 sm:$0xff]  }
 0x576   :  { %v12595_v45 = vadd.f32 %v1492_v36, %v1415_v29  ;;  %v10540_v29 = vld [vmem:[#allocation14 + $0x54] ss:$8 sps:$4 sm:$0xff]  }
 0x577   :  { %v10546_v36 = vld [vmem:[#allocation14 + $0x74] ss:$8 sps:$4 sm:$0xff]  }
 0x592   :  { %v9587_v17 = vpop.f32.mrb[16].mxu1 }
 0x593   :  { %v9588_v46 = vpop.f32.mrb[17].mxu1 }
 0x594   :  { %v9589_v47 = vadd.f32 %v9588_v46, %v9587_v17  ;;  %v10544_v17 = vld [vmem:[#allocation14 + $0x70] ss:$8 sps:$4 sm:$0xff]   ;;  %v10549_v46 = vld [vmem:[#allocation14 + $0x84] ss:$8 sps:$4 sm:$0xff]  }
 0x596   :  { %v1567_v49 = vmul.f32 0.17677669, %v9589_v47  ;;  %v10547_v47 = vld [vmem:[#allocation14 + $0x80] ss:$8 sps:$4 sm:$0xff]  }
 0x598   :  { %v1641_v25 = vmax.f32 %v1567_v49, %v1640_v48 }
 0x59a   :  { %v1642_v52 = vsub.f32 %v1567_v49, %v1641_v25  ;;  %v1645_v53 = vsub.f32 %v1640_v48, %v1641_v25  ;;  %v10552_v48 = vld [vmem:[#allocation14 + $0x94] ss:$8 sps:$4 sm:$0xff]   ;;  %v10550_v49 = vld [vmem:[#allocation14 + $0x90] ss:$8 sps:$4 sm:$0xff]   ;;  %v10555_v25 = vld [vmem:[#allocation14 + $0xa4] ss:$8 sps:$4 sm:$0xff]  }
 0x59c   :  { %v1643_v28 = vmul.f32 1.442695, %v1642_v52  ;;  %v1646_v54 = vmul.f32 1.442695, %v1645_v53  ;;  %v10553_v52 = vld [vmem:[#allocation14 + $0xa0] ss:$8 sps:$4 sm:$0xff]  }
 0x59d   :  { %v10558_v53 = vld [vmem:[#allocation14 + $0xb4] ss:$8 sps:$4 sm:$0xff]  }
 0x59e   :  { %11537 = vpow2.f32 %v1643_v28  ;;  %v10556_v28 = vld [vmem:[#allocation14 + $0xb0] ss:$8 sps:$4 sm:$0xff]  }
 0x59f   :  { %11539 = vpow2.f32 %v1646_v54  ;;  %v10561_v54 = vld [vmem:[#allocation14 + $0xc4] ss:$8 sps:$4 sm:$0xff]  }
 0x5a8   :  { %v11538_v55 = vpop.eup %11537 }
 0x5a9   :  { %v11540_v56 = vpop.eup %11539 }
 0x5aa   :  { %v1648_v57 = vadd.f32 %v11540_v56, %v11538_v55 }
 0x5ac   :  { %11541 = vrcp.f32 %v1648_v57  ;;  %v10562_v57 = vld [vmem:[#allocation14 + $0xd0] ss:$8 sps:$4 sm:$0xff]  }
 0x5b6   :  { %v11542_v60 = vpop.eup %11541 }
 0x5b7   :  { %v1650_v62 = vmul.f32 %v11542_v60, %v11538_v55  ;;  %v1727_v63 = vmul.f32 %v11542_v60, %v11540_v56  ;;  %v10559_v55 = vld [vmem:[#allocation14 + $0xc0] ss:$8 sps:$4 sm:$0xff]   ;;  %v10564_v56 = vld [vmem:[#allocation14 + $0xd4] ss:$8 sps:$4 sm:$0xff]   ;;  %v10567_v60 = vld [vmem:[#allocation14 + $0xe4] ss:$8 sps:$4 sm:$0xff]  }
 0x5b9   :  { %8803 = vmatmul.mubr.msk.f32.vlgmr.msra.gmra.mrb[18].mxu1 %vm1339_vm2, %v1650_v62  ;;  %v10565_v62 = vld [vmem:[#allocation14 + $0xe0] ss:$8 sps:$4 sm:$0xff]  }
 0x5ba   :  { %1732 = vmatpush1.msra.mxu1 %v12540_v30  ;;  %1795 = vmatprep.mubr.f32.mxu1 %v12041_v7  ;;  %v10535_v30 = vld [vmem:[#allocation14 + $0x40] ss:$8 sps:$4 sm:$0xff]  }
 0x5bb   :  { %2012 = vmatprep.subr.bf16.mxu1 %v10525_v2  ;;  %v10568_v2 = vld [vmem:[#allocation14 + $0xf0] ss:$8 sps:$4 sm:$0xff]  }
 0x5bd   :  { %8804 = vmatmul.mubr.msk.f32.vlgmr.msra.gmra.mrb[20].mxu1 %vm1339_vm2, %v1727_v63  ;;  %v10570_v63 = vld [vmem:[#allocation14 + $0xf4] ss:$8 sps:$4 sm:$0xff]  }
 0x5be   :  { %2013 = vmatpush1.bf16.msra.mxu1 %v10523_v0 }
 0x5bf   :  { %2014 = vmatprep.subr.bf16.mxu1 %v10528_v4 }
 0x5c2   :  { %2015 = vmatpush1.bf16.msra.mxu1 %v10526_v8 }
 0x5c3   :  { %2016 = vmatprep.subr.bf16.mxu1 %v10531_v12 }
 0x5c6   :  { %2017 = vmatpush1.bf16.msra.mxu1 %v10529_v14 }
 0x5c7   :  { %2018 = vmatprep.subr.bf16.mxu1 %v10534_v20 }
 0x5ca   :  { %2019 = vmatpush1.bf16.msra.mxu1 %v10532_v21 }
 0x5cb   :  { %2020 = vmatprep.subr.bf16.mxu1 %v10537_v22 }
 0x5ce   :  { %2021 = vmatpush1.bf16.msra.mxu1 %v10535_v30 }
 0x5cf   :  { %2022 = vmatprep.subr.bf16.mxu1 %v10540_v29 }
 0x5d2   :  { %2023 = vmatpush1.bf16.msra.mxu1 %v10538_v33 }
 0x5d3   :  { %2024 = vmatprep.subr.bf16.mxu1 %v10543_v41 }
 0x5d6   :  { %2025 = vmatpush1.bf16.msra.mxu1 %v10541_v23  ;;  %v1840_v23 = vld [vmem:[#allocation16] sm:$0x3] }
 0x5d7   :  { %2026 = vmatprep.subr.bf16.mxu1 %v10546_v36  ;;  %v1849_v36 = vrot.slane %v1840_v23, %v12482_v40 }
 0x5da   :  { %2027 = vmatpush1.bf16.msra.mxu1 %v10544_v17 }
 0x5db   :  { %2028 = vmatprep.subr.bf16.mxu1 %v10549_v46 }
 0x5de   :  { %2029 = vmatpush1.bf16.msra.mxu1 %v10547_v47 }
 0x5df   :  { %2030 = vmatprep.subr.bf16.mxu1 %v10552_v48 }
 0x5e2   :  { %2031 = vmatpush1.bf16.msra.mxu1 %v10550_v49 }
 0x5e3   :  { %2032 = vmatprep.subr.bf16.mxu1 %v10555_v25 }
 0x5e6   :  { %2033 = vmatpush1.bf16.msra.mxu1 %v10553_v52 }
 0x5e7   :  { %2034 = vmatprep.subr.bf16.mxu1 %v10558_v53 }
 0x5ea   :  { %2035 = vmatpush1.bf16.msra.mxu1 %v10556_v28 }
 0x5eb   :  { %2036 = vmatprep.subr.bf16.mxu1 %v10561_v54  ;;  %v10573_v54 = vld [vmem:[#allocation20 + $0x4] ss:$16 sps:$4 sm:$0xff]  }
 0x5ec   :  { %2532 = vmatprep.subr.bf16.mxu0 %v10573_v54 }
 0x5ee   :  { %2037 = vmatpush1.bf16.msra.mxu1 %v10559_v55  ;;  %v10574_v55 = vld [vmem:[#allocation20 + $0x8] ss:$16 sps:$4 sm:$0xff]  }
 0x5ef   :  { %2038 = vmatprep.subr.bf16.mxu1 %v10564_v56  ;;  %v10576_v56 = vld [vmem:[#allocation20 + $0xc] ss:$16 sps:$4 sm:$0xff]  }
 0x5f2   :  { %2039 = vmatpush1.bf16.msra.mxu1 %v10562_v57  ;;  %v10582_v57 = vld [vmem:[#allocation20 + $0x2c] ss:$16 sps:$4 sm:$0xff]  }
 0x5f3   :  { %2040 = vmatprep.subr.bf16.mxu1 %v10567_v60  ;;  %v10585_v60 = vld [vmem:[#allocation20 + $0x44] ss:$16 sps:$4 sm:$0xff]  }
 0x5f6   :  { %2041 = vmatpush1.bf16.msra.mxu1 %v10565_v62  ;;  %v10588_v62 = vld [vmem:[#allocation20 + $0x4c] ss:$16 sps:$4 sm:$0xff]  }
 0x5f7   :  { %2042 = vmatprep.subr.bf16.mxu1 %v10570_v63  ;;  %v10583_v63 = vld [vmem:[#allocation20 + $0x40] ss:$16 sps:$4 sm:$0xff]  }
 0x5fa   :  { %2043 = vmatpush1.bf16.msra.mxu1 %v10568_v2  ;;  %v10586_v2 = vld [vmem:[#allocation20 + $0x48] ss:$16 sps:$4 sm:$0xff]  }
 0x5fb   :  { %2575 = vmatprep.subr.bf16.mxu1 %v10576_v56 }
 0x68c   :  { %v1720_v0 = vpop.f32.mrb[18].mxu1 }
 0x68d   :  { %v1725_v4 = vmul.f32 %v1720_v0, %v12578_v16  ;;  %v1722_v8 = vpop.f32.mrb[19].mxu1  ;;  %v1845_v16 = vrot.slane %v1840_v23, %v12476_v15  ;;  %v10591_v0 = vld [vmem:[#allocation20 + $0x64] ss:$16 sps:$4 sm:$0xff]  }
 0x68e   :  { %v1726_v12 = vmul.f32 %v1722_v8, %v12581_v13  ;;  %v10589_v8 = vld [vmem:[#allocation20 + $0x60] ss:$16 sps:$4 sm:$0xff]   ;;  %v10609_v23 = vld [vmem:[#allocation20 + $0xc4] ss:$16 sps:$4 sm:$0xff]  }
 0x690   :  { %v1797_v14 = vpop.f32.mrb[20].mxu1 }
 0x691   :  { %v1802_v20 = vmul.f32 %v1797_v14, %v12586_v38  ;;  %v1799_v21 = vpop.f32.mrb[21].mxu1  ;;  %v10597_v14 = vld [vmem:[#allocation20 + $0x84] ss:$16 sps:$4 sm:$0xff]  }
 0x692   :  { %v1803_v22 = vmul.f32 %v1799_v21, %v12589_v31  ;;  %v10595_v21 = vld [vmem:[#allocation20 + $0x80] ss:$16 sps:$4 sm:$0xff]  }
 0x693   :  { %v1804_v30 = vadd.f32 %v1802_v20, %v1725_v4  ;;  %v10594_v4 = vld [vmem:[#allocation20 + $0x6c] ss:$16 sps:$4 sm:$0xff]  }
 0x694   :  { %v1805_v29 = vadd.f32 %v1803_v22, %v1726_v12  ;;  %v10592_v12 = vld [vmem:[#allocation20 + $0x68] ss:$16 sps:$4 sm:$0xff]   ;;  %v10600_v20 = vld [vmem:[#allocation20 + $0x8c] ss:$16 sps:$4 sm:$0xff]  }
 0x695   :  { %v1806_v33 = vpack.c.bf16 %v1804_v30, %v12593_v24  ;;  %v10598_v22 = vld [vmem:[#allocation20 + $0x88] ss:$16 sps:$4 sm:$0xff]   ;;  %v10603_v30 = vld [vmem:[#allocation20 + $0xa4] ss:$16 sps:$4 sm:$0xff]  }
 0x696   :  { %v1807_v41 = vpack.c.bf16 %v1805_v29, %v12595_v45  ;;  %v10606_v29 = vld [vmem:[#allocation20 + $0xac] ss:$16 sps:$4 sm:$0xff]  }
 0x698   :  { %2044 = vmatprep.mubr.bf16.mxu1 %v1807_v41  ;;  %v10604_v41 = vld [vmem:[#allocation20 + $0xa8] ss:$16 sps:$4 sm:$0xff]  }
 0x699   :  { %2045 = vmatmul.mubr.bf16.vlgmr.msra.gmra.mrb[24].mxu1 %v1806_v33  ;;  %v10601_v33 = vld [vmem:[#allocation20 + $0xa0] ss:$16 sps:$4 sm:$0xff]  }
 0x69a   :  { %2576 = vmatpush1.bf16.msra.mxu1 %v10574_v55 }
 0x69b   :  { %2577 = vmatprep.subr.bf16.mxu1 %v10582_v57 }
 0x76c   :  { %v2046_v13 = vpop.f32.mrb[24].mxu1 }
 0x76d   :  { %v2047_v17 = vadd.f32 %v2046_v13, %v1845_v16  ;;  %v2048_v46 = vpop.f32.mrb[25].mxu1  ;;  %v10610_v13 = vld [vmem:[#allocation20 + $0xc8] ss:$16 sps:$4 sm:$0xff]  }
 0x76e   :  { %v2049_v38 = vadd.f32 %v2048_v46, %v1849_v36  ;;  %v2050_v47 = vpop.f32.mrb[26].mxu1  ;;  %v10618_v46 = vld [vmem:[#allocation20 + $0xec] ss:$16 sps:$4 sm:$0xff]  }
 0x76f   :  { %v2051_v48 = vadd.f32 %v2050_v47, %v1845_v16  ;;  %v2052_v31 = vpop.f32.mrb[27].mxu1  ;;  %v12610_v49 = vadd.f32 %v2047_v17, %v12414_v10  ;;  %v10571_v10 = vld [vmem:[#allocation20] ss:$16 sps:$4 sm:$0xff]   ;;  %v10612_v16 = vld [vmem:[#allocation20 + $0xcc] ss:$16 sps:$4 sm:$0xff]  }
 0x770   :  { %v2053_v24 = vadd.f32 %v2052_v31, %v1849_v36  ;;  %v12613_v45 = vadd.f32 %v2049_v38, %v12410_v5  ;;  %v10579_v5 = vld [vmem:[#allocation20 + $0x24] ss:$16 sps:$4 sm:$0xff]   ;;  %2533 = vmatpush1.bf16.msra.mxu0 %v10571_v10  ;;  %v10607_v36 = vld [vmem:[#allocation20 + $0xc0] ss:$16 sps:$4 sm:$0xff]   ;;  %v10616_v47 = vld [vmem:[#allocation20 + $0xe8] ss:$16 sps:$4 sm:$0xff]  }
 0x771   :  { %v12616_v25 = vadd.f32 %v2051_v48, %v12408_v3  ;;  %v10577_v3 = vld [vmem:[#allocation20 + $0x20] ss:$16 sps:$4 sm:$0xff]   ;;  %2534 = vmatprep.subr.bf16.mxu0 %v10579_v5  ;;  %v10615_v17 = vld [vmem:[#allocation20 + $0xe4] ss:$16 sps:$4 sm:$0xff]   ;;  %v10624_v31 = vld [vmem:[#allocation20 + $0x10c] ss:$16 sps:$4 sm:$0xff]  }
 0x772   :  { %v12619_v52 = vadd.f32 %v2053_v24, %v12412_v6  ;;  %v2061_v53 = vadd.f32 %v12613_v45, %v12610_v49  ;;  %v10580_v6 = vld [vmem:[#allocation20 + $0x28] ss:$16 sps:$4 sm:$0xff]   ;;  %v10613_v38 = vld [vmem:[#allocation20 + $0xe0] ss:$16 sps:$4 sm:$0xff]   ;;  %v10621_v48 = vld [vmem:[#allocation20 + $0x104] ss:$16 sps:$4 sm:$0xff]  }
 0x773   :  { %2578 = vmatpush1.bf16.msra.mxu1 %v10580_v6  ;;  %v10619_v24 = vld [vmem:[#allocation20 + $0x100] ss:$16 sps:$4 sm:$0xff]  }
 0x774   :  { %2062 = vadd.xlane.f32.xlu1 %v2061_v53  ;;  %v2064_v28 = vadd.f32 %v12619_v52, %v12616_v25  ;;  %2535 = vmatpush1.bf16.msra.mxu0 %v10577_v3  ;;  %v10622_v53 = vld [vmem:[#allocation20 + $0x108] ss:$16 sps:$4 sm:$0xff]  }
 0x775   :  { %2536 = vmatprep.subr.bf16.mxu0 %v10585_v60  ;;  %2579 = vmatprep.subr.bf16.mxu1 %v10588_v62 }
 0x777   :  { %2580 = vmatpush1.bf16.msra.mxu1 %v10586_v2  ;;  %v10627_v2 = vld [vmem:[#allocation20 + $0x124] ss:$16 sps:$4 sm:$0xff]  }
 0x778   :  { %2065 = vadd.xlane.f32.xlu1 %v2064_v28  ;;  %2537 = vmatpush1.bf16.msra.mxu0 %v10583_v63 }
 0x779   :  { %2538 = vmatprep.subr.bf16.mxu0 %v10591_v0  ;;  %2581 = vmatprep.subr.bf16.mxu1 %v10594_v4  ;;  %v10630_v0 = vld [vmem:[#allocation20 + $0x12c] ss:$16 sps:$4 sm:$0xff]   ;;  %v10625_v4 = vld [vmem:[#allocation20 + $0x120] ss:$16 sps:$4 sm:$0xff]  }
 0x77b   :  { %2582 = vmatpush1.bf16.msra.mxu1 %v10592_v12  ;;  %v10631_v12 = vld [vmem:[#allocation20 + $0x140] ss:$16 sps:$4 sm:$0xff]  }
 0x77c   :  { %2539 = vmatpush1.bf16.msra.mxu0 %v10589_v8  ;;  %2583 = vmatprep.subr.bf16.mxu1 %v10600_v20  ;;  %v10628_v8 = vld [vmem:[#allocation20 + $0x128] ss:$16 sps:$4 sm:$0xff]   ;;  %v10639_v20 = vld [vmem:[#allocation20 + $0x164] ss:$16 sps:$4 sm:$0xff]  }
 0x77d   :  { %2540 = vmatprep.subr.bf16.mxu0 %v10597_v14  ;;  %v10634_v14 = vld [vmem:[#allocation20 + $0x148] ss:$16 sps:$4 sm:$0xff]  }
 0x77f   :  { %2584 = vmatpush1.bf16.msra.mxu1 %v10598_v22  ;;  %v10637_v22 = vld [vmem:[#allocation20 + $0x160] ss:$16 sps:$4 sm:$0xff]  }
 0x780   :  { %2541 = vmatpush1.bf16.msra.mxu0 %v10595_v21  ;;  %2585 = vmatprep.subr.bf16.mxu1 %v10606_v29  ;;  %v10642_v21 = vld [vmem:[#allocation20 + $0x16c] ss:$16 sps:$4 sm:$0xff]   ;;  %v10645_v29 = vld [vmem:[#allocation20 + $0x184] ss:$16 sps:$4 sm:$0xff]  }
 0x781   :  { %2542 = vmatprep.subr.bf16.mxu0 %v10603_v30  ;;  %v10640_v30 = vld [vmem:[#allocation20 + $0x168] ss:$16 sps:$4 sm:$0xff]  }
 0x783   :  { %2586 = vmatpush1.bf16.msra.mxu1 %v10604_v41  ;;  %v10643_v41 = vld [vmem:[#allocation20 + $0x180] ss:$16 sps:$4 sm:$0xff]  }
 0x784   :  { %2543 = vmatpush1.bf16.msra.mxu0 %v10601_v33  ;;  %2587 = vmatprep.subr.bf16.mxu1 %v10612_v16  ;;  %v10648_v33 = vld [vmem:[#allocation20 + $0x18c] ss:$16 sps:$4 sm:$0xff]   ;;  %v10651_v16 = vld [vmem:[#allocation20 + $0x1a4] ss:$16 sps:$4 sm:$0xff]  }
 0x785   :  { %2544 = vmatprep.subr.bf16.mxu0 %v10609_v23  ;;  %v10646_v23 = vld [vmem:[#allocation20 + $0x188] ss:$16 sps:$4 sm:$0xff]  }
 0x787   :  { %2588 = vmatpush1.bf16.msra.mxu1 %v10610_v13  ;;  %v10649_v13 = vld [vmem:[#allocation20 + $0x1a0] ss:$16 sps:$4 sm:$0xff]  }
 0x788   :  { %2545 = vmatpush1.bf16.msra.mxu0 %v10607_v36  ;;  %2589 = vmatprep.subr.bf16.mxu1 %v10618_v46  ;;  %v10654_v36 = vld [vmem:[#allocation20 + $0x1ac] ss:$16 sps:$4 sm:$0xff]   ;;  %v10657_v46 = vld [vmem:[#allocation20 + $0x1c4] ss:$16 sps:$4 sm:$0xff]  }
 0x789   :  { %2546 = vmatprep.subr.bf16.mxu0 %v10615_v17  ;;  %v10652_v17 = vld [vmem:[#allocation20 + $0x1a8] ss:$16 sps:$4 sm:$0xff]  }
 0x78b   :  { %2590 = vmatpush1.bf16.msra.mxu1 %v10616_v47  ;;  %v10655_v47 = vld [vmem:[#allocation20 + $0x1c0] ss:$16 sps:$4 sm:$0xff]  }
 0x78c   :  { %2547 = vmatpush1.bf16.msra.mxu0 %v10613_v38  ;;  %2591 = vmatprep.subr.bf16.mxu1 %v10624_v31  ;;  %v10660_v38 = vld [vmem:[#allocation20 + $0x1cc] ss:$16 sps:$4 sm:$0xff]   ;;  %v10663_v31 = vld [vmem:[#allocation20 + $0x1e4] ss:$16 sps:$4 sm:$0xff]  }
 0x78d   :  { %2548 = vmatprep.subr.bf16.mxu0 %v10621_v48  ;;  %v10658_v48 = vld [vmem:[#allocation20 + $0x1c8] ss:$16 sps:$4 sm:$0xff]  }
 0x78f   :  { %2592 = vmatpush1.bf16.msra.mxu1 %v10622_v53  ;;  %v10661_v53 = vld [vmem:[#allocation20 + $0x1e0] ss:$16 sps:$4 sm:$0xff]  }
 0x790   :  { %2549 = vmatpush1.bf16.msra.mxu0 %v10619_v24  ;;  %2593 = vmatprep.subr.bf16.mxu1 %v10630_v0  ;;  %v10666_v24 = vld [vmem:[#allocation20 + $0x1ec] ss:$16 sps:$4 sm:$0xff]   ;;  %v2060_v0 = vld [vmem:[#allocation19] sm:$0x3] }
 0x791   :  { %2550 = vmatprep.subr.bf16.mxu0 %v10627_v2 }
 0x793   :  { %2594 = vmatpush1.bf16.msra.mxu1 %v10628_v8 }
 0x794   :  { %2551 = vmatpush1.bf16.msra.mxu0 %v10625_v4 }
 0x801   :  { %v2063_v28 = vpop.xlane.xlu1 %2062 }
 0x802   :  { %v2068_v10 = vmul.f32 0.00390625, %v2063_v28  ;;  %v10664_v28 = vld [vmem:[#allocation20 + $0x1e8] ss:$16 sps:$4 sm:$0xff]  }
 0x804   :  { %v12626_v54 = vsub.f32 %v12610_v49, %v2068_v10  ;;  %v12629_v55 = vsub.f32 %v12613_v45, %v2068_v10  ;;  %v10669_v10 = vld [vmem:[#allocation23 + $0x4] ss:$8 sps:$4 sm:$0xff]  }
 0x805   :  { %v2066_v56 = vpop.xlane.xlu1 %2065 }
 0x806   :  { %v2069_v5 = vmul.f32 0.00390625, %v2066_v56  ;;  %v2074_v57 = vmul.f32 %v12626_v54, %v12626_v54  ;;  %v2075_v3 = vmul.f32 %v12629_v55, %v12629_v55 }
 0x808   :  { %v12636_v6 = vsub.f32 %v12616_v25, %v2069_v5  ;;  %v12639_v60 = vsub.f32 %v12619_v52, %v2069_v5  ;;  %v2078_v62 = vadd.f32 %v2075_v3, %v2074_v57  ;;  %v10633_v25 = vld [vmem:[#allocation20 + $0x144] ss:$16 sps:$4 sm:$0xff]   ;;  %v10636_v52 = vld [vmem:[#allocation20 + $0x14c] ss:$16 sps:$4 sm:$0xff]  }
 0x809   :  { %2552 = vmatprep.subr.bf16.mxu0 %v10633_v25  ;;  %2595 = vmatprep.subr.bf16.mxu1 %v10636_v52 }
 0x80a   :  { %2079 = vadd.xlane.f32.xlu0 %v2078_v62  ;;  %v2076_v49 = vmul.f32 %v12636_v6, %v12636_v6  ;;  %v2077_v45 = vmul.f32 %v12639_v60, %v12639_v60  ;;  %2553 = vmatpush1.bf16.msra.mxu0 %v10631_v12  ;;  %v2113_v12 = vrot.slane %v2060_v0, %v12476_v15 }
 0x80b   :  { %2596 = vmatpush1.bf16.msra.mxu1 %v10634_v14  ;;  %2554 = vmatprep.subr.bf16.mxu0 %v10639_v20  ;;  %v2117_v14 = vrot.slane %v2060_v0, %v12482_v40  ;;  %v10700_v0 = vld [vmem:[#allocation23 + $0xb0] ss:$8 sps:$4 sm:$0xff]  }
 0x80c   :  { %v2081_v63 = vadd.f32 %v2077_v45, %v2076_v49  ;;  %2597 = vmatprep.subr.bf16.mxu1 %v10642_v21  ;;  %v2059_v45 = vld [vmem:[#allocation17] sm:$0x3] }
 0x80d   :  { %v2098_v8 = vrot.slane %v2059_v45, %v12476_v15  ;;  %v2102_v25 = vrot.slane %v2059_v45, %v12482_v40  ;;  %v10699_v45 = vld [vmem:[#allocation23 + $0xa4] ss:$8 sps:$4 sm:$0xff]  }
 0x80e   :  { %2082 = vadd.xlane.f32.xlu1 %v2081_v63  ;;  %2555 = vmatpush1.bf16.msra.mxu0 %v10637_v22 }
 0x80f   :  { %2598 = vmatpush1.bf16.msra.mxu1 %v10640_v30  ;;  %2556 = vmatprep.subr.bf16.mxu0 %v10645_v29 }
 0x810   :  { %2599 = vmatprep.subr.bf16.mxu1 %v10648_v33 }
 0x812   :  { %2557 = vmatpush1.bf16.msra.mxu0 %v10643_v41 }
 0x813   :  { %2600 = vmatpush1.bf16.msra.mxu1 %v10646_v23  ;;  %2558 = vmatprep.subr.bf16.mxu0 %v10651_v16 }
 0x814   :  { %2601 = vmatprep.subr.bf16.mxu1 %v10654_v36  ;;  %v10667_v36 = vld [vmem:[#allocation23] ss:$8 sps:$4 sm:$0xff]  }
 0x816   :  { %2559 = vmatpush1.bf16.msra.mxu0 %v10649_v13  ;;  %v10670_v13 = vld [vmem:[#allocation23 + $0x10] ss:$8 sps:$4 sm:$0xff]  }
 0x817   :  { %2602 = vmatpush1.bf16.msra.mxu1 %v10652_v17  ;;  %2560 = vmatprep.subr.bf16.mxu0 %v10657_v46  ;;  %v10675_v17 = vld [vmem:[#allocation23 + $0x24] ss:$8 sps:$4 sm:$0xff]   ;;  %v10673_v46 = vld [vmem:[#allocation23 + $0x20] ss:$8 sps:$4 sm:$0xff]  }
 0x818   :  { %2603 = vmatprep.subr.bf16.mxu1 %v10660_v38  ;;  %v10678_v38 = vld [vmem:[#allocation23 + $0x34] ss:$8 sps:$4 sm:$0xff]  }
 0x81a   :  { %2561 = vmatpush1.bf16.msra.mxu0 %v10655_v47  ;;  %v10676_v47 = vld [vmem:[#allocation23 + $0x30] ss:$8 sps:$4 sm:$0xff]  }
 0x81b   :  { %2604 = vmatpush1.bf16.msra.mxu1 %v10658_v48  ;;  %2562 = vmatprep.subr.bf16.mxu0 %v10663_v31  ;;  %v10681_v48 = vld [vmem:[#allocation23 + $0x44] ss:$8 sps:$4 sm:$0xff]   ;;  %v10679_v31 = vld [vmem:[#allocation23 + $0x40] ss:$8 sps:$4 sm:$0xff]  }
 0x81c   :  { %2605 = vmatprep.subr.bf16.mxu1 %v10666_v24  ;;  %v10684_v24 = vld [vmem:[#allocation23 + $0x54] ss:$8 sps:$4 sm:$0xff]  }
 0x81e   :  { %2563 = vmatpush1.bf16.msra.mxu0 %v10661_v53  ;;  %v10682_v53 = vld [vmem:[#allocation23 + $0x50] ss:$8 sps:$4 sm:$0xff]  }
 0x81f   :  { %2606 = vmatpush1.bf16.msra.mxu1 %v10664_v28  ;;  %3026 = vmatprep.subr.bf16.mxu0 %v10669_v10  ;;  %v10687_v28 = vld [vmem:[#allocation23 + $0x64] ss:$8 sps:$4 sm:$0xff]   ;;  %v10685_v10 = vld [vmem:[#allocation23 + $0x60] ss:$8 sps:$4 sm:$0xff]  }
 0x897   :  { %v2080_v56 = vpop.xlane.xlu0 %2079 }
 0x898   :  { %v2084_v5 = vmul.f32 0.00390625, %v2080_v56  ;;  %v10690_v56 = vld [vmem:[#allocation23 + $0x74] ss:$8 sps:$4 sm:$0xff]  }
 0x89a   :  { %v2086_v57 = vadd.f32 1e-05, %v2084_v5  ;;  %v10688_v5 = vld [vmem:[#allocation23 + $0x70] ss:$8 sps:$4 sm:$0xff]  }
 0x89b   :  { %v2083_v3 = vpop.xlane.xlu1 %2082 }
 0x89c   :  { %11543 = vrsqrt.f32 %v2086_v57  ;;  %v2085_v62 = vmul.f32 0.00390625, %v2083_v3  ;;  %v10693_v57 = vld [vmem:[#allocation23 + $0x84] ss:$8 sps:$4 sm:$0xff]   ;;  %v10691_v3 = vld [vmem:[#allocation23 + $0x80] ss:$8 sps:$4 sm:$0xff]  }
 0x89e   :  { %v2087_v49 = vadd.f32 1e-05, %v2085_v62  ;;  %v10696_v62 = vld [vmem:[#allocation23 + $0x94] ss:$8 sps:$4 sm:$0xff]  }
 0x8a0   :  { %11545 = vrsqrt.f32 %v2087_v49  ;;  %v10694_v49 = vld [vmem:[#allocation23 + $0x90] ss:$8 sps:$4 sm:$0xff]  }
 0x8a6   :  { %v11544_v63 = vpop.eup %11543 }
 0x8a7   :  { %v2090_v2 = vmul.f32 %v11544_v63, %v12626_v54  ;;  %v2091_v4 = vmul.f32 %v11544_v63, %v12629_v55  ;;  %v10697_v63 = vld [vmem:[#allocation23 + $0xa0] ss:$8 sps:$4 sm:$0xff]  }
 0x8a9   :  { %v2106_v22 = vmul.f32 %v2102_v25, %v2091_v4  ;;  %v2105_v30 = vmul.f32 %v2098_v8, %v2090_v2  ;;  %v10702_v2 = vld [vmem:[#allocation23 + $0xb4] ss:$8 sps:$4 sm:$0xff]   ;;  %v10705_v4 = vld [vmem:[#allocation23 + $0xc4] ss:$8 sps:$4 sm:$0xff]  }
 0x8aa   :  { %v11546_v52 = vpop.eup %11545 }
 0x8ab   :  { %v2092_v20 = vmul.f32 %v11546_v52, %v12636_v6  ;;  %v2093_v21 = vmul.f32 %v11546_v52, %v12639_v60  ;;  %v12653_v33 = vadd.f32 %v2117_v14, %v2106_v22  ;;  %v12657_v41 = vadd.f32 %v2113_v12, %v2105_v30  ;;  %v10672_v60 = vld [vmem:[#allocation23 + $0x14] ss:$8 sps:$4 sm:$0xff]   ;;  %v10706_v52 = vld [vmem:[#allocation23 + $0xd0] ss:$8 sps:$4 sm:$0xff]   ;;  %v10717_v22 = vld [vmem:[#allocation23 + $0x104] ss:$8 sps:$4 sm:$0xff]  }
 0x8ac   :  { %v2190_v30 = vld [vmem:[#allocation22] sm:$0xf] }
 0x8ad   :  { %v2108_v29 = vmul.f32 %v2102_v25, %v2093_v21  ;;  %v2107_v54 = vmul.f32 %v2098_v8, %v2092_v20  ;;  %v10703_v8 = vld [vmem:[#allocation23 + $0xc0] ss:$8 sps:$4 sm:$0xff]   ;;  %v10708_v25 = vld [vmem:[#allocation23 + $0xd4] ss:$8 sps:$4 sm:$0xff]   ;;  %v10712_v21 = vld [vmem:[#allocation23 + $0xf0] ss:$8 sps:$4 sm:$0xff]  }
 0x8ae   :  { %v10714_v20 = vld [vmem:[#allocation23 + $0xf4] ss:$8 sps:$4 sm:$0xff]  }
 0x8af   :  { %v12655_v55 = vadd.f32 %v2117_v14, %v2108_v29  ;;  %v12659_v23 = vadd.f32 %v2113_v12, %v2107_v54  ;;  %v10711_v12 = vld [vmem:[#allocation23 + $0xe4] ss:$8 sps:$4 sm:$0xff]   ;;  %v10709_v14 = vld [vmem:[#allocation23 + $0xe0] ss:$8 sps:$4 sm:$0xff]   ;;  %v2195_v29 = vrot.slane %v2190_v30, %v12476_v15  ;;  %v2203_v54 = vrot.slane %v2190_v30, %v12479_v39 }
 0x8b1   :  { %v2125_v16 = vpack.c.bf16 %v12655_v55, %v12653_v33  ;;  %v2124_v6 = vpack.c.bf16 %v12659_v23, %v12657_v41 }
 0x8b3   :  { %2564 = vmatprep.mubr.bf16.mxu0 %v2125_v16  ;;  %2607 = vmatprep.mubr.bf16.mxu1 %v2125_v16  ;;  %v2199_v16 = vrot.slane %v2190_v30, %v12482_v40 }
 0x8b4   :  { %2565 = vmatmul.mubr.bf16.vlgmr.msra.gmra.mrb[12].mxu0 %v2124_v6  ;;  %2608 = vmatmul.mubr.bf16.vlgmr.msra.gmra.mrb[28].mxu1 %v2124_v6  ;;  %v2207_v6 = vrot.slane %v2190_v30, %v12487_v44  ;;  %v10721_v30 = vld [vmem:[#allocation23 + $0x120] ss:$8 sps:$4 sm:$0xff]  }
 0x8b5   :  { %3027 = vmatpush1.bf16.msra.mxu0 %v10667_v36 }
 0x8b6   :  { %3028 = vmatprep.subr.bf16.mxu0 %v10672_v60 }
 0x8b9   :  { %3029 = vmatpush1.bf16.msra.mxu0 %v10670_v13 }
 0x8ba   :  { %3030 = vmatprep.subr.bf16.mxu0 %v10675_v17 }
 0x8bd   :  { %3031 = vmatpush1.bf16.msra.mxu0 %v10673_v46 }
 0x8be   :  { %3032 = vmatprep.subr.bf16.mxu0 %v10678_v38 }
 0x8c1   :  { %3033 = vmatpush1.bf16.msra.mxu0 %v10676_v47 }
 0x8c2   :  { %3034 = vmatprep.subr.bf16.mxu0 %v10681_v48 }
 0x8c5   :  { %3035 = vmatpush1.bf16.msra.mxu0 %v10679_v31 }
 0x8c6   :  { %3036 = vmatprep.subr.bf16.mxu0 %v10684_v24 }
 0x8c9   :  { %3037 = vmatpush1.bf16.msra.mxu0 %v10682_v53 }
 0x8ca   :  { %3038 = vmatprep.subr.bf16.mxu0 %v10687_v28 }
 0x8cd   :  { %3039 = vmatpush1.bf16.msra.mxu0 %v10685_v10 }
 0x8ce   :  { %3040 = vmatprep.subr.bf16.mxu0 %v10690_v56 }
 0x8d1   :  { %3041 = vmatpush1.bf16.msra.mxu0 %v10688_v5 }
 0x8d2   :  { %3042 = vmatprep.subr.bf16.mxu0 %v10693_v57 }
 0x8d5   :  { %3043 = vmatpush1.bf16.msra.mxu0 %v10691_v3 }
 0x8d6   :  { %3044 = vmatprep.subr.bf16.mxu0 %v10696_v62 }
 0x8d9   :  { %3045 = vmatpush1.bf16.msra.mxu0 %v10694_v49 }
 0x8da   :  { %3046 = vmatprep.subr.bf16.mxu0 %v10699_v45 }
 0x8dd   :  { %3047 = vmatpush1.bf16.msra.mxu0 %v10697_v63 }
 0x8de   :  { %3048 = vmatprep.subr.bf16.mxu0 %v10702_v2 }
 0x8e1   :  { %3049 = vmatpush1.bf16.msra.mxu0 %v10700_v0 }
 0x8e2   :  { %3050 = vmatprep.subr.bf16.mxu0 %v10705_v4 }
 0x8e5   :  { %3051 = vmatpush1.bf16.msra.mxu0 %v10703_v8 }
 0x8e6   :  { %3052 = vmatprep.subr.bf16.mxu0 %v10708_v25 }
 0x8e9   :  { %3053 = vmatpush1.bf16.msra.mxu0 %v10706_v52 }
 0x8ea   :  { %3054 = vmatprep.subr.bf16.mxu0 %v10711_v12 }
 0x8ed   :  { %3055 = vmatpush1.bf16.msra.mxu0 %v10709_v14  ;;  %v10715_v14 = vld [vmem:[#allocation23 + $0x100] ss:$8 sps:$4 sm:$0xff]  }
 0x8ee   :  { %3056 = vmatprep.subr.bf16.mxu0 %v10714_v20  ;;  %v10720_v20 = vld [vmem:[#allocation23 + $0x114] ss:$8 sps:$4 sm:$0xff]  }
 0x8f1   :  { %3057 = vmatpush1.bf16.msra.mxu0 %v10712_v21  ;;  %v10718_v21 = vld [vmem:[#allocation23 + $0x110] ss:$8 sps:$4 sm:$0xff]  }
 0x8f2   :  { %3069 = vmatprep.subr.bf16.mxu0 %v10717_v22  ;;  %v10723_v22 = vld [vmem:[#allocation23 + $0x124] ss:$8 sps:$4 sm:$0xff]  }
 0x987   :  { %v2566_v36 = vpop.f32.mrb[12].mxu0  ;;  %v2609_v60 = vpop.f32.mrb[28].mxu1 }
 0x988   :  { %v2567_v13 = vadd.f32 %v2566_v36, %v2195_v29  ;;  %v2610_v17 = vadd.f32 %v2609_v60, %v2203_v54  ;;  %v2568_v46 = vpop.f32.mrb[13].mxu0  ;;  %v2611_v38 = vpop.f32.mrb[29].mxu1  ;;  %v10732_v36 = vld [vmem:[#allocation23 + $0x154] ss:$8 sps:$4 sm:$0xff]   ;;  %v10730_v60 = vld [vmem:[#allocation23 + $0x150] ss:$8 sps:$4 sm:$0xff]  }
 0x989   :  { %v2569_v47 = vadd.f32 %v2568_v46, %v2199_v16  ;;  %v2612_v48 = vadd.f32 %v2611_v38, %v2207_v6  ;;  %v2570_v31 = vpop.f32.mrb[14].mxu0  ;;  %v2613_v24 = vpop.f32.mrb[30].mxu1  ;;  %v10738_v46 = vld [vmem:[#allocation23 + $0x174] ss:$8 sps:$4 sm:$0xff]   ;;  %v10736_v38 = vld [vmem:[#allocation23 + $0x170] ss:$8 sps:$4 sm:$0xff]  }
 0x98a   :  { %v2571_v53 = vadd.f32 %v2570_v31, %v2195_v29  ;;  %v2614_v28 = vadd.f32 %v2613_v24, %v2203_v54  ;;  %v2572_v10 = vpop.f32.mrb[15].mxu0  ;;  %v2615_v56 = vpop.f32.mrb[31].mxu1  ;;  %v2618_v3 = vmax.f32 %v2567_v13, 0.0  ;;  %v2620_v62 = vmax.f32 %v2610_v17, 0.0  ;;  %v10726_v29 = vld [vmem:[#allocation23 + $0x134] ss:$8 sps:$4 sm:$0xff]  }
 0x98b   :  { %v2573_v5 = vadd.f32 %v2572_v10, %v2199_v16  ;;  %v2616_v57 = vadd.f32 %v2615_v56, %v2207_v6  ;;  %v2619_v63 = vmax.f32 %v2569_v47, 0.0  ;;  %v2621_v2 = vmax.f32 %v2612_v48, 0.0  ;;  %v10724_v54 = vld [vmem:[#allocation23 + $0x130] ss:$8 sps:$4 sm:$0xff]   ;;  %v10729_v16 = vld [vmem:[#allocation23 + $0x144] ss:$8 sps:$4 sm:$0xff]  }
 0x98c   :  { %v2622_v49 = vmax.f32 %v2571_v53, 0.0  ;;  %v2624_v45 = vmax.f32 %v2614_v28, 0.0  ;;  %v10727_v6 = vld [vmem:[#allocation23 + $0x140] ss:$8 sps:$4 sm:$0xff]   ;;  %v10735_v13 = vld [vmem:[#allocation23 + $0x164] ss:$8 sps:$4 sm:$0xff]  }
 0x98d   :  { %v2623_v0 = vmax.f32 %v2573_v5, 0.0  ;;  %v2625_v4 = vmax.f32 %v2616_v57, 0.0  ;;  %v10733_v17 = vld [vmem:[#allocation23 + $0x160] ss:$8 sps:$4 sm:$0xff]   ;;  %v10741_v47 = vld [vmem:[#allocation23 + $0x184] ss:$8 sps:$4 sm:$0xff]  }
 0x98e   :  { %v2626_v8 = vpack.c.bf16 %v2622_v49, %v2618_v3  ;;  %v12669_v25 = vpack.c.bf16 %v2624_v45, %v2620_v62  ;;  %v10739_v48 = vld [vmem:[#allocation23 + $0x180] ss:$8 sps:$4 sm:$0xff]   ;;  %v10744_v31 = vld [vmem:[#allocation23 + $0x194] ss:$8 sps:$4 sm:$0xff]   ;;  %v10742_v24 = vld [vmem:[#allocation23 + $0x190] ss:$8 sps:$4 sm:$0xff]  }
 0x98f   :  { %v2627_v52 = vpack.c.bf16 %v2623_v0, %v2619_v63  ;;  %v2629_v12 = vpack.c.bf16 %v2625_v4, %v2621_v2  ;;  %v10747_v53 = vld [vmem:[#allocation23 + $0x1a4] ss:$8 sps:$4 sm:$0xff]   ;;  %v10745_v28 = vld [vmem:[#allocation23 + $0x1a0] ss:$8 sps:$4 sm:$0xff]   ;;  %v10750_v10 = vld [vmem:[#allocation23 + $0x1b4] ss:$8 sps:$4 sm:$0xff]  }
 0x990   :  { %v10748_v56 = vld [vmem:[#allocation23 + $0x1b0] ss:$8 sps:$4 sm:$0xff]   ;;  %v10753_v5 = vld [vmem:[#allocation23 + $0x1c4] ss:$8 sps:$4 sm:$0xff]   ;;  %v10751_v57 = vld [vmem:[#allocation23 + $0x1c0] ss:$8 sps:$4 sm:$0xff]  }
 0x991   :  { %3058 = vmatprep.mubr.bf16.mxu0 %v2627_v52  ;;  %v10756_v3 = vld [vmem:[#allocation23 + $0x1d4] ss:$8 sps:$4 sm:$0xff]   ;;  %v10754_v62 = vld [vmem:[#allocation23 + $0x1d0] ss:$8 sps:$4 sm:$0xff]   ;;  %v10759_v49 = vld [vmem:[#allocation23 + $0x1e4] ss:$8 sps:$4 sm:$0xff]  }
 0x992   :  { %3059 = vmatmul.mubr.bf16.vlgmr.msra.gmra.mrb[16].mxu0 %v2626_v8  ;;  %v10757_v45 = vld [vmem:[#allocation23 + $0x1e0] ss:$8 sps:$4 sm:$0xff]   ;;  %v10762_v63 = vld [vmem:[#allocation23 + $0x1f4] ss:$8 sps:$4 sm:$0xff]   ;;  %v10760_v2 = vld [vmem:[#allocation23 + $0x1f0] ss:$8 sps:$4 sm:$0xff]  }
 0x993   :  { %3070 = vmatpush1.bf16.msra.mxu0 %v10715_v14  ;;  %3101 = vmatprep.mubr.bf16.mxu0 %v2629_v12  ;;  %v2694_v0 = vld [vmem:[#allocation25] sm:$0x3] }
 0x994   :  { %3071 = vmatprep.subr.bf16.mxu0 %v10720_v20  ;;  %v2699_v4 = vrot.slane %v2694_v0, %v12476_v15  ;;  %v2703_v8 = vrot.slane %v2694_v0, %v12482_v40  ;;  %v10801_v0 = vld [vmem:[#allocation11 + $0x424] ss:$24 sps:$4 sm:$0xff]  }
 0x997   :  { %3072 = vmatpush1.bf16.msra.mxu0 %v10718_v21 }
 0x998   :  { %3073 = vmatprep.subr.bf16.mxu0 %v10723_v22 }
 0x99b   :  { %3074 = vmatpush1.bf16.msra.mxu0 %v10721_v30 }
 0x99c   :  { %3075 = vmatprep.subr.bf16.mxu0 %v10726_v29 }
 0x99f   :  { %3076 = vmatpush1.bf16.msra.mxu0 %v10724_v54 }
 0x9a0   :  { %3077 = vmatprep.subr.bf16.mxu0 %v10729_v16 }
 0x9a3   :  { %3078 = vmatpush1.bf16.msra.mxu0 %v10727_v6 }
 0x9a4   :  { %3079 = vmatprep.subr.bf16.mxu0 %v10732_v36 }
 0x9a7   :  { %3080 = vmatpush1.bf16.msra.mxu0 %v10730_v60  ;;  %v10763_v60 = vld [vmem:[#allocation11 + $0x300] ss:$24 sps:$4 sm:$0xff]  }
 0x9a8   :  { %3081 = vmatprep.subr.bf16.mxu0 %v10735_v13  ;;  %v10765_v13 = vld [vmem:[#allocation11 + $0x304] ss:$24 sps:$4 sm:$0xff]  }
 0x9a9   :  { %3792 = vmatprep.subr.bf16.mxu1 %v10765_v13 }
 0x9aa   :  { %3793 = vmatpush1.bf16.msra.mxu1 %v10763_v60  ;;  %v10817_v60 = vld [vmem:[#allocation11 + $0x4b0] ss:$24 sps:$4 sm:$0xff]  }
 0x9ab   :  { %3082 = vmatpush1.bf16.msra.mxu0 %v10733_v17  ;;  %v10766_v17 = vld [vmem:[#allocation11 + $0x310] ss:$24 sps:$4 sm:$0xff]  }
 0x9ac   :  { %3083 = vmatprep.subr.bf16.mxu0 %v10738_v46  ;;  %v10771_v46 = vld [vmem:[#allocation11 + $0x334] ss:$24 sps:$4 sm:$0xff]  }
 0x9ad   :  { %3794 = vmatprep.subr.bf16.mxu1 %v10771_v46 }
 0x9af   :  { %3084 = vmatpush1.bf16.msra.mxu0 %v10736_v38  ;;  %v10774_v38 = vld [vmem:[#allocation11 + $0x344] ss:$24 sps:$4 sm:$0xff]  }
 0x9b0   :  { %3085 = vmatprep.subr.bf16.mxu0 %v10741_v47  ;;  %v10777_v47 = vld [vmem:[#allocation11 + $0x364] ss:$24 sps:$4 sm:$0xff]  }
 0x9b3   :  { %3086 = vmatpush1.bf16.msra.mxu0 %v10739_v48  ;;  %v10780_v48 = vld [vmem:[#allocation11 + $0x374] ss:$24 sps:$4 sm:$0xff]  }
 0x9b4   :  { %3087 = vmatprep.subr.bf16.mxu0 %v10744_v31  ;;  %v10775_v31 = vld [vmem:[#allocation11 + $0x360] ss:$24 sps:$4 sm:$0xff]  }
 0x9b7   :  { %3088 = vmatpush1.bf16.msra.mxu0 %v10742_v24  ;;  %v10778_v24 = vld [vmem:[#allocation11 + $0x370] ss:$24 sps:$4 sm:$0xff]  }
 0x9b8   :  { %3089 = vmatprep.subr.bf16.mxu0 %v10747_v53  ;;  %v10783_v53 = vld [vmem:[#allocation11 + $0x394] ss:$24 sps:$4 sm:$0xff]  }
 0x9bb   :  { %3090 = vmatpush1.bf16.msra.mxu0 %v10745_v28  ;;  %v10786_v28 = vld [vmem:[#allocation11 + $0x3a4] ss:$24 sps:$4 sm:$0xff]  }
 0x9bc   :  { %3091 = vmatprep.subr.bf16.mxu0 %v10750_v10  ;;  %v10781_v10 = vld [vmem:[#allocation11 + $0x390] ss:$24 sps:$4 sm:$0xff]  }
 0x9bf   :  { %3092 = vmatpush1.bf16.msra.mxu0 %v10748_v56  ;;  %v10784_v56 = vld [vmem:[#allocation11 + $0x3a0] ss:$24 sps:$4 sm:$0xff]  }
 0x9c0   :  { %3093 = vmatprep.subr.bf16.mxu0 %v10753_v5  ;;  %v10789_v5 = vld [vmem:[#allocation11 + $0x3c4] ss:$24 sps:$4 sm:$0xff]  }
 0x9c3   :  { %3094 = vmatpush1.bf16.msra.mxu0 %v10751_v57  ;;  %v10792_v57 = vld [vmem:[#allocation11 + $0x3d4] ss:$24 sps:$4 sm:$0xff]  }
 0x9c4   :  { %3095 = vmatprep.subr.bf16.mxu0 %v10756_v3  ;;  %v10787_v3 = vld [vmem:[#allocation11 + $0x3c0] ss:$24 sps:$4 sm:$0xff]  }
 0x9c7   :  { %3096 = vmatpush1.bf16.msra.mxu0 %v10754_v62  ;;  %v10790_v62 = vld [vmem:[#allocation11 + $0x3d0] ss:$24 sps:$4 sm:$0xff]  }
 0x9c8   :  { %3097 = vmatprep.subr.bf16.mxu0 %v10759_v49  ;;  %v10795_v49 = vld [vmem:[#allocation11 + $0x3f4] ss:$24 sps:$4 sm:$0xff]  }
 0x9cb   :  { %3098 = vmatpush1.bf16.msra.mxu0 %v10757_v45  ;;  %v10798_v45 = vld [vmem:[#allocation11 + $0x404] ss:$24 sps:$4 sm:$0xff]  }
 0x9cc   :  { %3099 = vmatprep.subr.bf16.mxu0 %v10762_v63  ;;  %v10793_v63 = vld [vmem:[#allocation11 + $0x3f0] ss:$24 sps:$4 sm:$0xff]  }
 0x9cf   :  { %3100 = vmatpush1.bf16.msra.mxu0 %v10760_v2  ;;  %v10796_v2 = vld [vmem:[#allocation11 + $0x400] ss:$24 sps:$4 sm:$0xff]  }
 0x9d2   :  { %3102 = vmatmul.mubr.bf16.vlgmr.msra.gmra.mrb[16].mxu0 %v12669_v25 }
 0xaa5   :  { %v3103_v52 = vpop.f32.mrb[16].mxu0 }
 0xaa6   :  { %v10321_v12 = vadd.f32 %v3103_v52, %v2699_v4  ;;  %v3105_v14 = vpop.f32.mrb[17].mxu0  ;;  %v10802_v52 = vld [vmem:[#allocation11 + $0x430] ss:$24 sps:$4 sm:$0xff]  }
 0xaa7   :  { %v10322_v20 = vadd.f32 %v3105_v14, %v2703_v8  ;;  %v3107_v21 = vpop.f32.mrb[18].mxu0  ;;  %v10810_v14 = vld [vmem:[#allocation11 + $0x464] ss:$24 sps:$4 sm:$0xff]  }
 0xaa8   :  { %v12675_v22 = vadd.f32 %v10321_v12, %v12657_v41  ;;  %v10323_v30 = vadd.f32 %v3107_v21, %v2699_v4  ;;  %v3109_v29 = vpop.f32.mrb[19].mxu0  ;;  %v10804_v4 = vld [vmem:[#allocation11 + $0x434] ss:$24 sps:$4 sm:$0xff]   ;;  %v10808_v21 = vld [vmem:[#allocation11 + $0x460] ss:$24 sps:$4 sm:$0xff]  }
 0xaa9   :  { %v12678_v54 = vadd.f32 %v10322_v20, %v12653_v33  ;;  %v10324_v16 = vadd.f32 %v3109_v29, %v2703_v8  ;;  %v10768_v33 = vld [vmem:[#allocation11 + $0x314] ss:$24 sps:$4 sm:$0xff]   ;;  %v10799_v8 = vld [vmem:[#allocation11 + $0x420] ss:$24 sps:$4 sm:$0xff]   ;;  %v10805_v20 = vld [vmem:[#allocation11 + $0x450] ss:$24 sps:$4 sm:$0xff]  }
 0xaaa   :  { %v12681_v25 = vadd.f32 %v10323_v30, %v12659_v23  ;;  %3878 = vmatprep.subr.bf16.mxu0 %v10768_v33  ;;  %v10769_v23 = vld [vmem:[#allocation11 + $0x330] ss:$24 sps:$4 sm:$0xff]   ;;  %v10807_v12 = vld [vmem:[#allocation11 + $0x454] ss:$24 sps:$4 sm:$0xff]   ;;  %v10813_v30 = vld [vmem:[#allocation11 + $0x484] ss:$24 sps:$4 sm:$0xff]  }
 0xaab   :  { %v12684_v6 = vadd.f32 %v10324_v16, %v12655_v55  ;;  %v3118_v36 = vadd.f32 %v12678_v54, %v12675_v22  ;;  %3879 = vmatpush1.bf16.msra.mxu0 %v10766_v17  ;;  %v10772_v55 = vld [vmem:[#allocation11 + $0x340] ss:$24 sps:$4 sm:$0xff]   ;;  %3795 = vmatpush1.bf16.msra.mxu1 %v10769_v23  ;;  %v10816_v29 = vld [vmem:[#allocation11 + $0x494] ss:$24 sps:$4 sm:$0xff]  }
 0xaac   :  { %3880 = vmatprep.subr.bf16.mxu0 %v10774_v38  ;;  %3796 = vmatprep.subr.bf16.mxu1 %v10777_v47  ;;  %v10811_v16 = vld [vmem:[#allocation11 + $0x480] ss:$24 sps:$4 sm:$0xff]  }
 0xaad   :  { %3119 = vadd.xlane.f32.xlu1 %v3118_v36  ;;  %v3121_v41 = vadd.f32 %v12684_v6, %v12681_v25  ;;  %v10814_v36 = vld [vmem:[#allocation11 + $0x490] ss:$24 sps:$4 sm:$0xff]  }
 0xaaf   :  { %3881 = vmatpush1.bf16.msra.mxu0 %v10772_v55  ;;  %3797 = vmatpush1.bf16.msra.mxu1 %v10775_v31 }
 0xab0   :  { %3882 = vmatprep.subr.bf16.mxu0 %v10780_v48  ;;  %3798 = vmatprep.subr.bf16.mxu1 %v10783_v53 }
 0xab1   :  { %3122 = vadd.xlane.f32.xlu1 %v3121_v41  ;;  %v10819_v41 = vld [vmem:[#allocation11 + $0x4b4] ss:$24 sps:$4 sm:$0xff]  }
 0xab3   :  { %3883 = vmatpush1.bf16.msra.mxu0 %v10778_v24  ;;  %3799 = vmatpush1.bf16.msra.mxu1 %v10781_v10  ;;  %v10820_v10 = vld [vmem:[#allocation11 + $0x4c0] ss:$24 sps:$4 sm:$0xff]  }
 0xab4   :  { %3884 = vmatprep.subr.bf16.mxu0 %v10786_v28  ;;  %3800 = vmatprep.subr.bf16.mxu1 %v10789_v5  ;;  %v10822_v28 = vld [vmem:[#allocation11 + $0x4c4] ss:$24 sps:$4 sm:$0xff]   ;;  %v10828_v5 = vld [vmem:[#allocation11 + $0x4f4] ss:$24 sps:$4 sm:$0xff]  }
 0xab7   :  { %3885 = vmatpush1.bf16.msra.mxu0 %v10784_v56  ;;  %3801 = vmatpush1.bf16.msra.mxu1 %v10787_v3  ;;  %v10825_v56 = vld [vmem:[#allocation11 + $0x4e4] ss:$24 sps:$4 sm:$0xff]   ;;  %v10829_v3 = vld [vmem:[#allocation11 + $0x510] ss:$24 sps:$4 sm:$0xff]  }
 0xab8   :  { %3886 = vmatprep.subr.bf16.mxu0 %v10792_v57  ;;  %3802 = vmatprep.subr.bf16.mxu1 %v10795_v49  ;;  %v10831_v57 = vld [vmem:[#allocation11 + $0x514] ss:$24 sps:$4 sm:$0xff]   ;;  %v10832_v49 = vld [vmem:[#allocation11 + $0x520] ss:$24 sps:$4 sm:$0xff]  }
 0xabb   :  { %3887 = vmatpush1.bf16.msra.mxu0 %v10790_v62  ;;  %3803 = vmatpush1.bf16.msra.mxu1 %v10793_v63  ;;  %v10834_v62 = vld [vmem:[#allocation11 + $0x524] ss:$24 sps:$4 sm:$0xff]   ;;  %v10835_v63 = vld [vmem:[#allocation11 + $0x540] ss:$24 sps:$4 sm:$0xff]  }
 0xabc   :  { %3888 = vmatprep.subr.bf16.mxu0 %v10798_v45  ;;  %3804 = vmatprep.subr.bf16.mxu1 %v10801_v0  ;;  %v10837_v45 = vld [vmem:[#allocation11 + $0x544] ss:$24 sps:$4 sm:$0xff]   ;;  %v10838_v0 = vld [vmem:[#allocation11 + $0x550] ss:$24 sps:$4 sm:$0xff]  }
 0xabf   :  { %3889 = vmatpush1.bf16.msra.mxu0 %v10796_v2  ;;  %3805 = vmatpush1.bf16.msra.mxu1 %v10799_v8  ;;  %v10840_v2 = vld [vmem:[#allocation11 + $0x554] ss:$24 sps:$4 sm:$0xff]   ;;  %v10841_v8 = vld [vmem:[#allocation11 + $0x570] ss:$24 sps:$4 sm:$0xff]  }
 0xac0   :  { %3890 = vmatprep.subr.bf16.mxu0 %v10804_v4  ;;  %3806 = vmatprep.subr.bf16.mxu1 %v10807_v12  ;;  %v10843_v4 = vld [vmem:[#allocation11 + $0x574] ss:$24 sps:$4 sm:$0xff]   ;;  %v10844_v12 = vld [vmem:[#allocation11 + $0x580] ss:$24 sps:$4 sm:$0xff]  }
 0xac3   :  { %3891 = vmatpush1.bf16.msra.mxu0 %v10802_v52  ;;  %3807 = vmatpush1.bf16.msra.mxu1 %v10805_v20  ;;  %v10846_v52 = vld [vmem:[#allocation11 + $0x584] ss:$24 sps:$4 sm:$0xff]   ;;  %v10847_v20 = vld [vmem:[#allocation11 + $0x5a0] ss:$24 sps:$4 sm:$0xff]  }
 0xac4   :  { %3892 = vmatprep.subr.bf16.mxu0 %v10810_v14  ;;  %3808 = vmatprep.subr.bf16.mxu1 %v10813_v30  ;;  %v10849_v14 = vld [vmem:[#allocation11 + $0x5a4] ss:$24 sps:$4 sm:$0xff]   ;;  %v10850_v30 = vld [vmem:[#allocation11 + $0x5b0] ss:$24 sps:$4 sm:$0xff]  }
 0xac7   :  { %3893 = vmatpush1.bf16.msra.mxu0 %v10808_v21  ;;  %3809 = vmatpush1.bf16.msra.mxu1 %v10811_v16  ;;  %v10852_v21 = vld [vmem:[#allocation11 + $0x5b4] ss:$24 sps:$4 sm:$0xff]   ;;  %v10853_v16 = vld [vmem:[#allocation11 + $0x5d0] ss:$24 sps:$4 sm:$0xff]  }
 0xac8   :  { %3894 = vmatprep.subr.bf16.mxu0 %v10816_v29  ;;  %3810 = vmatprep.subr.bf16.mxu1 %v10819_v41  ;;  %v10855_v29 = vld [vmem:[#allocation11 + $0x5d4] ss:$24 sps:$4 sm:$0xff]   ;;  %v10856_v41 = vld [vmem:[#allocation11 + $0x5e0] ss:$24 sps:$4 sm:$0xff]  }
 0xacb   :  { %3895 = vmatpush1.bf16.msra.mxu0 %v10814_v36  ;;  %3811 = vmatpush1.bf16.msra.mxu1 %v10817_v60  ;;  %v10858_v36 = vld [vmem:[#allocation11 + $0x5e4] ss:$24 sps:$4 sm:$0xff]  }
 0xacc   :  { %3896 = vmatprep.subr.bf16.mxu0 %v10822_v28  ;;  %3812 = vmatprep.subr.bf16.mxu1 %v10825_v56  ;;  %v10861_v60 = vld [vmem:[#allocation11 + $0x30c] ss:$24 sps:$4 sm:$0xff]  }
 0xacf   :  { %3897 = vmatpush1.bf16.msra.mxu0 %v10820_v10 }
 0xad0   :  { %3898 = vmatprep.subr.bf16.mxu0 %v10828_v5 }
 0xb3a   :  { %v3120_v13 = vpop.xlane.xlu1 %3119 }
 0xb3b   :  { %v3124_v17 = vmul.f32 0.00390625, %v3120_v13 }
 0xb3d   :  { %v12691_v33 = vsub.f32 %v12675_v22, %v3124_v17  ;;  %v12694_v46 = vsub.f32 %v12678_v54, %v3124_v17 }
 0xb3e   :  { %v3123_v38 = vpop.xlane.xlu1 %3122 }
 0xb3f   :  { %v3125_v23 = vmul.f32 0.00390625, %v3123_v38  ;;  %v3130_v55 = vmul.f32 %v12691_v33, %v12691_v33  ;;  %v3131_v47 = vmul.f32 %v12694_v46, %v12694_v46 }
 0xb41   :  { %v12701_v48 = vsub.f32 %v12681_v25, %v3125_v23  ;;  %v12704_v31 = vsub.f32 %v12684_v6, %v3125_v23  ;;  %v3134_v24 = vadd.f32 %v3131_v47, %v3130_v55  ;;  %v10823_v25 = vld [vmem:[#allocation11 + $0x4e0] ss:$24 sps:$4 sm:$0xff]   ;;  %v10826_v6 = vld [vmem:[#allocation11 + $0x4f0] ss:$24 sps:$4 sm:$0xff]  }
 0xb42   :  { %3813 = vmatpush1.bf16.msra.mxu1 %v10823_v25  ;;  %3899 = vmatpush1.bf16.msra.mxu0 %v10826_v6 }
 0xb43   :  { %3135 = vadd.xlane.f32.xlu1 %v3134_v24  ;;  %v3132_v22 = vmul.f32 %v12701_v48, %v12701_v48  ;;  %v3133_v54 = vmul.f32 %v12704_v31, %v12704_v31  ;;  %3814 = vmatprep.subr.bf16.mxu1 %v10831_v57  ;;  %v3116_v24 = vld [vmem:[#allocation26] sm:$0x3] }
 0xb44   :  { %3900 = vmatprep.subr.bf16.mxu0 %v10834_v62  ;;  %v3154_v10 = vrot.slane %v3116_v24, %v12476_v15  ;;  %v3158_v56 = vrot.slane %v3116_v24, %v12482_v40  ;;  %v10891_v24 = vld [vmem:[#allocation11 + $0x4ec] ss:$24 sps:$4 sm:$0xff]  }
 0xb45   :  { %v3137_v53 = vadd.f32 %v3133_v54, %v3132_v22 }
 0xb46   :  { %3815 = vmatpush1.bf16.msra.mxu1 %v10829_v3  ;;  %3901 = vmatpush1.bf16.msra.mxu0 %v10832_v49 }
 0xb47   :  { %3138 = vadd.xlane.f32.xlu1 %v3137_v53  ;;  %3816 = vmatprep.subr.bf16.mxu1 %v10837_v45  ;;  %v3117_v53 = vld [vmem:[#allocation28] sm:$0x3] }
 0xb48   :  { %3902 = vmatprep.subr.bf16.mxu0 %v10840_v2  ;;  %v3169_v5 = vrot.slane %v3117_v53, %v12476_v15  ;;  %v3173_v6 = vrot.slane %v3117_v53, %v12482_v40  ;;  %v10892_v53 = vld [vmem:[#allocation11 + $0x518] ss:$24 sps:$4 sm:$0xff]  }
 0xb4a   :  { %3817 = vmatpush1.bf16.msra.mxu1 %v10835_v63  ;;  %3903 = vmatpush1.bf16.msra.mxu0 %v10838_v0 }
 0xb4b   :  { %3818 = vmatprep.subr.bf16.mxu1 %v10843_v4  ;;  %3904 = vmatprep.subr.bf16.mxu0 %v10846_v52  ;;  %v10862_v52 = vld [vmem:[#allocation11 + $0x338] ss:$24 sps:$4 sm:$0xff]  }
 0xb4e   :  { %3819 = vmatpush1.bf16.msra.mxu1 %v10841_v8  ;;  %3905 = vmatpush1.bf16.msra.mxu0 %v10844_v12  ;;  %v10859_v8 = vld [vmem:[#allocation11 + $0x308] ss:$24 sps:$4 sm:$0xff]   ;;  %v10867_v12 = vld [vmem:[#allocation11 + $0x36c] ss:$24 sps:$4 sm:$0xff]  }
 0xb4f   :  { %3820 = vmatprep.subr.bf16.mxu1 %v10849_v14  ;;  %3906 = vmatprep.subr.bf16.mxu0 %v10852_v21  ;;  %v10865_v14 = vld [vmem:[#allocation11 + $0x368] ss:$24 sps:$4 sm:$0xff]   ;;  %v10868_v21 = vld [vmem:[#allocation11 + $0x398] ss:$24 sps:$4 sm:$0xff]  }
 0xb52   :  { %3821 = vmatpush1.bf16.msra.mxu1 %v10847_v20  ;;  %3907 = vmatpush1.bf16.msra.mxu0 %v10850_v30  ;;  %v10870_v20 = vld [vmem:[#allocation11 + $0x39c] ss:$24 sps:$4 sm:$0xff]   ;;  %v10873_v30 = vld [vmem:[#allocation11 + $0x3cc] ss:$24 sps:$4 sm:$0xff]  }
 0xb53   :  { %3822 = vmatprep.subr.bf16.mxu1 %v10855_v29  ;;  %3908 = vmatprep.subr.bf16.mxu0 %v10858_v36  ;;  %v10871_v29 = vld [vmem:[#allocation11 + $0x3c8] ss:$24 sps:$4 sm:$0xff]   ;;  %v10874_v36 = vld [vmem:[#allocation11 + $0x3f8] ss:$24 sps:$4 sm:$0xff]  }
 0xb56   :  { %3823 = vmatpush1.bf16.msra.mxu1 %v10853_v16  ;;  %3909 = vmatpush1.bf16.msra.mxu0 %v10856_v41  ;;  %v10876_v16 = vld [vmem:[#allocation11 + $0x3fc] ss:$24 sps:$4 sm:$0xff]   ;;  %v10879_v41 = vld [vmem:[#allocation11 + $0x42c] ss:$24 sps:$4 sm:$0xff]  }
 0xb57   :  { %10098 = vmatprep.subr.bf16.mxu0 %v12405_v61  ;;  %3835 = vmatprep.subr.bf16.mxu1 %v10861_v60  ;;  %v10877_v60 = vld [vmem:[#allocation11 + $0x428] ss:$24 sps:$4 sm:$0xff]  }
 0xbd0   :  { %v3136_v13 = vpop.xlane.xlu1 %3135 }
 0xbd1   :  { %v3140_v17 = vmul.f32 0.00390625, %v3136_v13  ;;  %v10882_v13 = vld [vmem:[#allocation11 + $0x45c] ss:$24 sps:$4 sm:$0xff]  }
 0xbd3   :  { %v3142_v38 = vadd.f32 1e-05, %v3140_v17  ;;  %v10880_v17 = vld [vmem:[#allocation11 + $0x458] ss:$24 sps:$4 sm:$0xff]  }
 0xbd4   :  { %v3139_v23 = vpop.xlane.xlu1 %3138 }
 0xbd5   :  { %11547 = vrsqrt.f32 %v3142_v38  ;;  %v3141_v55 = vmul.f32 0.00390625, %v3139_v23  ;;  %v10885_v38 = vld [vmem:[#allocation11 + $0x48c] ss:$24 sps:$4 sm:$0xff]   ;;  %v10883_v23 = vld [vmem:[#allocation11 + $0x488] ss:$24 sps:$4 sm:$0xff]  }
 0xbd7   :  { %v3143_v47 = vadd.f32 1e-05, %v3141_v55  ;;  %v10888_v55 = vld [vmem:[#allocation11 + $0x4bc] ss:$24 sps:$4 sm:$0xff]  }
 0xbd9   :  { %11549 = vrsqrt.f32 %v3143_v47  ;;  %v10886_v47 = vld [vmem:[#allocation11 + $0x4b8] ss:$24 sps:$4 sm:$0xff]  }
 0xbdf   :  { %v11548_v22 = vpop.eup %11547 }
 0xbe0   :  { %v3146_v54 = vmul.f32 %v11548_v22, %v12691_v33  ;;  %v3147_v28 = vmul.f32 %v11548_v22, %v12694_v46  ;;  %v10889_v22 = vld [vmem:[#allocation11 + $0x4e8] ss:$24 sps:$4 sm:$0xff]  }
 0xbe2   :  { %v3162_v62 = vmul.f32 %v3158_v56, %v3147_v28  ;;  %v3161_v49 = vmul.f32 %v3154_v10, %v3146_v54  ;;  %v10894_v54 = vld [vmem:[#allocation11 + $0x51c] ss:$24 sps:$4 sm:$0xff]   ;;  %v10897_v28 = vld [vmem:[#allocation11 + $0x54c] ss:$24 sps:$4 sm:$0xff]  }
 0xbe3   :  { %v11550_v25 = vpop.eup %11549 }
 0xbe4   :  { %v3148_v57 = vmul.f32 %v11550_v25, %v12701_v48  ;;  %v3149_v3 = vmul.f32 %v11550_v25, %v12704_v31  ;;  %v12719_v63 = vadd.f32 %v3173_v6, %v3162_v62  ;;  %v12723_v2 = vadd.f32 %v3169_v5, %v3161_v49  ;;  %v10864_v31 = vld [vmem:[#allocation11 + $0x33c] ss:$24 sps:$4 sm:$0xff]   ;;  %v10898_v25 = vld [vmem:[#allocation11 + $0x578] ss:$24 sps:$4 sm:$0xff]  }
 0xbe5   :  { %v12768_v62 = vld [vmem:[#allocation10 + $0x8] sm:$0xff] }
 0xbe6   :  { %v3164_v45 = vmul.f32 %v3158_v56, %v3149_v3  ;;  %v3163_v33 = vmul.f32 %v3154_v10, %v3148_v57  ;;  %v10895_v10 = vld [vmem:[#allocation11 + $0x548] ss:$24 sps:$4 sm:$0xff]   ;;  %v10900_v56 = vld [vmem:[#allocation11 + $0x57c] ss:$24 sps:$4 sm:$0xff]   ;;  %v10904_v3 = vld [vmem:[#allocation11 + $0x5d8] ss:$24 sps:$4 sm:$0xff]  }
 0xbe7   :  { %v10906_v57 = vld [vmem:[#allocation11 + $0x5dc] ss:$24 sps:$4 sm:$0xff]  }
 0xbe8   :  { %v12721_v46 = vadd.f32 %v3173_v6, %v3164_v45  ;;  %v12725_v0 = vadd.f32 %v3169_v5, %v3163_v33  ;;  %v10903_v5 = vld [vmem:[#allocation11 + $0x5ac] ss:$24 sps:$4 sm:$0xff]   ;;  %v10901_v6 = vld [vmem:[#allocation11 + $0x5a8] ss:$24 sps:$4 sm:$0xff]  }
 0xbea   :  { %v3181_v4 = vpack.c.bf16 %v12721_v46, %v12719_v63  ;;  %v12731_v48 = vpack.c.bf16 %v12725_v0, %v12723_v2 }
 0xbec   :  { %3824 = vmatprep.mubr.bf16.mxu1 %v3181_v4  ;;  %3910 = vmatprep.mubr.bf16.mxu0 %v3181_v4 }
 0xbed   :  { %3825 = vmatmul.mubr.bf16.vlgmr.msra.gmra.mrb[32].mxu1 %v12731_v48  ;;  %3911 = vmatmul.mubr.bf16.vlgmr.msra.gmra.mrb[20].mxu0 %v12731_v48 }
 0xbee   :  { %3836 = vmatpush1.bf16.msra.mxu1 %v10859_v8  ;;  %3867 = vmatprep.mubr.bf16.mxu1 %v3181_v4 }
 0xbef   :  { %3837 = vmatprep.subr.bf16.mxu1 %v10864_v31  ;;  %10100 = vmatpush3.bf16.msra.mxu0 %v12422_v18 }
 0xbf0   :  { %10102 = vmatprep.subr.bf16.mxu0 %v12424_v19 }
 0xbf2   :  { %3838 = vmatpush1.bf16.msra.mxu1 %v10862_v52 }
 0xbf3   :  { %3839 = vmatprep.subr.bf16.mxu1 %v10867_v12  ;;  %10104 = vmatpush3.bf16.msra.mxu0 %v12429_v26  ;;  %v12779_v12 = vld [vmem:[#allocation13 + $0x6] sm:$0x3f] }
 0xbf4   :  { %10106 = vmatprep.subr.bf16.mxu0 %v12432_v27 }
 0xbf6   :  { %3840 = vmatpush1.bf16.msra.mxu1 %v10865_v14  ;;  %v3285_v14 = vrot.slane %v12779_v12, %v12476_v15 }
 0xbf7   :  { %3841 = vmatprep.subr.bf16.mxu1 %v10870_v20  ;;  %10108 = vmatpush3.bf16.msra.mxu0 %v12435_v34  ;;  %v3293_v20 = vrot.slane %v12779_v12, %v12479_v39 }
 0xbf8   :  { %10110 = vmatprep.subr.bf16.mxu0 %v12438_v35 }
 0xbfa   :  { %3842 = vmatpush1.bf16.msra.mxu1 %v10868_v21  ;;  %v3289_v21 = vrot.slane %v12779_v12, %v12482_v40 }
 0xbfb   :  { %3843 = vmatprep.subr.bf16.mxu1 %v10873_v30  ;;  %10112 = vmatpush3.bf16.msra.mxu0 %v12441_v42  ;;  %v3297_v30 = vrot.slane %v12779_v12, %v12487_v44 }
 0xbfc   :  { %10114 = vmatprep.subr.bf16.mxu0 %v12444_v43 }
 0xbfe   :  { %3844 = vmatpush1.bf16.msra.mxu1 %v10871_v29 }
 0xbff   :  { %3845 = vmatprep.subr.bf16.mxu1 %v10876_v16  ;;  %10116 = vmatpush3.bf16.msra.mxu0 %v12447_v50 }
 0xc00   :  { %10118 = vmatprep.subr.bf16.mxu0 %v12450_v51 }
 0xc02   :  { %3846 = vmatpush1.bf16.msra.mxu1 %v10874_v36 }
 0xc03   :  { %3847 = vmatprep.subr.bf16.mxu1 %v10879_v41  ;;  %10120 = vmatpush3.bf16.msra.mxu0 %v12453_v58 }
 0xc04   :  { %10122 = vmatprep.subr.bf16.mxu0 %v12456_v59 }
 0xc06   :  { %3848 = vmatpush1.bf16.msra.mxu1 %v10877_v60 }
 0xc07   :  { %3849 = vmatprep.subr.bf16.mxu1 %v10882_v13  ;;  %10124 = vmatpush3.bf16.msra.mxu0 %v12459_v1 }
 0xc08   :  { %10126 = vmatprep.subr.bf16.mxu0 %v12465_v32 }
 0xc0a   :  { %3850 = vmatpush1.bf16.msra.mxu1 %v10880_v17 }
 0xc0b   :  { %3851 = vmatprep.subr.bf16.mxu1 %v10885_v38  ;;  %10128 = vmatpush3.bf16.msra.mxu0 %v12467_v37 }
 0xc0c   :  { %10162 = vmatprep.subr.bf16.mxu0 %v12405_v61 }
 0xc0e   :  { %3852 = vmatpush1.bf16.msra.mxu1 %v10883_v23 }
 0xc0f   :  { %3853 = vmatprep.subr.bf16.mxu1 %v10888_v55 }
 0xc12   :  { %3854 = vmatpush1.bf16.msra.mxu1 %v10886_v47 }
 0xc13   :  { %3855 = vmatprep.subr.bf16.mxu1 %v10891_v24 }
 0xc16   :  { %3856 = vmatpush1.bf16.msra.mxu1 %v10889_v22 }
 0xc17   :  { %3857 = vmatprep.subr.bf16.mxu1 %v10894_v54 }
 0xc1a   :  { %3858 = vmatpush1.bf16.msra.mxu1 %v10892_v53 }
 0xc1b   :  { %3859 = vmatprep.subr.bf16.mxu1 %v10897_v28 }
 0xc1e   :  { %3860 = vmatpush1.bf16.msra.mxu1 %v10895_v10 }
 0xc1f   :  { %3861 = vmatprep.subr.bf16.mxu1 %v10900_v56 }
 0xc22   :  { %3862 = vmatpush1.bf16.msra.mxu1 %v10898_v25 }
 0xc23   :  { %3863 = vmatprep.subr.bf16.mxu1 %v10903_v5 }
 0xc26   :  { %3864 = vmatpush1.bf16.msra.mxu1 %v10901_v6  ;;  %v12793_v6 = vld [vmem:[#allocation10] sm:$0xff] }
 0xc27   :  { %3865 = vmatprep.subr.bf16.mxu1 %v10906_v57 }
 0xc2a   :  { %3866 = vmatpush1.bf16.msra.mxu1 %v10904_v3 }
 0xc2b   :  { %10066 = vmatprep.subr.bf16.mxu1 %v12405_v61 }
 0xc2d   :  { %3868 = vmatmul.mubr.bf16.vlgmr.msra.gmra.mrb[36].mxu1 %v12731_v48 }
 0xc2e   :  { %10068 = vmatpush3.bf16.msra.mxu1 %v12422_v18 }
 0xc2f   :  { %10070 = vmatprep.subr.bf16.mxu1 %v12424_v19 }
 0xc32   :  { %10072 = vmatpush3.bf16.msra.mxu1 %v12429_v26 }
 0xc33   :  { %10074 = vmatprep.subr.bf16.mxu1 %v12432_v27 }
 0xc36   :  { %10076 = vmatpush3.bf16.msra.mxu1 %v12435_v34 }
 0xc37   :  { %10078 = vmatprep.subr.bf16.mxu1 %v12438_v35 }
 0xc3a   :  { %10080 = vmatpush3.bf16.msra.mxu1 %v12441_v42 }
 0xc3b   :  { %10082 = vmatprep.subr.bf16.mxu1 %v12444_v43 }
 0xc3e   :  { %10084 = vmatpush3.bf16.msra.mxu1 %v12447_v50 }
 0xc3f   :  { %10086 = vmatprep.subr.bf16.mxu1 %v12450_v51 }
 0xc42   :  { %10088 = vmatpush3.bf16.msra.mxu1 %v12453_v58 }
 0xc43   :  { %10090 = vmatprep.subr.bf16.mxu1 %v12456_v59 }
 0xc46   :  { %10092 = vmatpush3.bf16.msra.mxu1 %v12459_v1 }
 0xc47   :  { %10094 = vmatprep.subr.bf16.mxu1 %v12465_v32 }
 0xc4a   :  { %10096 = vmatpush3.bf16.msra.mxu1 %v12467_v37 }
 0xc4b   :  { %4080 = vmatprep.subr.mxu1 %v12768_v62 }
 0xcc0   :  { %v3826_v49 = vpop.f32.mrb[32].mxu1  ;;  %v12771_v45 = vpop.f32.mrb[20].mxu0 }
 0xcc1   :  { %v3828_v33 = vpop.f32.mrb[33].mxu1  ;;  %v12773_v4 = vpop.f32.mrb[21].mxu0  ;;  %v3827_v16 = vadd.f32 %v3826_v49, %v3285_v14 }
 0xcc2   :  { %v3830_v8 = vpop.f32.mrb[34].mxu1  ;;  %v12775_v48 = vpop.f32.mrb[22].mxu0  ;;  %v3829_v13 = vadd.f32 %v3828_v33, %v3289_v21 }
 0xcc3   :  { %v3832_v31 = vpop.f32.mrb[35].mxu1  ;;  %v12777_v52 = vpop.f32.mrb[23].mxu0  ;;  %v3831_v36 = vadd.f32 %v3830_v8, %v3285_v14 }
 0xcc4   :  { %v3833_v17 = vadd.f32 %v3832_v31, %v3289_v21 }
 0xd00   :  { %v3869_v29 = vpop.f32.mrb[36].mxu1 }
 0xd01   :  { %v3870_v41 = vadd.f32 %v3869_v29, %v3293_v20  ;;  %v3871_v60 = vpop.f32.mrb[37].mxu1 }
 0xd02   :  { %v3872_v38 = vadd.f32 %v3871_v60, %v3297_v30  ;;  %v3873_v23 = vpop.f32.mrb[38].mxu1 }
 0xd03   :  { %v3921_v55 = vmul.f32 %v3870_v41, %v3827_v16  ;;  %v12789_v47 = vmul.f32 %v3870_v41, %v3831_v36  ;;  %v3874_v24 = vadd.f32 %v3873_v23, %v3293_v20  ;;  %v3875_v22 = vpop.f32.mrb[39].mxu1 }
 0xd04   :  { %v3922_v54 = vmul.f32 %v3872_v38, %v3829_v13  ;;  %v12791_v53 = vmul.f32 %v3872_v38, %v3833_v17  ;;  %v3876_v28 = vadd.f32 %v3875_v22, %v3297_v30 }
 0xd05   :  { %v3994_v10 = vmul.f32 %v3874_v24, %v3827_v16  ;;  %v4305_v56 = vmul.f32 %v3874_v24, %v3831_v36 }
 0xd06   :  { %v3995_v25 = vmul.f32 %v3876_v28, %v3829_v13  ;;  %v4306_v5 = vmul.f32 %v3876_v28, %v3833_v17  ;;  %3987 = vmatprep.mubr.f32.mxu1 %v3922_v54  ;;  %v10909_v54 = vld [vmem:[#allocation14 + $0x104] ss:$8 sps:$4 sm:$0xff]   ;;  %v3305_v28 = vrot.slane %v12779_v12, %v12571_v11 }
 0xd07   :  { %3988 = vmatmul.mubr.f32.vlgmr.msra.gmra.mrb[22].mxu1 %v3921_v55 }
 0xd08   :  { %4060 = vmatprep.mubr.f32.mxu0 %v3995_v25  ;;  %4081 = vmatpush1.msra.mxu1 %v12793_v6 }
 0xd09   :  { %4061 = vmatmul.mubr.f32.vlgmr.msra.gmra.mrb[10].mxu0 %v3994_v10  ;;  %4144 = vmatprep.mubr.f32.mxu1 %v12041_v7 }
 0xd0a   :  { %10164 = vmatpush3.bf16.msra.mxu0 %v12422_v18  ;;  %4371 = vmatprep.mubr.f32.mxu0 %v4306_v5 }
 0xd0b   :  { %10166 = vmatprep.subr.bf16.mxu0 %v12424_v19  ;;  %4157 = vmatprep.subr.mxu1 %v12768_v62 }
 0xd0e   :  { %10168 = vmatpush3.bf16.msra.mxu0 %v12429_v26 }
 0xd0f   :  { %10170 = vmatprep.subr.bf16.mxu0 %v12432_v27 }
 0xd12   :  { %10172 = vmatpush3.bf16.msra.mxu0 %v12435_v34 }
 0xd13   :  { %10174 = vmatprep.subr.bf16.mxu0 %v12438_v35 }
 0xd16   :  { %10176 = vmatpush3.bf16.msra.mxu0 %v12441_v42 }
 0xd17   :  { %10178 = vmatprep.subr.bf16.mxu0 %v12444_v43 }
 0xd1a   :  { %10180 = vmatpush3.bf16.msra.mxu0 %v12447_v50 }
 0xd1b   :  { %10182 = vmatprep.subr.bf16.mxu0 %v12450_v51 }
 0xd1e   :  { %10184 = vmatpush3.bf16.msra.mxu0 %v12453_v58 }
 0xd1f   :  { %10186 = vmatprep.subr.bf16.mxu0 %v12456_v59 }
 0xd22   :  { %10188 = vmatpush3.bf16.msra.mxu0 %v12459_v1 }
 0xd23   :  { %10190 = vmatprep.subr.bf16.mxu0 %v12465_v32 }
 0xd26   :  { %10192 = vmatpush3.bf16.msra.mxu0 %v12467_v37 }
 0xd27   :  { %4468 = vmatprep.subr.mxu0 %v12768_v62 }
 0xd29   :  { %4372 = vmatmul.mubr.f32.vlgmr.msra.gmra.mrb[24].mxu0 %v4305_v56  ;;  %v12849_v56 = vadd.f32 %v12773_v4, %v3305_v28 }
 0xd2a   :  { %4469 = vmatpush1.msra.mxu0 %v12793_v6  ;;  %4532 = vmatprep.mubr.f32.mxu0 %v12041_v7 }
 0xdda   :  { %v9657_v57 = vpop.f32.mrb[22].mxu1 }
 0xddb   :  { %v9658_v3 = vpop.f32.mrb[23].mxu1 }
 0xddc   :  { %v9659_v49 = vadd.f32 %v9658_v3, %v9657_v57  ;;  %v9692_v33 = vpop.f32.mrb[10].mxu0  ;;  %v12857_v57 = vadd.f32 %v12777_v52, %v3305_v28  ;;  %v10916_v28 = vld [vmem:[#allocation14 + $0x130] ss:$8 sps:$4 sm:$0xff]  }
 0xddd   :  { %v9693_v8 = vpop.f32.mrb[11].mxu0 }
 0xdde   :  { %v9694_v31 = vadd.f32 %v9693_v8, %v9692_v33  ;;  %v3993_v14 = vmul.f32 0.17677669, %v9659_v49 }
 0xde0   :  { %v4066_v20 = vmul.f32 0.17677669, %v9694_v31 }
 0xde2   :  { %v4067_v21 = vmax.f32 %v3993_v14, %v4066_v20 }
 0xde4   :  { %v4068_v30 = vsub.f32 %v3993_v14, %v4067_v21  ;;  %v4071_v29 = vsub.f32 %v4066_v20, %v4067_v21 }
 0xde6   :  { %v4069_v16 = vmul.f32 1.442695, %v4068_v30  ;;  %v4072_v36 = vmul.f32 1.442695, %v4071_v29 }
 0xde8   :  { %11551 = vpow2.f32 %v4069_v16 }
 0xde9   :  { %11553 = vpow2.f32 %v4072_v36 }
 0xdf2   :  { %v11552_v41 = vpop.eup %11551 }
 0xdf3   :  { %v11554_v60 = vpop.eup %11553 }
 0xdf4   :  { %v4074_v13 = vadd.f32 %v11554_v60, %v11552_v41 }
 0xdf6   :  { %11555 = vrcp.f32 %v4074_v13 }
 0xdfc   :  { %v9762_v17 = vpop.f32.mrb[24].mxu0 }
 0xdfd   :  { %v9763_v38 = vpop.f32.mrb[25].mxu0 }
 0xdfe   :  { %v9764_v23 = vadd.f32 %v9763_v38, %v9762_v17  ;;  %v10907_v17 = vld [vmem:[#allocation14 + $0x100] ss:$8 sps:$4 sm:$0xff]  }
 0xe00   :  { %v11556_v55 = vpop.eup %11555  ;;  %v4377_v20 = vmul.f32 0.17677669, %v9764_v23  ;;  %v10910_v23 = vld [vmem:[#allocation14 + $0x110] ss:$8 sps:$4 sm:$0xff]  }
 0xe01   :  { %v4076_v24 = vmul.f32 %v11556_v55, %v11552_v41  ;;  %v4153_v22 = vmul.f32 %v11556_v55, %v11554_v60 }
 0xe03   :  { %9061 = vmatmul.mubr.msk.f32.vlgmr.msra.gmra.mrb[40].mxu1 %vm1339_vm2, %v4076_v24  ;;  %v10912_v24 = vld [vmem:[#allocation14 + $0x114] ss:$8 sps:$4 sm:$0xff]  }
 0xe04   :  { %4158 = vmatpush1.msra.mxu1 %v12793_v6  ;;  %4221 = vmatprep.mubr.f32.mxu1 %v12041_v7 }
 0xe05   :  { %10130 = vmatprep.subr.bf16.mxu1 %v12405_v61 }
 0xe07   :  { %9062 = vmatmul.mubr.msk.f32.vlgmr.msra.gmra.mrb[42].mxu1 %vm1339_vm2, %v4153_v22  ;;  %v10915_v22 = vld [vmem:[#allocation14 + $0x124] ss:$8 sps:$4 sm:$0xff]  }
 0xe08   :  { %10132 = vmatpush3.bf16.msra.mxu1 %v12422_v18  ;;  %4298 = vmatprep.mubr.f32.mxu1 %v12791_v53  ;;  %v3301_v53 = vrot.slane %v12779_v12, %v12568_v9 }
 0xe09   :  { %10134 = vmatprep.subr.bf16.mxu1 %v12424_v19 }
 0xe0a   :  { %v12846_v10 = vadd.f32 %v12771_v45, %v3301_v53 }
 0xe0c   :  { %10136 = vmatpush3.bf16.msra.mxu1 %v12429_v26 }
 0xe0d   :  { %10138 = vmatprep.subr.bf16.mxu1 %v12432_v27 }
 0xe10   :  { %10140 = vmatpush3.bf16.msra.mxu1 %v12435_v34 }
 0xe11   :  { %10142 = vmatprep.subr.bf16.mxu1 %v12438_v35 }
 0xe14   :  { %10144 = vmatpush3.bf16.msra.mxu1 %v12441_v42 }
 0xe15   :  { %10146 = vmatprep.subr.bf16.mxu1 %v12444_v43 }
 0xe18   :  { %10148 = vmatpush3.bf16.msra.mxu1 %v12447_v50 }
 0xe19   :  { %10150 = vmatprep.subr.bf16.mxu1 %v12450_v51 }
 0xe1c   :  { %10152 = vmatpush3.bf16.msra.mxu1 %v12453_v58 }
 0xe1d   :  { %10154 = vmatprep.subr.bf16.mxu1 %v12456_v59 }
 0xe20   :  { %10156 = vmatpush3.bf16.msra.mxu1 %v12459_v1 }
 0xe21   :  { %10158 = vmatprep.subr.bf16.mxu1 %v12465_v32 }
 0xe24   :  { %10160 = vmatpush3.bf16.msra.mxu1 %v12467_v37 }
 0xe25   :  { %4391 = vmatprep.subr.mxu1 %v12768_v62 }
 0xe27   :  { %4299 = vmatmul.mubr.f32.vlgmr.msra.gmra.mrb[44].mxu1 %v12789_v47 }
 0xe28   :  { %4392 = vmatpush1.msra.mxu1 %v12793_v6  ;;  %4455 = vmatprep.mubr.f32.mxu1 %v12041_v7  ;;  %v12854_v6 = vadd.f32 %v12775_v48, %v3301_v53  ;;  %v10918_v53 = vld [vmem:[#allocation14 + $0x134] ss:$8 sps:$4 sm:$0xff]  }
 0xe29   :  { %4751 = vmatprep.subr.bf16.mxu1 %v10909_v54  ;;  %v10913_v54 = vld [vmem:[#allocation14 + $0x120] ss:$8 sps:$4 sm:$0xff]  }
 0xed6   :  { %v4146_v62 = vpop.f32.mrb[40].mxu1 }
 0xed7   :  { %v4151_v47 = vmul.f32 %v4146_v62, %v12846_v10  ;;  %v4148_v25 = vpop.f32.mrb[41].mxu1  ;;  %v10921_v62 = vld [vmem:[#allocation14 + $0x144] ss:$8 sps:$4 sm:$0xff]  }
 0xed8   :  { %v4152_v5 = vmul.f32 %v4148_v25, %v12849_v56  ;;  %v10924_v25 = vld [vmem:[#allocation14 + $0x154] ss:$8 sps:$4 sm:$0xff]  }
 0xeda   :  { %v4223_v3 = vpop.f32.mrb[42].mxu1 }
 0xedb   :  { %v4228_v12 = vmul.f32 %v4223_v3, %v12854_v6  ;;  %v4225_v45 = vpop.f32.mrb[43].mxu1  ;;  %v10927_v3 = vld [vmem:[#allocation14 + $0x164] ss:$8 sps:$4 sm:$0xff]  }
 0xedc   :  { %v4229_v49 = vmul.f32 %v4225_v45, %v12857_v57  ;;  %v10930_v45 = vld [vmem:[#allocation14 + $0x174] ss:$8 sps:$4 sm:$0xff]  }
 0xedd   :  { %v12861_v4 = vadd.f32 %v4228_v12, %v4151_v47  ;;  %v10919_v47 = vld [vmem:[#allocation14 + $0x140] ss:$8 sps:$4 sm:$0xff]  }
 0xede   :  { %v12863_v33 = vadd.f32 %v4229_v49, %v4152_v5  ;;  %v10922_v5 = vld [vmem:[#allocation14 + $0x150] ss:$8 sps:$4 sm:$0xff]   ;;  %v10925_v12 = vld [vmem:[#allocation14 + $0x160] ss:$8 sps:$4 sm:$0xff]  }
 0xedf   :  { %v10928_v49 = vld [vmem:[#allocation14 + $0x170] ss:$8 sps:$4 sm:$0xff]  }
 0xefa   :  { %v9727_v8 = vpop.f32.mrb[44].mxu1 }
 0xefb   :  { %v9728_v31 = vpop.f32.mrb[45].mxu1 }
 0xefc   :  { %v9729_v14 = vadd.f32 %v9728_v31, %v9727_v8  ;;  %v10933_v8 = vld [vmem:[#allocation14 + $0x184] ss:$8 sps:$4 sm:$0xff]   ;;  %v10931_v31 = vld [vmem:[#allocation14 + $0x180] ss:$8 sps:$4 sm:$0xff]  }
 0xefe   :  { %v4304_v21 = vmul.f32 0.17677669, %v9729_v14  ;;  %v10936_v14 = vld [vmem:[#allocation14 + $0x194] ss:$8 sps:$4 sm:$0xff]  }
 0xf00   :  { %v4378_v48 = vmax.f32 %v4304_v21, %v4377_v20 }
 0xf02   :  { %v4379_v30 = vsub.f32 %v4304_v21, %v4378_v48  ;;  %v4382_v29 = vsub.f32 %v4377_v20, %v4378_v48  ;;  %v10934_v20 = vld [vmem:[#allocation14 + $0x190] ss:$8 sps:$4 sm:$0xff]   ;;  %v10939_v21 = vld [vmem:[#allocation14 + $0x1a4] ss:$8 sps:$4 sm:$0xff]   ;;  %v10937_v48 = vld [vmem:[#allocation14 + $0x1a0] ss:$8 sps:$4 sm:$0xff]  }
 0xf04   :  { %v4380_v52 = vmul.f32 1.442695, %v4379_v30  ;;  %v4383_v16 = vmul.f32 1.442695, %v4382_v29  ;;  %v10942_v30 = vld [vmem:[#allocation14 + $0x1b4] ss:$8 sps:$4 sm:$0xff]  }
 0xf05   :  { %v10940_v29 = vld [vmem:[#allocation14 + $0x1b0] ss:$8 sps:$4 sm:$0xff]  }
 0xf06   :  { %11557 = vpow2.f32 %v4380_v52  ;;  %v10945_v52 = vld [vmem:[#allocation14 + $0x1c4] ss:$8 sps:$4 sm:$0xff]  }
 0xf07   :  { %11559 = vpow2.f32 %v4383_v16  ;;  %v10943_v16 = vld [vmem:[#allocation14 + $0x1c0] ss:$8 sps:$4 sm:$0xff]  }
 0xf10   :  { %v11558_v36 = vpop.eup %11557 }
 0xf11   :  { %v11560_v41 = vpop.eup %11559 }
 0xf12   :  { %v4385_v60 = vadd.f32 %v11560_v41, %v11558_v36 }
 0xf14   :  { %11561 = vrcp.f32 %v4385_v60  ;;  %v10951_v60 = vld [vmem:[#allocation14 + $0x1e4] ss:$8 sps:$4 sm:$0xff]  }
 0xf1e   :  { %v11562_v13 = vpop.eup %11561 }
 0xf1f   :  { %v4387_v38 = vmul.f32 %v11562_v13, %v11558_v36  ;;  %v4464_v55 = vmul.f32 %v11562_v13, %v11560_v41  ;;  %v10948_v36 = vld [vmem:[#allocation14 + $0x1d4] ss:$8 sps:$4 sm:$0xff]   ;;  %v10946_v41 = vld [vmem:[#allocation14 + $0x1d0] ss:$8 sps:$4 sm:$0xff]   ;;  %v10949_v13 = vld [vmem:[#allocation14 + $0x1e0] ss:$8 sps:$4 sm:$0xff]  }
 0xf21   :  { %9063 = vmatmul.mubr.msk.f32.vlgmr.msra.gmra.mrb[46].mxu1 %vm1339_vm2, %v4387_v38  ;;  %9064 = vmatmul.mubr.msk.f32.vlgmr.msra.gmra.mrb[26].mxu0 %vm1339_vm2, %v4464_v55  ;;  %v10952_v38 = vld [vmem:[#allocation14 + $0x1f0] ss:$8 sps:$4 sm:$0xff]  }
 0xf22   :  { %4752 = vmatpush1.bf16.msra.mxu1 %v10907_v17  ;;  %v10954_v17 = vld [vmem:[#allocation14 + $0x1f4] ss:$8 sps:$4 sm:$0xff]  }
 0xf23   :  { %4753 = vmatprep.subr.bf16.mxu1 %v10912_v24 }
 0xf26   :  { %4754 = vmatpush1.bf16.msra.mxu1 %v10910_v23 }
 0xf27   :  { %4755 = vmatprep.subr.bf16.mxu1 %v10915_v22 }
 0xf2a   :  { %4756 = vmatpush1.bf16.msra.mxu1 %v10913_v54 }
 0xf2b   :  { %4757 = vmatprep.subr.bf16.mxu1 %v10918_v53 }
 0xf2e   :  { %4758 = vmatpush1.bf16.msra.mxu1 %v10916_v28 }
 0xf2f   :  { %4759 = vmatprep.subr.bf16.mxu1 %v10921_v62 }
 0xf32   :  { %4760 = vmatpush1.bf16.msra.mxu1 %v10919_v47 }
 0xf33   :  { %4761 = vmatprep.subr.bf16.mxu1 %v10924_v25 }
 0xf36   :  { %4762 = vmatpush1.bf16.msra.mxu1 %v10922_v5 }
 0xf37   :  { %4763 = vmatprep.subr.bf16.mxu1 %v10927_v3 }
 0xf3a   :  { %4764 = vmatpush1.bf16.msra.mxu1 %v10925_v12  ;;  %v4579_v12 = vld [vmem:[#allocation16 + $0x2] sm:$0x3] }
 0xf3b   :  { %4765 = vmatprep.subr.bf16.mxu1 %v10930_v45  ;;  %v4584_v45 = vrot.slane %v4579_v12, %v12476_v15 }
 0xf3e   :  { %4766 = vmatpush1.bf16.msra.mxu1 %v10928_v49 }
 0xf3f   :  { %4767 = vmatprep.subr.bf16.mxu1 %v10933_v8 }
 0xf42   :  { %4768 = vmatpush1.bf16.msra.mxu1 %v10931_v31 }
 0xf43   :  { %4769 = vmatprep.subr.bf16.mxu1 %v10936_v14 }
 0xf46   :  { %4770 = vmatpush1.bf16.msra.mxu1 %v10934_v20 }
 0xf47   :  { %4771 = vmatprep.subr.bf16.mxu1 %v10939_v21 }
 0xf4a   :  { %4772 = vmatpush1.bf16.msra.mxu1 %v10937_v48 }
 0xf4b   :  { %4773 = vmatprep.subr.bf16.mxu1 %v10942_v30 }
 0xf4e   :  { %4774 = vmatpush1.bf16.msra.mxu1 %v10940_v29  ;;  %v10955_v29 = vld [vmem:[#allocation20 + $0x200] ss:$16 sps:$4 sm:$0xff]  }
 0xf4f   :  { %4775 = vmatprep.subr.bf16.mxu1 %v10945_v52  ;;  %v10957_v52 = vld [vmem:[#allocation20 + $0x204] ss:$16 sps:$4 sm:$0xff]  }
 0xf50   :  { %5274 = vmatprep.subr.bf16.mxu0 %v10957_v52 }
 0xf51   :  { %5275 = vmatpush1.bf16.msra.mxu0 %v10955_v29 }
 0xf52   :  { %4776 = vmatpush1.bf16.msra.mxu1 %v10943_v16  ;;  %v10958_v16 = vld [vmem:[#allocation20 + $0x208] ss:$16 sps:$4 sm:$0xff]  }
 0xf53   :  { %4777 = vmatprep.subr.bf16.mxu1 %v10948_v36  ;;  %v10963_v36 = vld [vmem:[#allocation20 + $0x224] ss:$16 sps:$4 sm:$0xff]  }
 0xf54   :  { %5276 = vmatprep.subr.bf16.mxu0 %v10963_v36 }
 0xf56   :  { %4778 = vmatpush1.bf16.msra.mxu1 %v10946_v41  ;;  %v10966_v41 = vld [vmem:[#allocation20 + $0x22c] ss:$16 sps:$4 sm:$0xff]  }
 0xf57   :  { %4779 = vmatprep.subr.bf16.mxu1 %v10951_v60  ;;  %v10969_v60 = vld [vmem:[#allocation20 + $0x244] ss:$16 sps:$4 sm:$0xff]  }
 0xf5a   :  { %4780 = vmatpush1.bf16.msra.mxu1 %v10949_v13  ;;  %v10972_v13 = vld [vmem:[#allocation20 + $0x24c] ss:$16 sps:$4 sm:$0xff]  }
 0xf5b   :  { %4781 = vmatprep.subr.bf16.mxu1 %v10954_v17  ;;  %v10967_v17 = vld [vmem:[#allocation20 + $0x240] ss:$16 sps:$4 sm:$0xff]  }
 0xf5e   :  { %4782 = vmatpush1.bf16.msra.mxu1 %v10952_v38  ;;  %v10970_v38 = vld [vmem:[#allocation20 + $0x248] ss:$16 sps:$4 sm:$0xff]  }
 0xff4   :  { %v4457_v55 = vpop.f32.mrb[46].mxu1  ;;  %v4534_v24 = vpop.f32.mrb[26].mxu0 }
 0xff5   :  { %v4462_v23 = vmul.f32 %v4457_v55, %v12846_v10  ;;  %v4539_v22 = vmul.f32 %v4534_v24, %v12854_v6  ;;  %v4459_v54 = vpop.f32.mrb[47].mxu1  ;;  %v4536_v53 = vpop.f32.mrb[27].mxu0  ;;  %v4588_v10 = vrot.slane %v4579_v12, %v12482_v40  ;;  %v10975_v55 = vld [vmem:[#allocation20 + $0x264] ss:$16 sps:$4 sm:$0xff]   ;;  %v10978_v24 = vld [vmem:[#allocation20 + $0x26c] ss:$16 sps:$4 sm:$0xff]  }
 0xff6   :  { %v4463_v28 = vmul.f32 %v4459_v54, %v12849_v56  ;;  %v4540_v62 = vmul.f32 %v4536_v53, %v12857_v57  ;;  %v10981_v54 = vld [vmem:[#allocation20 + $0x284] ss:$16 sps:$4 sm:$0xff]   ;;  %v10984_v53 = vld [vmem:[#allocation20 + $0x28c] ss:$16 sps:$4 sm:$0xff]  }
 0xff7   :  { %v4541_v47 = vadd.f32 %v4539_v22, %v4462_v23  ;;  %v10973_v23 = vld [vmem:[#allocation20 + $0x260] ss:$16 sps:$4 sm:$0xff]   ;;  %v10976_v22 = vld [vmem:[#allocation20 + $0x268] ss:$16 sps:$4 sm:$0xff]   ;;  %v10993_v12 = vld [vmem:[#allocation20 + $0x2c4] ss:$16 sps:$4 sm:$0xff]  }
 0xff8   :  { %v4542_v25 = vadd.f32 %v4540_v62, %v4463_v28  ;;  %v10979_v28 = vld [vmem:[#allocation20 + $0x280] ss:$16 sps:$4 sm:$0xff]   ;;  %v10982_v62 = vld [vmem:[#allocation20 + $0x288] ss:$16 sps:$4 sm:$0xff]  }
 0xff9   :  { %v4543_v5 = vpack.c.bf16 %v4541_v47, %v12861_v4  ;;  %v10987_v47 = vld [vmem:[#allocation20 + $0x2a4] ss:$16 sps:$4 sm:$0xff]  }
 0xffa   :  { %v4544_v3 = vpack.c.bf16 %v4542_v25, %v12863_v33  ;;  %v10990_v25 = vld [vmem:[#allocation20 + $0x2ac] ss:$16 sps:$4 sm:$0xff]  }
 0xffc   :  { %4783 = vmatprep.mubr.bf16.mxu1 %v4544_v3  ;;  %v10988_v3 = vld [vmem:[#allocation20 + $0x2a8] ss:$16 sps:$4 sm:$0xff]  }
 0xffd   :  { %4784 = vmatmul.mubr.bf16.vlgmr.msra.gmra.mrb[48].mxu1 %v4543_v5  ;;  %v10985_v5 = vld [vmem:[#allocation20 + $0x2a0] ss:$16 sps:$4 sm:$0xff]  }
0x10d0   :  { %v4785_v6 = vpop.f32.mrb[48].mxu1 }
0x10d1   :  { %v4786_v49 = vadd.f32 %v4785_v6, %v4584_v45  ;;  %v4787_v8 = vpop.f32.mrb[49].mxu1  ;;  %v10994_v6 = vld [vmem:[#allocation20 + $0x2c8] ss:$16 sps:$4 sm:$0xff]  }
0x10d2   :  { %v4788_v31 = vadd.f32 %v4787_v8, %v4588_v10  ;;  %v4789_v56 = vpop.f32.mrb[50].mxu1  ;;  %v11002_v8 = vld [vmem:[#allocation20 + $0x2ec] ss:$16 sps:$4 sm:$0xff]  }
0x10d3   :  { %v12876_v57 = vadd.f32 %v4786_v49, %v12723_v2  ;;  %v4790_v14 = vadd.f32 %v4789_v56, %v4584_v45  ;;  %v4791_v20 = vpop.f32.mrb[51].mxu1  ;;  %v10996_v45 = vld [vmem:[#allocation20 + $0x2cc] ss:$16 sps:$4 sm:$0xff]   ;;  %v10999_v49 = vld [vmem:[#allocation20 + $0x2e4] ss:$16 sps:$4 sm:$0xff]  }
0x10d4   :  { %v12879_v4 = vadd.f32 %v4788_v31, %v12719_v63  ;;  %v4792_v33 = vadd.f32 %v4791_v20, %v4588_v10  ;;  %v10960_v63 = vld [vmem:[#allocation20 + $0x20c] ss:$16 sps:$4 sm:$0xff]   ;;  %v10991_v10 = vld [vmem:[#allocation20 + $0x2c0] ss:$16 sps:$4 sm:$0xff]   ;;  %v11000_v56 = vld [vmem:[#allocation20 + $0x2e8] ss:$16 sps:$4 sm:$0xff]  }
0x10d5   :  { %v12882_v21 = vadd.f32 %v4790_v14, %v12725_v0  ;;  %5317 = vmatprep.subr.bf16.mxu1 %v10960_v63  ;;  %v10961_v0 = vld [vmem:[#allocation20 + $0x220] ss:$16 sps:$4 sm:$0xff]   ;;  %v11005_v14 = vld [vmem:[#allocation20 + $0x304] ss:$16 sps:$4 sm:$0xff]   ;;  %v11008_v20 = vld [vmem:[#allocation20 + $0x30c] ss:$16 sps:$4 sm:$0xff]  }
0x10d6   :  { %v12885_v48 = vadd.f32 %v4792_v33, %v12721_v46  ;;  %v4802_v30 = vadd.f32 %v12879_v4, %v12876_v57  ;;  %5318 = vmatpush1.bf16.msra.mxu1 %v10958_v16  ;;  %v10964_v46 = vld [vmem:[#allocation20 + $0x228] ss:$16 sps:$4 sm:$0xff]   ;;  %5277 = vmatpush1.bf16.msra.mxu0 %v10961_v0  ;;  %v10997_v31 = vld [vmem:[#allocation20 + $0x2e0] ss:$16 sps:$4 sm:$0xff]  }
0x10d7   :  { %5319 = vmatprep.subr.bf16.mxu1 %v10966_v41  ;;  %5278 = vmatprep.subr.bf16.mxu0 %v10969_v60  ;;  %v11003_v33 = vld [vmem:[#allocation20 + $0x300] ss:$16 sps:$4 sm:$0xff]  }
0x10d8   :  { %4803 = vadd.xlane.f32.xlu1 %v4802_v30  ;;  %v4805_v2 = vadd.f32 %v12885_v48, %v12882_v21  ;;  %v11006_v30 = vld [vmem:[#allocation20 + $0x308] ss:$16 sps:$4 sm:$0xff]  }
0x10da   :  { %5320 = vmatpush1.bf16.msra.mxu1 %v10964_v46  ;;  %5279 = vmatpush1.bf16.msra.mxu0 %v10967_v17 }
0x10db   :  { %5321 = vmatprep.subr.bf16.mxu1 %v10972_v13  ;;  %5280 = vmatprep.subr.bf16.mxu0 %v10975_v55  ;;  %v11014_v55 = vld [vmem:[#allocation20 + $0x32c] ss:$16 sps:$4 sm:$0xff]  }
0x10dc   :  { %4806 = vadd.xlane.f32.xlu1 %v4805_v2 }
0x10de   :  { %5322 = vmatpush1.bf16.msra.mxu1 %v10970_v38  ;;  %5281 = vmatpush1.bf16.msra.mxu0 %v10973_v23  ;;  %v11011_v38 = vld [vmem:[#allocation20 + $0x324] ss:$16 sps:$4 sm:$0xff]   ;;  %v11012_v23 = vld [vmem:[#allocation20 + $0x328] ss:$16 sps:$4 sm:$0xff]  }
0x10df   :  { %5323 = vmatprep.subr.bf16.mxu1 %v10978_v24  ;;  %5282 = vmatprep.subr.bf16.mxu0 %v10981_v54  ;;  %v11009_v24 = vld [vmem:[#allocation20 + $0x320] ss:$16 sps:$4 sm:$0xff]   ;;  %v11018_v54 = vld [vmem:[#allocation20 + $0x348] ss:$16 sps:$4 sm:$0xff]  }
0x10e2   :  { %5324 = vmatpush1.bf16.msra.mxu1 %v10976_v22  ;;  %5283 = vmatpush1.bf16.msra.mxu0 %v10979_v28  ;;  %v11015_v22 = vld [vmem:[#allocation20 + $0x340] ss:$16 sps:$4 sm:$0xff]   ;;  %v11026_v28 = vld [vmem:[#allocation20 + $0x36c] ss:$16 sps:$4 sm:$0xff]  }
0x10e3   :  { %5325 = vmatprep.subr.bf16.mxu1 %v10984_v53  ;;  %5284 = vmatprep.subr.bf16.mxu0 %v10987_v47  ;;  %v11023_v53 = vld [vmem:[#allocation20 + $0x364] ss:$16 sps:$4 sm:$0xff]   ;;  %v11024_v47 = vld [vmem:[#allocation20 + $0x368] ss:$16 sps:$4 sm:$0xff]  }
0x10e6   :  { %5326 = vmatpush1.bf16.msra.mxu1 %v10982_v62  ;;  %5285 = vmatpush1.bf16.msra.mxu0 %v10985_v5  ;;  %v11021_v62 = vld [vmem:[#allocation20 + $0x360] ss:$16 sps:$4 sm:$0xff]   ;;  %v11032_v5 = vld [vmem:[#allocation20 + $0x38c] ss:$16 sps:$4 sm:$0xff]  }
0x10e7   :  { %5327 = vmatprep.subr.bf16.mxu1 %v10990_v25  ;;  %5286 = vmatprep.subr.bf16.mxu0 %v10993_v12  ;;  %v11029_v25 = vld [vmem:[#allocation20 + $0x384] ss:$16 sps:$4 sm:$0xff]   ;;  %v11030_v12 = vld [vmem:[#allocation20 + $0x388] ss:$16 sps:$4 sm:$0xff]  }
0x10ea   :  { %5328 = vmatpush1.bf16.msra.mxu1 %v10988_v3  ;;  %5287 = vmatpush1.bf16.msra.mxu0 %v10991_v10  ;;  %v11027_v3 = vld [vmem:[#allocation20 + $0x380] ss:$16 sps:$4 sm:$0xff]   ;;  %v11038_v10 = vld [vmem:[#allocation20 + $0x3ac] ss:$16 sps:$4 sm:$0xff]  }
0x10eb   :  { %5329 = vmatprep.subr.bf16.mxu1 %v10996_v45  ;;  %5288 = vmatprep.subr.bf16.mxu0 %v10999_v49  ;;  %v11035_v45 = vld [vmem:[#allocation20 + $0x3a4] ss:$16 sps:$4 sm:$0xff]   ;;  %v11036_v49 = vld [vmem:[#allocation20 + $0x3a8] ss:$16 sps:$4 sm:$0xff]  }
0x10ee   :  { %5330 = vmatpush1.bf16.msra.mxu1 %v10994_v6  ;;  %5289 = vmatpush1.bf16.msra.mxu0 %v10997_v31  ;;  %v11033_v6 = vld [vmem:[#allocation20 + $0x3a0] ss:$16 sps:$4 sm:$0xff]   ;;  %v11044_v31 = vld [vmem:[#allocation20 + $0x3cc] ss:$16 sps:$4 sm:$0xff]  }
0x10ef   :  { %5331 = vmatprep.subr.bf16.mxu1 %v11002_v8  ;;  %5290 = vmatprep.subr.bf16.mxu0 %v11005_v14  ;;  %v11041_v8 = vld [vmem:[#allocation20 + $0x3c4] ss:$16 sps:$4 sm:$0xff]   ;;  %v11042_v14 = vld [vmem:[#allocation20 + $0x3c8] ss:$16 sps:$4 sm:$0xff]  }
0x10f2   :  { %5332 = vmatpush1.bf16.msra.mxu1 %v11000_v56  ;;  %5291 = vmatpush1.bf16.msra.mxu0 %v11003_v33  ;;  %v11039_v56 = vld [vmem:[#allocation20 + $0x3c0] ss:$16 sps:$4 sm:$0xff]   ;;  %v11050_v33 = vld [vmem:[#allocation20 + $0x3ec] ss:$16 sps:$4 sm:$0xff]  }
0x10f3   :  { %5333 = vmatprep.subr.bf16.mxu1 %v11008_v20  ;;  %5292 = vmatprep.subr.bf16.mxu0 %v11011_v38  ;;  %v11047_v20 = vld [vmem:[#allocation20 + $0x3e4] ss:$16 sps:$4 sm:$0xff]  }
0x10f6   :  { %5334 = vmatpush1.bf16.msra.mxu1 %v11006_v30  ;;  %5293 = vmatpush1.bf16.msra.mxu0 %v11009_v24  ;;  %v11045_v30 = vld [vmem:[#allocation20 + $0x3e0] ss:$16 sps:$4 sm:$0xff]  }
0x10f7   :  { %5335 = vmatprep.subr.bf16.mxu1 %v11014_v55  ;;  %v4801_v55 = vld [vmem:[#allocation19 + $0x2] sm:$0x3] }
0x10fa   :  { %5336 = vmatpush1.bf16.msra.mxu1 %v11012_v23 }
0x1165   :  { %v4804_v2 = vpop.xlane.xlu1 %4803 }
0x1166   :  { %v4808_v29 = vmul.f32 0.00390625, %v4804_v2  ;;  %v11048_v2 = vld [vmem:[#allocation20 + $0x3e8] ss:$16 sps:$4 sm:$0xff]  }
0x1168   :  { %v12892_v52 = vsub.f32 %v12876_v57, %v4808_v29  ;;  %v12895_v16 = vsub.f32 %v12879_v4, %v4808_v29  ;;  %v11053_v29 = vld [vmem:[#allocation23 + $0x204] ss:$8 sps:$4 sm:$0xff]  }
0x1169   :  { %v4807_v63 = vpop.xlane.xlu1 %4806 }
0x116a   :  { %v4809_v36 = vmul.f32 0.00390625, %v4807_v63  ;;  %v4814_v41 = vmul.f32 %v12892_v52, %v12892_v52  ;;  %v4815_v0 = vmul.f32 %v12895_v16, %v12895_v16 }
0x116c   :  { %v12902_v46 = vsub.f32 %v12882_v21, %v4809_v36  ;;  %v12905_v60 = vsub.f32 %v12885_v48, %v4809_v36  ;;  %v4818_v13 = vadd.f32 %v4815_v0, %v4814_v41  ;;  %v11017_v21 = vld [vmem:[#allocation20 + $0x344] ss:$16 sps:$4 sm:$0xff]   ;;  %v11020_v48 = vld [vmem:[#allocation20 + $0x34c] ss:$16 sps:$4 sm:$0xff]  }
0x116d   :  { %5294 = vmatprep.subr.bf16.mxu0 %v11017_v21  ;;  %5337 = vmatprep.subr.bf16.mxu1 %v11020_v48 }
0x116e   :  { %4819 = vadd.xlane.f32.xlu1 %v4818_v13  ;;  %v4816_v57 = vmul.f32 %v12902_v46, %v12902_v46  ;;  %v4817_v4 = vmul.f32 %v12905_v60, %v12905_v60  ;;  %5295 = vmatpush1.bf16.msra.mxu0 %v11015_v22  ;;  %v4853_v22 = vrot.slane %v4801_v55, %v12476_v15 }
0x116f   :  { %5338 = vmatpush1.bf16.msra.mxu1 %v11018_v54  ;;  %5296 = vmatprep.subr.bf16.mxu0 %v11023_v53  ;;  %v4857_v54 = vrot.slane %v4801_v55, %v12482_v40  ;;  %v11084_v55 = vld [vmem:[#allocation23 + $0x2b0] ss:$8 sps:$4 sm:$0xff]  }
0x1170   :  { %v4821_v17 = vadd.f32 %v4817_v4, %v4816_v57  ;;  %5339 = vmatprep.subr.bf16.mxu1 %v11026_v28  ;;  %v4799_v4 = vld [vmem:[#allocation17 + $0x2] sm:$0x3] }
0x1171   :  { %v4838_v23 = vrot.slane %v4799_v4, %v12476_v15  ;;  %v4842_v21 = vrot.slane %v4799_v4, %v12482_v40  ;;  %v11083_v4 = vld [vmem:[#allocation23 + $0x2a4] ss:$8 sps:$4 sm:$0xff]  }
0x1172   :  { %4822 = vadd.xlane.f32.xlu0 %v4821_v17  ;;  %5297 = vmatpush1.bf16.msra.mxu0 %v11021_v62 }
0x1173   :  { %5340 = vmatpush1.bf16.msra.mxu1 %v11024_v47  ;;  %5298 = vmatprep.subr.bf16.mxu0 %v11029_v25 }
0x1174   :  { %5341 = vmatprep.subr.bf16.mxu1 %v11032_v5 }
0x1176   :  { %5299 = vmatpush1.bf16.msra.mxu0 %v11027_v3 }
0x1177   :  { %5342 = vmatpush1.bf16.msra.mxu1 %v11030_v12  ;;  %5300 = vmatprep.subr.bf16.mxu0 %v11035_v45 }
0x1178   :  { %5343 = vmatprep.subr.bf16.mxu1 %v11038_v10  ;;  %v11051_v10 = vld [vmem:[#allocation23 + $0x200] ss:$8 sps:$4 sm:$0xff]  }
0x117a   :  { %5301 = vmatpush1.bf16.msra.mxu0 %v11033_v6  ;;  %v11054_v6 = vld [vmem:[#allocation23 + $0x210] ss:$8 sps:$4 sm:$0xff]  }
0x117b   :  { %5344 = vmatpush1.bf16.msra.mxu1 %v11036_v49  ;;  %5302 = vmatprep.subr.bf16.mxu0 %v11041_v8  ;;  %v11059_v49 = vld [vmem:[#allocation23 + $0x224] ss:$8 sps:$4 sm:$0xff]   ;;  %v11057_v8 = vld [vmem:[#allocation23 + $0x220] ss:$8 sps:$4 sm:$0xff]  }
0x117c   :  { %5345 = vmatprep.subr.bf16.mxu1 %v11044_v31  ;;  %v11062_v31 = vld [vmem:[#allocation23 + $0x234] ss:$8 sps:$4 sm:$0xff]  }
0x117e   :  { %5303 = vmatpush1.bf16.msra.mxu0 %v11039_v56  ;;  %v11060_v56 = vld [vmem:[#allocation23 + $0x230] ss:$8 sps:$4 sm:$0xff]  }
0x117f   :  { %5346 = vmatpush1.bf16.msra.mxu1 %v11042_v14  ;;  %5304 = vmatprep.subr.bf16.mxu0 %v11047_v20  ;;  %v11065_v14 = vld [vmem:[#allocation23 + $0x244] ss:$8 sps:$4 sm:$0xff]   ;;  %v11063_v20 = vld [vmem:[#allocation23 + $0x240] ss:$8 sps:$4 sm:$0xff]  }
0x1180   :  { %5347 = vmatprep.subr.bf16.mxu1 %v11050_v33  ;;  %v11068_v33 = vld [vmem:[#allocation23 + $0x254] ss:$8 sps:$4 sm:$0xff]  }
0x1182   :  { %5305 = vmatpush1.bf16.msra.mxu0 %v11045_v30  ;;  %v11066_v30 = vld [vmem:[#allocation23 + $0x250] ss:$8 sps:$4 sm:$0xff]  }
0x1183   :  { %5348 = vmatpush1.bf16.msra.mxu1 %v11048_v2  ;;  %5770 = vmatprep.subr.bf16.mxu0 %v11053_v29  ;;  %v11071_v2 = vld [vmem:[#allocation23 + $0x264] ss:$8 sps:$4 sm:$0xff]   ;;  %v11069_v29 = vld [vmem:[#allocation23 + $0x260] ss:$8 sps:$4 sm:$0xff]  }
0x11fb   :  { %v4820_v63 = vpop.xlane.xlu1 %4819 }
0x11fc   :  { %v4824_v36 = vmul.f32 0.00390625, %v4820_v63  ;;  %v11074_v63 = vld [vmem:[#allocation23 + $0x274] ss:$8 sps:$4 sm:$0xff]  }
0x11fe   :  { %v4826_v41 = vadd.f32 1e-05, %v4824_v36  ;;  %v11072_v36 = vld [vmem:[#allocation23 + $0x270] ss:$8 sps:$4 sm:$0xff]  }
0x11ff   :  { %v4823_v0 = vpop.xlane.xlu0 %4822 }
0x1200   :  { %11563 = vrsqrt.f32 %v4826_v41  ;;  %v4825_v13 = vmul.f32 0.00390625, %v4823_v0  ;;  %v11077_v41 = vld [vmem:[#allocation23 + $0x284] ss:$8 sps:$4 sm:$0xff]   ;;  %v11075_v0 = vld [vmem:[#allocation23 + $0x280] ss:$8 sps:$4 sm:$0xff]  }
0x1202   :  { %v4827_v57 = vadd.f32 1e-05, %v4825_v13  ;;  %v11080_v13 = vld [vmem:[#allocation23 + $0x294] ss:$8 sps:$4 sm:$0xff]  }
0x1204   :  { %11565 = vrsqrt.f32 %v4827_v57  ;;  %v11078_v57 = vld [vmem:[#allocation23 + $0x290] ss:$8 sps:$4 sm:$0xff]  }
0x120a   :  { %v11564_v17 = vpop.eup %11563 }
0x120b   :  { %v4830_v38 = vmul.f32 %v11564_v17, %v12892_v52  ;;  %v4831_v24 = vmul.f32 %v11564_v17, %v12895_v16  ;;  %v11081_v17 = vld [vmem:[#allocation23 + $0x2a0] ss:$8 sps:$4 sm:$0xff]  }
0x120d   :  { %v4846_v62 = vmul.f32 %v4842_v21, %v4831_v24  ;;  %v4845_v47 = vmul.f32 %v4838_v23, %v4830_v38  ;;  %v11086_v38 = vld [vmem:[#allocation23 + $0x2b4] ss:$8 sps:$4 sm:$0xff]   ;;  %v11089_v24 = vld [vmem:[#allocation23 + $0x2c4] ss:$8 sps:$4 sm:$0xff]  }
0x120e   :  { %v11566_v48 = vpop.eup %11565 }
0x120f   :  { %v4832_v53 = vmul.f32 %v11566_v48, %v12902_v46  ;;  %v4833_v28 = vmul.f32 %v11566_v48, %v12905_v60  ;;  %v12919_v5 = vadd.f32 %v4857_v54, %v4846_v62  ;;  %v12923_v3 = vadd.f32 %v4853_v22, %v4845_v47  ;;  %v11056_v60 = vld [vmem:[#allocation23 + $0x214] ss:$8 sps:$4 sm:$0xff]   ;;  %v11090_v48 = vld [vmem:[#allocation23 + $0x2d0] ss:$8 sps:$4 sm:$0xff]   ;;  %v11101_v62 = vld [vmem:[#allocation23 + $0x304] ss:$8 sps:$4 sm:$0xff]  }
0x1210   :  { %v4932_v47 = vld [vmem:[#allocation22 + $0x4] sm:$0xf] }
0x1211   :  { %v4848_v25 = vmul.f32 %v4842_v21, %v4833_v28  ;;  %v4847_v52 = vmul.f32 %v4838_v23, %v4832_v53  ;;  %v11087_v23 = vld [vmem:[#allocation23 + $0x2c0] ss:$8 sps:$4 sm:$0xff]   ;;  %v11092_v21 = vld [vmem:[#allocation23 + $0x2d4] ss:$8 sps:$4 sm:$0xff]   ;;  %v11096_v28 = vld [vmem:[#allocation23 + $0x2f0] ss:$8 sps:$4 sm:$0xff]  }
0x1212   :  { %v11098_v53 = vld [vmem:[#allocation23 + $0x2f4] ss:$8 sps:$4 sm:$0xff]  }
0x1213   :  { %v12921_v16 = vadd.f32 %v4857_v54, %v4848_v25  ;;  %v12925_v12 = vadd.f32 %v4853_v22, %v4847_v52  ;;  %v11095_v22 = vld [vmem:[#allocation23 + $0x2e4] ss:$8 sps:$4 sm:$0xff]   ;;  %v11093_v54 = vld [vmem:[#allocation23 + $0x2e0] ss:$8 sps:$4 sm:$0xff]   ;;  %v4937_v25 = vrot.slane %v4932_v47, %v12476_v15  ;;  %v4945_v52 = vrot.slane %v4932_v47, %v12479_v39 }
0x1215   :  { %v4865_v45 = vpack.c.bf16 %v12921_v16, %v12919_v5  ;;  %v4864_v46 = vpack.c.bf16 %v12925_v12, %v12923_v3 }
0x1217   :  { %5306 = vmatprep.mubr.bf16.mxu0 %v4865_v45  ;;  %5349 = vmatprep.mubr.bf16.mxu1 %v4865_v45  ;;  %v4941_v45 = vrot.slane %v4932_v47, %v12482_v40 }
0x1218   :  { %5307 = vmatmul.mubr.bf16.vlgmr.msra.gmra.mrb[28].mxu0 %v4864_v46  ;;  %5350 = vmatmul.mubr.bf16.vlgmr.msra.gmra.mrb[52].mxu1 %v4864_v46  ;;  %v4949_v46 = vrot.slane %v4932_v47, %v12487_v44  ;;  %v11105_v47 = vld [vmem:[#allocation23 + $0x320] ss:$8 sps:$4 sm:$0xff]  }
0x1219   :  { %5771 = vmatpush1.bf16.msra.mxu0 %v11051_v10 }
0x121a   :  { %5772 = vmatprep.subr.bf16.mxu0 %v11056_v60 }
0x121d   :  { %5773 = vmatpush1.bf16.msra.mxu0 %v11054_v6 }
0x121e   :  { %5774 = vmatprep.subr.bf16.mxu0 %v11059_v49 }
0x1221   :  { %5775 = vmatpush1.bf16.msra.mxu0 %v11057_v8 }
0x1222   :  { %5776 = vmatprep.subr.bf16.mxu0 %v11062_v31 }
0x1225   :  { %5777 = vmatpush1.bf16.msra.mxu0 %v11060_v56 }
0x1226   :  { %5778 = vmatprep.subr.bf16.mxu0 %v11065_v14 }
0x1229   :  { %5779 = vmatpush1.bf16.msra.mxu0 %v11063_v20 }
0x122a   :  { %5780 = vmatprep.subr.bf16.mxu0 %v11068_v33 }
0x122d   :  { %5781 = vmatpush1.bf16.msra.mxu0 %v11066_v30 }
0x122e   :  { %5782 = vmatprep.subr.bf16.mxu0 %v11071_v2 }
0x1231   :  { %5783 = vmatpush1.bf16.msra.mxu0 %v11069_v29 }
0x1232   :  { %5784 = vmatprep.subr.bf16.mxu0 %v11074_v63 }
0x1235   :  { %5785 = vmatpush1.bf16.msra.mxu0 %v11072_v36 }
0x1236   :  { %5786 = vmatprep.subr.bf16.mxu0 %v11077_v41 }
0x1239   :  { %5787 = vmatpush1.bf16.msra.mxu0 %v11075_v0 }
0x123a   :  { %5788 = vmatprep.subr.bf16.mxu0 %v11080_v13 }
0x123d   :  { %5789 = vmatpush1.bf16.msra.mxu0 %v11078_v57 }
0x123e   :  { %5790 = vmatprep.subr.bf16.mxu0 %v11083_v4 }
0x1241   :  { %5791 = vmatpush1.bf16.msra.mxu0 %v11081_v17 }
0x1242   :  { %5792 = vmatprep.subr.bf16.mxu0 %v11086_v38 }
0x1245   :  { %5793 = vmatpush1.bf16.msra.mxu0 %v11084_v55 }
0x1246   :  { %5794 = vmatprep.subr.bf16.mxu0 %v11089_v24 }
0x1249   :  { %5795 = vmatpush1.bf16.msra.mxu0 %v11087_v23 }
0x124a   :  { %5796 = vmatprep.subr.bf16.mxu0 %v11092_v21 }
0x124d   :  { %5797 = vmatpush1.bf16.msra.mxu0 %v11090_v48 }
0x124e   :  { %5798 = vmatprep.subr.bf16.mxu0 %v11095_v22 }
0x1251   :  { %5799 = vmatpush1.bf16.msra.mxu0 %v11093_v54  ;;  %v11099_v54 = vld [vmem:[#allocation23 + $0x300] ss:$8 sps:$4 sm:$0xff]  }
0x1252   :  { %5800 = vmatprep.subr.bf16.mxu0 %v11098_v53  ;;  %v11104_v53 = vld [vmem:[#allocation23 + $0x314] ss:$8 sps:$4 sm:$0xff]  }
0x1255   :  { %5801 = vmatpush1.bf16.msra.mxu0 %v11096_v28  ;;  %v11102_v28 = vld [vmem:[#allocation23 + $0x310] ss:$8 sps:$4 sm:$0xff]  }
0x1256   :  { %5813 = vmatprep.subr.bf16.mxu0 %v11101_v62  ;;  %v11107_v62 = vld [vmem:[#allocation23 + $0x324] ss:$8 sps:$4 sm:$0xff]  }
0x12eb   :  { %v5308_v10 = vpop.f32.mrb[28].mxu0  ;;  %v5351_v60 = vpop.f32.mrb[52].mxu1 }
0x12ec   :  { %v5309_v6 = vadd.f32 %v5308_v10, %v4937_v25  ;;  %v5352_v49 = vadd.f32 %v5351_v60, %v4945_v52  ;;  %v5310_v8 = vpop.f32.mrb[29].mxu0  ;;  %v5353_v31 = vpop.f32.mrb[53].mxu1  ;;  %v11116_v10 = vld [vmem:[#allocation23 + $0x354] ss:$8 sps:$4 sm:$0xff]   ;;  %v11114_v60 = vld [vmem:[#allocation23 + $0x350] ss:$8 sps:$4 sm:$0xff]  }
0x12ed   :  { %v5311_v56 = vadd.f32 %v5310_v8, %v4941_v45  ;;  %v5354_v14 = vadd.f32 %v5353_v31, %v4949_v46  ;;  %v5312_v20 = vpop.f32.mrb[30].mxu0  ;;  %v5355_v33 = vpop.f32.mrb[54].mxu1  ;;  %v11122_v8 = vld [vmem:[#allocation23 + $0x374] ss:$8 sps:$4 sm:$0xff]   ;;  %v11120_v31 = vld [vmem:[#allocation23 + $0x370] ss:$8 sps:$4 sm:$0xff]  }
0x12ee   :  { %v5313_v30 = vadd.f32 %v5312_v20, %v4937_v25  ;;  %v5356_v2 = vadd.f32 %v5355_v33, %v4945_v52  ;;  %v5314_v29 = vpop.f32.mrb[31].mxu0  ;;  %v5357_v63 = vpop.f32.mrb[55].mxu1  ;;  %v5360_v0 = vmax.f32 %v5309_v6, 0.0  ;;  %v5362_v13 = vmax.f32 %v5352_v49, 0.0  ;;  %v11110_v25 = vld [vmem:[#allocation23 + $0x334] ss:$8 sps:$4 sm:$0xff]  }
0x12ef   :  { %v5315_v36 = vadd.f32 %v5314_v29, %v4941_v45  ;;  %v5358_v41 = vadd.f32 %v5357_v63, %v4949_v46  ;;  %v5361_v17 = vmax.f32 %v5311_v56, 0.0  ;;  %v5363_v38 = vmax.f32 %v5354_v14, 0.0  ;;  %v11108_v52 = vld [vmem:[#allocation23 + $0x330] ss:$8 sps:$4 sm:$0xff]   ;;  %v11113_v45 = vld [vmem:[#allocation23 + $0x344] ss:$8 sps:$4 sm:$0xff]  }
0x12f0   :  { %v5364_v57 = vmax.f32 %v5313_v30, 0.0  ;;  %v5366_v4 = vmax.f32 %v5356_v2, 0.0  ;;  %v11111_v46 = vld [vmem:[#allocation23 + $0x340] ss:$8 sps:$4 sm:$0xff]   ;;  %v11119_v6 = vld [vmem:[#allocation23 + $0x364] ss:$8 sps:$4 sm:$0xff]  }
0x12f1   :  { %v5365_v55 = vmax.f32 %v5315_v36, 0.0  ;;  %v5367_v24 = vmax.f32 %v5358_v41, 0.0  ;;  %v11117_v49 = vld [vmem:[#allocation23 + $0x360] ss:$8 sps:$4 sm:$0xff]   ;;  %v11125_v56 = vld [vmem:[#allocation23 + $0x384] ss:$8 sps:$4 sm:$0xff]  }
0x12f2   :  { %v5368_v23 = vpack.c.bf16 %v5364_v57, %v5360_v0  ;;  %v12935_v21 = vpack.c.bf16 %v5366_v4, %v5362_v13  ;;  %v11123_v14 = vld [vmem:[#allocation23 + $0x380] ss:$8 sps:$4 sm:$0xff]   ;;  %v11128_v20 = vld [vmem:[#allocation23 + $0x394] ss:$8 sps:$4 sm:$0xff]   ;;  %v11126_v33 = vld [vmem:[#allocation23 + $0x390] ss:$8 sps:$4 sm:$0xff]  }
0x12f3   :  { %v5369_v48 = vpack.c.bf16 %v5365_v55, %v5361_v17  ;;  %v5371_v22 = vpack.c.bf16 %v5367_v24, %v5363_v38  ;;  %v11131_v30 = vld [vmem:[#allocation23 + $0x3a4] ss:$8 sps:$4 sm:$0xff]   ;;  %v11129_v2 = vld [vmem:[#allocation23 + $0x3a0] ss:$8 sps:$4 sm:$0xff]   ;;  %v11134_v29 = vld [vmem:[#allocation23 + $0x3b4] ss:$8 sps:$4 sm:$0xff]  }
0x12f4   :  { %v11132_v63 = vld [vmem:[#allocation23 + $0x3b0] ss:$8 sps:$4 sm:$0xff]   ;;  %v11137_v36 = vld [vmem:[#allocation23 + $0x3c4] ss:$8 sps:$4 sm:$0xff]   ;;  %v11135_v41 = vld [vmem:[#allocation23 + $0x3c0] ss:$8 sps:$4 sm:$0xff]  }
0x12f5   :  { %5802 = vmatprep.mubr.bf16.mxu0 %v5369_v48  ;;  %v11140_v0 = vld [vmem:[#allocation23 + $0x3d4] ss:$8 sps:$4 sm:$0xff]   ;;  %v11138_v13 = vld [vmem:[#allocation23 + $0x3d0] ss:$8 sps:$4 sm:$0xff]   ;;  %v11143_v57 = vld [vmem:[#allocation23 + $0x3e4] ss:$8 sps:$4 sm:$0xff]  }
0x12f6   :  { %5803 = vmatmul.mubr.bf16.vlgmr.msra.gmra.mrb[32].mxu0 %v5368_v23  ;;  %v11141_v4 = vld [vmem:[#allocation23 + $0x3e0] ss:$8 sps:$4 sm:$0xff]   ;;  %v11146_v17 = vld [vmem:[#allocation23 + $0x3f4] ss:$8 sps:$4 sm:$0xff]   ;;  %v11144_v38 = vld [vmem:[#allocation23 + $0x3f0] ss:$8 sps:$4 sm:$0xff]  }
0x12f7   :  { %5814 = vmatpush1.bf16.msra.mxu0 %v11099_v54  ;;  %5845 = vmatprep.mubr.bf16.mxu0 %v5371_v22  ;;  %v5438_v55 = vld [vmem:[#allocation25 + $0x2] sm:$0x3] }
0x12f8   :  { %5815 = vmatprep.subr.bf16.mxu0 %v11104_v53  ;;  %v5443_v24 = vrot.slane %v5438_v55, %v12476_v15  ;;  %v5447_v23 = vrot.slane %v5438_v55, %v12482_v40  ;;  %v11185_v55 = vld [vmem:[#allocation11 + $0x724] ss:$24 sps:$4 sm:$0xff]  }
0x12fb   :  { %5816 = vmatpush1.bf16.msra.mxu0 %v11102_v28 }
0x12fc   :  { %5817 = vmatprep.subr.bf16.mxu0 %v11107_v62 }
0x12ff   :  { %5818 = vmatpush1.bf16.msra.mxu0 %v11105_v47 }
0x1300   :  { %5819 = vmatprep.subr.bf16.mxu0 %v11110_v25 }
0x1303   :  { %5820 = vmatpush1.bf16.msra.mxu0 %v11108_v52 }
0x1304   :  { %5821 = vmatprep.subr.bf16.mxu0 %v11113_v45 }
0x1307   :  { %5822 = vmatpush1.bf16.msra.mxu0 %v11111_v46 }
0x1308   :  { %5823 = vmatprep.subr.bf16.mxu0 %v11116_v10 }
0x130b   :  { %5824 = vmatpush1.bf16.msra.mxu0 %v11114_v60  ;;  %v11147_v60 = vld [vmem:[#allocation11 + $0x600] ss:$24 sps:$4 sm:$0xff]  }
0x130c   :  { %5825 = vmatprep.subr.bf16.mxu0 %v11119_v6  ;;  %v11149_v6 = vld [vmem:[#allocation11 + $0x604] ss:$24 sps:$4 sm:$0xff]  }
0x130d   :  { %6538 = vmatprep.subr.bf16.mxu1 %v11149_v6  ;;  %v11201_v6 = vld [vmem:[#allocation11 + $0x7b0] ss:$24 sps:$4 sm:$0xff]  }
0x130e   :  { %6539 = vmatpush1.bf16.msra.mxu1 %v11147_v60  ;;  %v11206_v60 = vld [vmem:[#allocation11 + $0x7c4] ss:$24 sps:$4 sm:$0xff]  }
0x130f   :  { %5826 = vmatpush1.bf16.msra.mxu0 %v11117_v49  ;;  %v11150_v49 = vld [vmem:[#allocation11 + $0x610] ss:$24 sps:$4 sm:$0xff]  }
0x1310   :  { %5827 = vmatprep.subr.bf16.mxu0 %v11122_v8  ;;  %v11155_v8 = vld [vmem:[#allocation11 + $0x634] ss:$24 sps:$4 sm:$0xff]  }
0x1311   :  { %6540 = vmatprep.subr.bf16.mxu1 %v11155_v8 }
0x1313   :  { %5828 = vmatpush1.bf16.msra.mxu0 %v11120_v31  ;;  %v11158_v31 = vld [vmem:[#allocation11 + $0x644] ss:$24 sps:$4 sm:$0xff]  }
0x1314   :  { %5829 = vmatprep.subr.bf16.mxu0 %v11125_v56  ;;  %v11161_v56 = vld [vmem:[#allocation11 + $0x664] ss:$24 sps:$4 sm:$0xff]  }
0x1317   :  { %5830 = vmatpush1.bf16.msra.mxu0 %v11123_v14  ;;  %v11164_v14 = vld [vmem:[#allocation11 + $0x674] ss:$24 sps:$4 sm:$0xff]  }
0x1318   :  { %5831 = vmatprep.subr.bf16.mxu0 %v11128_v20  ;;  %v11159_v20 = vld [vmem:[#allocation11 + $0x660] ss:$24 sps:$4 sm:$0xff]  }
0x131b   :  { %5832 = vmatpush1.bf16.msra.mxu0 %v11126_v33  ;;  %v11162_v33 = vld [vmem:[#allocation11 + $0x670] ss:$24 sps:$4 sm:$0xff]  }
0x131c   :  { %5833 = vmatprep.subr.bf16.mxu0 %v11131_v30  ;;  %v11167_v30 = vld [vmem:[#allocation11 + $0x694] ss:$24 sps:$4 sm:$0xff]  }
0x131f   :  { %5834 = vmatpush1.bf16.msra.mxu0 %v11129_v2  ;;  %v11170_v2 = vld [vmem:[#allocation11 + $0x6a4] ss:$24 sps:$4 sm:$0xff]  }
0x1320   :  { %5835 = vmatprep.subr.bf16.mxu0 %v11134_v29  ;;  %v11165_v29 = vld [vmem:[#allocation11 + $0x690] ss:$24 sps:$4 sm:$0xff]  }
0x1323   :  { %5836 = vmatpush1.bf16.msra.mxu0 %v11132_v63  ;;  %v11168_v63 = vld [vmem:[#allocation11 + $0x6a0] ss:$24 sps:$4 sm:$0xff]  }
0x1324   :  { %5837 = vmatprep.subr.bf16.mxu0 %v11137_v36  ;;  %v11173_v36 = vld [vmem:[#allocation11 + $0x6c4] ss:$24 sps:$4 sm:$0xff]  }
0x1327   :  { %5838 = vmatpush1.bf16.msra.mxu0 %v11135_v41  ;;  %v11176_v41 = vld [vmem:[#allocation11 + $0x6d4] ss:$24 sps:$4 sm:$0xff]  }
0x1328   :  { %5839 = vmatprep.subr.bf16.mxu0 %v11140_v0  ;;  %v11171_v0 = vld [vmem:[#allocation11 + $0x6c0] ss:$24 sps:$4 sm:$0xff]  }
0x132b   :  { %5840 = vmatpush1.bf16.msra.mxu0 %v11138_v13  ;;  %v11174_v13 = vld [vmem:[#allocation11 + $0x6d0] ss:$24 sps:$4 sm:$0xff]  }
0x132c   :  { %5841 = vmatprep.subr.bf16.mxu0 %v11143_v57  ;;  %v11179_v57 = vld [vmem:[#allocation11 + $0x6f4] ss:$24 sps:$4 sm:$0xff]  }
0x132f   :  { %5842 = vmatpush1.bf16.msra.mxu0 %v11141_v4  ;;  %v11182_v4 = vld [vmem:[#allocation11 + $0x704] ss:$24 sps:$4 sm:$0xff]  }
0x1330   :  { %5843 = vmatprep.subr.bf16.mxu0 %v11146_v17  ;;  %v11177_v17 = vld [vmem:[#allocation11 + $0x6f0] ss:$24 sps:$4 sm:$0xff]  }
0x1333   :  { %5844 = vmatpush1.bf16.msra.mxu0 %v11144_v38  ;;  %v11180_v38 = vld [vmem:[#allocation11 + $0x700] ss:$24 sps:$4 sm:$0xff]  }
0x1336   :  { %5846 = vmatmul.mubr.bf16.vlgmr.msra.gmra.mrb[32].mxu0 %v12935_v21 }
0x1409   :  { %v5847_v48 = vpop.f32.mrb[32].mxu0 }
0x140a   :  { %v10325_v22 = vadd.f32 %v5847_v48, %v5443_v24  ;;  %v5849_v54 = vpop.f32.mrb[33].mxu0  ;;  %v11186_v48 = vld [vmem:[#allocation11 + $0x730] ss:$24 sps:$4 sm:$0xff]  }
0x140b   :  { %v10326_v53 = vadd.f32 %v5849_v54, %v5447_v23  ;;  %v5851_v28 = vpop.f32.mrb[34].mxu0  ;;  %v11194_v54 = vld [vmem:[#allocation11 + $0x764] ss:$24 sps:$4 sm:$0xff]  }
0x140c   :  { %v12941_v62 = vadd.f32 %v10325_v22, %v12923_v3  ;;  %v10327_v47 = vadd.f32 %v5851_v28, %v5443_v24  ;;  %v5853_v25 = vpop.f32.mrb[35].mxu0  ;;  %v11188_v24 = vld [vmem:[#allocation11 + $0x734] ss:$24 sps:$4 sm:$0xff]   ;;  %v11192_v28 = vld [vmem:[#allocation11 + $0x760] ss:$24 sps:$4 sm:$0xff]  }
0x140d   :  { %v12944_v52 = vadd.f32 %v10326_v53, %v12919_v5  ;;  %v10328_v45 = vadd.f32 %v5853_v25, %v5447_v23  ;;  %v11152_v5 = vld [vmem:[#allocation11 + $0x614] ss:$24 sps:$4 sm:$0xff]   ;;  %v11183_v23 = vld [vmem:[#allocation11 + $0x720] ss:$24 sps:$4 sm:$0xff]   ;;  %v11189_v53 = vld [vmem:[#allocation11 + $0x750] ss:$24 sps:$4 sm:$0xff]  }
0x140e   :  { %v12947_v21 = vadd.f32 %v10327_v47, %v12925_v12  ;;  %6624 = vmatprep.subr.bf16.mxu0 %v11152_v5  ;;  %v11153_v12 = vld [vmem:[#allocation11 + $0x630] ss:$24 sps:$4 sm:$0xff]   ;;  %v11191_v22 = vld [vmem:[#allocation11 + $0x754] ss:$24 sps:$4 sm:$0xff]   ;;  %v11197_v47 = vld [vmem:[#allocation11 + $0x784] ss:$24 sps:$4 sm:$0xff]  }
0x140f   :  { %v12950_v46 = vadd.f32 %v10328_v45, %v12921_v16  ;;  %v5864_v10 = vadd.f32 %v12944_v52, %v12941_v62  ;;  %6625 = vmatpush1.bf16.msra.mxu0 %v11150_v49  ;;  %v11156_v16 = vld [vmem:[#allocation11 + $0x640] ss:$24 sps:$4 sm:$0xff]   ;;  %6541 = vmatpush1.bf16.msra.mxu1 %v11153_v12  ;;  %v11200_v25 = vld [vmem:[#allocation11 + $0x794] ss:$24 sps:$4 sm:$0xff]  }
0x1410   :  { %6626 = vmatprep.subr.bf16.mxu0 %v11158_v31  ;;  %6542 = vmatprep.subr.bf16.mxu1 %v11161_v56  ;;  %v11195_v45 = vld [vmem:[#allocation11 + $0x780] ss:$24 sps:$4 sm:$0xff]  }
0x1411   :  { %5865 = vadd.xlane.f32.xlu1 %v5864_v10  ;;  %v5867_v3 = vadd.f32 %v12950_v46, %v12947_v21  ;;  %v11198_v10 = vld [vmem:[#allocation11 + $0x790] ss:$24 sps:$4 sm:$0xff]   ;;  %v11204_v49 = vld [vmem:[#allocation11 + $0x7c0] ss:$24 sps:$4 sm:$0xff]  }
0x1413   :  { %5868 = vadd.xlane.f32.xlu0 %v5867_v3  ;;  %6627 = vmatpush1.bf16.msra.mxu0 %v11156_v16  ;;  %v11203_v3 = vld [vmem:[#allocation11 + $0x7b4] ss:$24 sps:$4 sm:$0xff]  }
0x1414   :  { %6628 = vmatprep.subr.bf16.mxu0 %v11164_v14  ;;  %6543 = vmatpush1.bf16.msra.mxu1 %v11159_v20 }
0x1415   :  { %6544 = vmatprep.subr.bf16.mxu1 %v11167_v30 }
0x1417   :  { %6629 = vmatpush1.bf16.msra.mxu0 %v11162_v33 }
0x1418   :  { %6630 = vmatprep.subr.bf16.mxu0 %v11170_v2  ;;  %6545 = vmatpush1.bf16.msra.mxu1 %v11165_v29 }
0x1419   :  { %6546 = vmatprep.subr.bf16.mxu1 %v11173_v36  ;;  %v11210_v36 = vld [vmem:[#allocation11 + $0x7f0] ss:$24 sps:$4 sm:$0xff]  }
0x141b   :  { %6631 = vmatpush1.bf16.msra.mxu0 %v11168_v63  ;;  %v11207_v63 = vld [vmem:[#allocation11 + $0x7e0] ss:$24 sps:$4 sm:$0xff]  }
0x141c   :  { %6632 = vmatprep.subr.bf16.mxu0 %v11176_v41  ;;  %6547 = vmatpush1.bf16.msra.mxu1 %v11171_v0  ;;  %v11215_v41 = vld [vmem:[#allocation11 + $0x814] ss:$24 sps:$4 sm:$0xff]   ;;  %v11213_v0 = vld [vmem:[#allocation11 + $0x810] ss:$24 sps:$4 sm:$0xff]  }
0x141d   :  { %6548 = vmatprep.subr.bf16.mxu1 %v11179_v57  ;;  %v11216_v57 = vld [vmem:[#allocation11 + $0x820] ss:$24 sps:$4 sm:$0xff]  }
0x141f   :  { %6633 = vmatpush1.bf16.msra.mxu0 %v11174_v13  ;;  %v11218_v13 = vld [vmem:[#allocation11 + $0x824] ss:$24 sps:$4 sm:$0xff]  }
0x1420   :  { %6634 = vmatprep.subr.bf16.mxu0 %v11182_v4  ;;  %6549 = vmatpush1.bf16.msra.mxu1 %v11177_v17  ;;  %v11221_v4 = vld [vmem:[#allocation11 + $0x844] ss:$24 sps:$4 sm:$0xff]   ;;  %v11219_v17 = vld [vmem:[#allocation11 + $0x840] ss:$24 sps:$4 sm:$0xff]  }
0x1421   :  { %6550 = vmatprep.subr.bf16.mxu1 %v11185_v55  ;;  %v11222_v55 = vld [vmem:[#allocation11 + $0x850] ss:$24 sps:$4 sm:$0xff]  }
0x1423   :  { %6635 = vmatpush1.bf16.msra.mxu0 %v11180_v38  ;;  %v11224_v38 = vld [vmem:[#allocation11 + $0x854] ss:$24 sps:$4 sm:$0xff]  }
0x1424   :  { %6636 = vmatprep.subr.bf16.mxu0 %v11188_v24  ;;  %6551 = vmatpush1.bf16.msra.mxu1 %v11183_v23  ;;  %v11227_v24 = vld [vmem:[#allocation11 + $0x874] ss:$24 sps:$4 sm:$0xff]   ;;  %v11225_v23 = vld [vmem:[#allocation11 + $0x870] ss:$24 sps:$4 sm:$0xff]  }
0x1425   :  { %6552 = vmatprep.subr.bf16.mxu1 %v11191_v22  ;;  %v11228_v22 = vld [vmem:[#allocation11 + $0x880] ss:$24 sps:$4 sm:$0xff]  }
0x1427   :  { %6637 = vmatpush1.bf16.msra.mxu0 %v11186_v48  ;;  %v11230_v48 = vld [vmem:[#allocation11 + $0x884] ss:$24 sps:$4 sm:$0xff]  }
0x1428   :  { %6638 = vmatprep.subr.bf16.mxu0 %v11194_v54  ;;  %6553 = vmatpush1.bf16.msra.mxu1 %v11189_v53  ;;  %v11233_v54 = vld [vmem:[#allocation11 + $0x8a4] ss:$24 sps:$4 sm:$0xff]   ;;  %v11231_v53 = vld [vmem:[#allocation11 + $0x8a0] ss:$24 sps:$4 sm:$0xff]  }
0x1429   :  { %6554 = vmatprep.subr.bf16.mxu1 %v11197_v47  ;;  %v11234_v47 = vld [vmem:[#allocation11 + $0x8b0] ss:$24 sps:$4 sm:$0xff]  }
0x142b   :  { %6639 = vmatpush1.bf16.msra.mxu0 %v11192_v28  ;;  %v11236_v28 = vld [vmem:[#allocation11 + $0x8b4] ss:$24 sps:$4 sm:$0xff]  }
0x142c   :  { %6640 = vmatprep.subr.bf16.mxu0 %v11200_v25  ;;  %6555 = vmatpush1.bf16.msra.mxu1 %v11195_v45  ;;  %v11239_v25 = vld [vmem:[#allocation11 + $0x8d4] ss:$24 sps:$4 sm:$0xff]   ;;  %v11237_v45 = vld [vmem:[#allocation11 + $0x8d0] ss:$24 sps:$4 sm:$0xff]  }
0x142d   :  { %6556 = vmatprep.subr.bf16.mxu1 %v11203_v3  ;;  %v11240_v3 = vld [vmem:[#allocation11 + $0x8e0] ss:$24 sps:$4 sm:$0xff]  }
0x142f   :  { %6641 = vmatpush1.bf16.msra.mxu0 %v11198_v10  ;;  %v11242_v10 = vld [vmem:[#allocation11 + $0x8e4] ss:$24 sps:$4 sm:$0xff]  }
0x1430   :  { %6642 = vmatprep.subr.bf16.mxu0 %v11206_v60  ;;  %6557 = vmatpush1.bf16.msra.mxu1 %v11201_v6  ;;  %v11245_v60 = vld [vmem:[#allocation11 + $0x60c] ss:$24 sps:$4 sm:$0xff]  }
0x1433   :  { %6643 = vmatpush1.bf16.msra.mxu0 %v11204_v49 }
0x149e   :  { %v5866_v5 = vpop.xlane.xlu1 %5865 }
0x149f   :  { %v5870_v8 = vmul.f32 0.00390625, %v5866_v5 }
0x14a0   :  { %v5869_v31 = vpop.xlane.xlu0 %5868 }
0x14a1   :  { %v12957_v12 = vsub.f32 %v12941_v62, %v5870_v8  ;;  %v12960_v16 = vsub.f32 %v12944_v52, %v5870_v8  ;;  %v5871_v56 = vmul.f32 0.00390625, %v5869_v31 }
0x14a3   :  { %v12963_v14 = vsub.f32 %v12947_v21, %v5871_v56  ;;  %v12966_v20 = vsub.f32 %v12950_v46, %v5871_v56  ;;  %v5876_v33 = vmul.f32 %v12957_v12, %v12957_v12  ;;  %v5877_v30 = vmul.f32 %v12960_v16, %v12960_v16  ;;  %v11209_v21 = vld [vmem:[#allocation11 + $0x7e4] ss:$24 sps:$4 sm:$0xff]   ;;  %v11212_v46 = vld [vmem:[#allocation11 + $0x7f4] ss:$24 sps:$4 sm:$0xff]  }
0x14a4   :  { %6558 = vmatprep.subr.bf16.mxu1 %v11209_v21  ;;  %6644 = vmatprep.subr.bf16.mxu0 %v11212_v46 }
0x14a5   :  { %v5880_v2 = vadd.f32 %v5877_v30, %v5876_v33  ;;  %v5878_v62 = vmul.f32 %v12963_v14, %v12963_v14  ;;  %v5879_v52 = vmul.f32 %v12966_v20, %v12966_v20  ;;  %6559 = vmatpush1.bf16.msra.mxu1 %v11207_v63  ;;  %6645 = vmatpush1.bf16.msra.mxu0 %v11210_v36  ;;  %v5861_v33 = vld [vmem:[#allocation26 + $0x2] sm:$0x3]  ;;  %v5863_v30 = vld [vmem:[#allocation28 + $0x2] sm:$0x3] }
0x14a6   :  { %6560 = vmatprep.subr.bf16.mxu1 %v11215_v41  ;;  %6646 = vmatprep.subr.bf16.mxu0 %v11218_v13  ;;  %v5915_v46 = vrot.slane %v5863_v30, %v12476_v15  ;;  %v5919_v36 = vrot.slane %v5863_v30, %v12482_v40  ;;  %v11275_v30 = vld [vmem:[#allocation11 + $0x7ec] ss:$24 sps:$4 sm:$0xff]  }
0x14a7   :  { %5881 = vadd.xlane.f32.xlu1 %v5880_v2  ;;  %v5883_v29 = vadd.f32 %v5879_v52, %v5878_v62  ;;  %v5900_v2 = vrot.slane %v5861_v33, %v12476_v15  ;;  %v5904_v62 = vrot.slane %v5861_v33, %v12482_v40  ;;  %v11270_v33 = vld [vmem:[#allocation11 + $0x7b8] ss:$24 sps:$4 sm:$0xff]  }
0x14a9   :  { %5884 = vadd.xlane.f32.xlu0 %v5883_v29  ;;  %6561 = vmatpush1.bf16.msra.mxu1 %v11213_v0 }
0x14aa   :  { %6647 = vmatpush1.bf16.msra.mxu0 %v11216_v57  ;;  %6562 = vmatprep.subr.bf16.mxu1 %v11221_v4 }
0x14ab   :  { %6648 = vmatprep.subr.bf16.mxu0 %v11224_v38 }
0x14ad   :  { %6563 = vmatpush1.bf16.msra.mxu1 %v11219_v17 }
0x14ae   :  { %6649 = vmatpush1.bf16.msra.mxu0 %v11222_v55  ;;  %6564 = vmatprep.subr.bf16.mxu1 %v11227_v24 }
0x14af   :  { %6650 = vmatprep.subr.bf16.mxu0 %v11230_v48  ;;  %v11246_v48 = vld [vmem:[#allocation11 + $0x638] ss:$24 sps:$4 sm:$0xff]  }
0x14b1   :  { %6565 = vmatpush1.bf16.msra.mxu1 %v11225_v23  ;;  %v11243_v23 = vld [vmem:[#allocation11 + $0x608] ss:$24 sps:$4 sm:$0xff]  }
0x14b2   :  { %6651 = vmatpush1.bf16.msra.mxu0 %v11228_v22  ;;  %6566 = vmatprep.subr.bf16.mxu1 %v11233_v54  ;;  %v11251_v22 = vld [vmem:[#allocation11 + $0x66c] ss:$24 sps:$4 sm:$0xff]   ;;  %v11249_v54 = vld [vmem:[#allocation11 + $0x668] ss:$24 sps:$4 sm:$0xff]  }
0x14b3   :  { %6652 = vmatprep.subr.bf16.mxu0 %v11236_v28  ;;  %v11252_v28 = vld [vmem:[#allocation11 + $0x698] ss:$24 sps:$4 sm:$0xff]  }
0x14b5   :  { %6567 = vmatpush1.bf16.msra.mxu1 %v11231_v53  ;;  %v11254_v53 = vld [vmem:[#allocation11 + $0x69c] ss:$24 sps:$4 sm:$0xff]  }
0x14b6   :  { %6653 = vmatpush1.bf16.msra.mxu0 %v11234_v47  ;;  %6568 = vmatprep.subr.bf16.mxu1 %v11239_v25  ;;  %v11257_v47 = vld [vmem:[#allocation11 + $0x6cc] ss:$24 sps:$4 sm:$0xff]   ;;  %v11255_v25 = vld [vmem:[#allocation11 + $0x6c8] ss:$24 sps:$4 sm:$0xff]  }
0x14b7   :  { %6654 = vmatprep.subr.bf16.mxu0 %v11242_v10  ;;  %v11258_v10 = vld [vmem:[#allocation11 + $0x6f8] ss:$24 sps:$4 sm:$0xff]  }
0x14b9   :  { %6569 = vmatpush1.bf16.msra.mxu1 %v11237_v45  ;;  %v11260_v45 = vld [vmem:[#allocation11 + $0x6fc] ss:$24 sps:$4 sm:$0xff]  }
0x14ba   :  { %6655 = vmatpush1.bf16.msra.mxu0 %v11240_v3  ;;  %6581 = vmatprep.subr.bf16.mxu1 %v11245_v60  ;;  %v11263_v3 = vld [vmem:[#allocation11 + $0x72c] ss:$24 sps:$4 sm:$0xff]   ;;  %v11261_v60 = vld [vmem:[#allocation11 + $0x728] ss:$24 sps:$4 sm:$0xff]  }
0x14bb   :  { %10226 = vmatprep.subr.bf16.mxu0 %v12405_v61 }
0x1534   :  { %v5882_v6 = vpop.xlane.xlu1 %5881 }
0x1535   :  { %v5886_v49 = vmul.f32 0.00390625, %v5882_v6  ;;  %v11266_v6 = vld [vmem:[#allocation11 + $0x75c] ss:$24 sps:$4 sm:$0xff]  }
0x1536   :  { %v5885_v5 = vpop.xlane.xlu0 %5884 }
0x1537   :  { %v5888_v8 = vadd.f32 1e-05, %v5886_v49  ;;  %v5887_v31 = vmul.f32 0.00390625, %v5885_v5  ;;  %v11264_v49 = vld [vmem:[#allocation11 + $0x758] ss:$24 sps:$4 sm:$0xff]  }
0x1538   :  { %v11269_v5 = vld [vmem:[#allocation11 + $0x78c] ss:$24 sps:$4 sm:$0xff]  }
0x1539   :  { %11567 = vrsqrt.f32 %v5888_v8  ;;  %v5889_v56 = vadd.f32 1e-05, %v5887_v31  ;;  %v11267_v8 = vld [vmem:[#allocation11 + $0x788] ss:$24 sps:$4 sm:$0xff]   ;;  %v11272_v31 = vld [vmem:[#allocation11 + $0x7bc] ss:$24 sps:$4 sm:$0xff]  }
0x153b   :  { %11569 = vrsqrt.f32 %v5889_v56  ;;  %v13016_v56 = vld [vmem:[#allocation10 + $0x8] sm:$0xff] }
0x1543   :  { %v11568_v52 = vpop.eup %11567 }
0x1544   :  { %v5892_v29 = vmul.f32 %v11568_v52, %v12957_v12  ;;  %v5893_v21 = vmul.f32 %v11568_v52, %v12960_v16  ;;  %v11276_v52 = vld [vmem:[#allocation11 + $0x818] ss:$24 sps:$4 sm:$0xff]  }
0x1545   :  { %v11570_v63 = vpop.eup %11569 }
0x1546   :  { %v5894_v41 = vmul.f32 %v11570_v63, %v12963_v14  ;;  %v5895_v0 = vmul.f32 %v11570_v63, %v12966_v20  ;;  %v5908_v13 = vmul.f32 %v5904_v62, %v5893_v21  ;;  %v5907_v57 = vmul.f32 %v5900_v2, %v5892_v29  ;;  %v11248_v20 = vld [vmem:[#allocation11 + $0x63c] ss:$24 sps:$4 sm:$0xff]   ;;  %v11281_v29 = vld [vmem:[#allocation11 + $0x84c] ss:$24 sps:$4 sm:$0xff]   ;;  %v11279_v21 = vld [vmem:[#allocation11 + $0x848] ss:$24 sps:$4 sm:$0xff]  }
0x1547   :  { %v11284_v63 = vld [vmem:[#allocation11 + $0x87c] ss:$24 sps:$4 sm:$0xff]  }
0x1548   :  { %v5910_v4 = vmul.f32 %v5904_v62, %v5895_v0  ;;  %v5909_v17 = vmul.f32 %v5900_v2, %v5894_v41  ;;  %v12985_v38 = vadd.f32 %v5919_v36, %v5908_v13  ;;  %v12989_v12 = vadd.f32 %v5915_v46, %v5907_v57  ;;  %v11273_v2 = vld [vmem:[#allocation11 + $0x7e8] ss:$24 sps:$4 sm:$0xff]   ;;  %v11278_v62 = vld [vmem:[#allocation11 + $0x81c] ss:$24 sps:$4 sm:$0xff]   ;;  %v11288_v13 = vld [vmem:[#allocation11 + $0x8d8] ss:$24 sps:$4 sm:$0xff]  }
0x1549   :  { %v11285_v41 = vld [vmem:[#allocation11 + $0x8a8] ss:$24 sps:$4 sm:$0xff]   ;;  %v11290_v0 = vld [vmem:[#allocation11 + $0x8dc] ss:$24 sps:$4 sm:$0xff]   ;;  %v13037_v57 = vld [vmem:[#allocation13 + $0xc] sm:$0x3f] }
0x154a   :  { %v12987_v55 = vadd.f32 %v5919_v36, %v5910_v4  ;;  %v12991_v16 = vadd.f32 %v5915_v46, %v5909_v17  ;;  %v11282_v46 = vld [vmem:[#allocation11 + $0x878] ss:$24 sps:$4 sm:$0xff]   ;;  %v11287_v36 = vld [vmem:[#allocation11 + $0x8ac] ss:$24 sps:$4 sm:$0xff]  }
0x154c   :  { %v5927_v24 = vpack.c.bf16 %v12987_v55, %v12985_v38  ;;  %v12997_v14 = vpack.c.bf16 %v12991_v16, %v12989_v12 }
0x154e   :  { %6570 = vmatprep.mubr.bf16.mxu1 %v5927_v24  ;;  %6656 = vmatprep.mubr.bf16.mxu0 %v5927_v24 }
0x154f   :  { %6571 = vmatmul.mubr.bf16.vlgmr.msra.gmra.mrb[56].mxu1 %v12997_v14  ;;  %6657 = vmatmul.mubr.bf16.vlgmr.msra.gmra.mrb[36].mxu0 %v12997_v14 }
0x1550   :  { %6582 = vmatpush1.bf16.msra.mxu1 %v11243_v23  ;;  %6613 = vmatprep.mubr.bf16.mxu1 %v5927_v24  ;;  %v6031_v24 = vrot.slane %v13037_v57, %v12476_v15 }
0x1551   :  { %6583 = vmatprep.subr.bf16.mxu1 %v11248_v20  ;;  %10228 = vmatpush3.bf16.msra.mxu0 %v12422_v18  ;;  %v6035_v20 = vrot.slane %v13037_v57, %v12482_v40 }
0x1552   :  { %10230 = vmatprep.subr.bf16.mxu0 %v12424_v19 }
0x1554   :  { %6584 = vmatpush1.bf16.msra.mxu1 %v11246_v48 }
0x1555   :  { %6585 = vmatprep.subr.bf16.mxu1 %v11251_v22  ;;  %10232 = vmatpush3.bf16.msra.mxu0 %v12429_v26 }
0x1556   :  { %10234 = vmatprep.subr.bf16.mxu0 %v12432_v27 }
0x1558   :  { %6586 = vmatpush1.bf16.msra.mxu1 %v11249_v54 }
0x1559   :  { %6587 = vmatprep.subr.bf16.mxu1 %v11254_v53  ;;  %10236 = vmatpush3.bf16.msra.mxu0 %v12435_v34 }
0x155a   :  { %10238 = vmatprep.subr.bf16.mxu0 %v12438_v35 }
0x155c   :  { %6588 = vmatpush1.bf16.msra.mxu1 %v11252_v28 }
0x155d   :  { %6589 = vmatprep.subr.bf16.mxu1 %v11257_v47  ;;  %10240 = vmatpush3.bf16.msra.mxu0 %v12441_v42 }
0x155e   :  { %10242 = vmatprep.subr.bf16.mxu0 %v12444_v43 }
0x1560   :  { %6590 = vmatpush1.bf16.msra.mxu1 %v11255_v25  ;;  %v6039_v25 = vrot.slane %v13037_v57, %v12479_v39 }
0x1561   :  { %6591 = vmatprep.subr.bf16.mxu1 %v11260_v45  ;;  %10244 = vmatpush3.bf16.msra.mxu0 %v12447_v50  ;;  %v6043_v45 = vrot.slane %v13037_v57, %v12487_v44 }
0x1562   :  { %10246 = vmatprep.subr.bf16.mxu0 %v12450_v51 }
0x1564   :  { %6592 = vmatpush1.bf16.msra.mxu1 %v11258_v10 }
0x1565   :  { %6593 = vmatprep.subr.bf16.mxu1 %v11263_v3  ;;  %10248 = vmatpush3.bf16.msra.mxu0 %v12453_v58 }
0x1566   :  { %10250 = vmatprep.subr.bf16.mxu0 %v12456_v59 }
0x1568   :  { %6594 = vmatpush1.bf16.msra.mxu1 %v11261_v60 }
0x1569   :  { %6595 = vmatprep.subr.bf16.mxu1 %v11266_v6  ;;  %10252 = vmatpush3.bf16.msra.mxu0 %v12459_v1 }
0x156a   :  { %10254 = vmatprep.subr.bf16.mxu0 %v12465_v32 }
0x156c   :  { %6596 = vmatpush1.bf16.msra.mxu1 %v11264_v49 }
0x156d   :  { %6597 = vmatprep.subr.bf16.mxu1 %v11269_v5  ;;  %10256 = vmatpush3.bf16.msra.mxu0 %v12467_v37 }
0x156e   :  { %6903 = vmatprep.subr.mxu0 %v13016_v56 }
0x1570   :  { %6598 = vmatpush1.bf16.msra.mxu1 %v11267_v8 }
0x1571   :  { %6599 = vmatprep.subr.bf16.mxu1 %v11272_v31 }
0x1574   :  { %6600 = vmatpush1.bf16.msra.mxu1 %v11270_v33 }
0x1575   :  { %6601 = vmatprep.subr.bf16.mxu1 %v11275_v30 }
0x1578   :  { %6602 = vmatpush1.bf16.msra.mxu1 %v11273_v2 }
0x1579   :  { %6603 = vmatprep.subr.bf16.mxu1 %v11278_v62 }
0x157c   :  { %6604 = vmatpush1.bf16.msra.mxu1 %v11276_v52 }
0x157d   :  { %6605 = vmatprep.subr.bf16.mxu1 %v11281_v29 }
0x1580   :  { %6606 = vmatpush1.bf16.msra.mxu1 %v11279_v21 }
0x1581   :  { %6607 = vmatprep.subr.bf16.mxu1 %v11284_v63 }
0x1584   :  { %6608 = vmatpush1.bf16.msra.mxu1 %v11282_v46 }
0x1585   :  { %6609 = vmatprep.subr.bf16.mxu1 %v11287_v36 }
0x1588   :  { %6610 = vmatpush1.bf16.msra.mxu1 %v11285_v41  ;;  %v13059_v41 = vld [vmem:[#allocation10] sm:$0xff] }
0x1589   :  { %6611 = vmatprep.subr.bf16.mxu1 %v11290_v0 }
0x158c   :  { %6612 = vmatpush1.bf16.msra.mxu1 %v11288_v13 }
0x158d   :  { %10194 = vmatprep.subr.bf16.mxu1 %v12405_v61 }
0x158f   :  { %6614 = vmatmul.mubr.bf16.vlgmr.msra.gmra.mrb[60].mxu1 %v12997_v14 }
0x1590   :  { %10196 = vmatpush3.bf16.msra.mxu1 %v12422_v18 }
0x1591   :  { %10198 = vmatprep.subr.bf16.mxu1 %v12424_v19 }
0x1594   :  { %10200 = vmatpush3.bf16.msra.mxu1 %v12429_v26 }
0x1595   :  { %10202 = vmatprep.subr.bf16.mxu1 %v12432_v27 }
0x1598   :  { %10204 = vmatpush3.bf16.msra.mxu1 %v12435_v34 }
0x1599   :  { %10206 = vmatprep.subr.bf16.mxu1 %v12438_v35 }
0x159c   :  { %10208 = vmatpush3.bf16.msra.mxu1 %v12441_v42 }
0x159d   :  { %10210 = vmatprep.subr.bf16.mxu1 %v12444_v43 }
0x15a0   :  { %10212 = vmatpush3.bf16.msra.mxu1 %v12447_v50 }
0x15a1   :  { %10214 = vmatprep.subr.bf16.mxu1 %v12450_v51 }
0x15a4   :  { %10216 = vmatpush3.bf16.msra.mxu1 %v12453_v58 }
0x15a5   :  { %10218 = vmatprep.subr.bf16.mxu1 %v12456_v59 }
0x15a8   :  { %10220 = vmatpush3.bf16.msra.mxu1 %v12459_v1 }
0x15a9   :  { %10222 = vmatprep.subr.bf16.mxu1 %v12465_v32 }
0x15ac   :  { %10224 = vmatpush3.bf16.msra.mxu1 %v12467_v37 }
0x15ad   :  { %6826 = vmatprep.subr.mxu1 %v13016_v56 }
0x1622   :  { %v6572_v4 = vpop.f32.mrb[56].mxu1  ;;  %v13039_v17 = vpop.f32.mrb[36].mxu0 }
0x1623   :  { %v6574_v23 = vpop.f32.mrb[57].mxu1  ;;  %v13043_v14 = vpop.f32.mrb[37].mxu0  ;;  %v6573_v3 = vadd.f32 %v6572_v4, %v6031_v24 }
0x1624   :  { %v6576_v48 = vpop.f32.mrb[58].mxu1  ;;  %v13047_v22 = vpop.f32.mrb[38].mxu0  ;;  %v6575_v49 = vadd.f32 %v6574_v23, %v6035_v20 }
0x1625   :  { %v6577_v54 = vadd.f32 %v6576_v48, %v6031_v24  ;;  %v6578_v53 = vpop.f32.mrb[59].mxu1  ;;  %v13049_v28 = vpop.f32.mrb[39].mxu0 }
0x1626   :  { %v6579_v47 = vadd.f32 %v6578_v53, %v6035_v20 }
0x1662   :  { %v6615_v10 = vpop.f32.mrb[60].mxu1 }
0x1663   :  { %v6616_v60 = vadd.f32 %v6615_v10, %v6039_v25  ;;  %v6617_v6 = vpop.f32.mrb[61].mxu1 }
0x1664   :  { %v6618_v5 = vadd.f32 %v6617_v6, %v6043_v45  ;;  %v6619_v8 = vpop.f32.mrb[62].mxu1 }
0x1665   :  { %v6667_v31 = vmul.f32 %v6616_v60, %v6573_v3  ;;  %v13055_v33 = vmul.f32 %v6616_v60, %v6577_v54  ;;  %v6620_v30 = vadd.f32 %v6619_v8, %v6039_v25  ;;  %v6621_v2 = vpop.f32.mrb[63].mxu1 }
0x1666   :  { %v6668_v62 = vmul.f32 %v6618_v5, %v6575_v49  ;;  %v6979_v52 = vmul.f32 %v6618_v5, %v6579_v47  ;;  %v6622_v29 = vadd.f32 %v6621_v2, %v6043_v45 }
0x1667   :  { %v6740_v21 = vmul.f32 %v6620_v30, %v6573_v3  ;;  %v13057_v63 = vmul.f32 %v6620_v30, %v6577_v54 }
0x1668   :  { %v6741_v46 = vmul.f32 %v6622_v29, %v6575_v49  ;;  %v7052_v36 = vmul.f32 %v6622_v29, %v6579_v47  ;;  %6733 = vmatprep.mubr.f32.mxu1 %v6668_v62 }
0x1669   :  { %6734 = vmatmul.mubr.f32.vlgmr.msra.gmra.mrb[64].mxu1 %v6667_v31 }
0x166a   :  { %6806 = vmatprep.mubr.f32.mxu0 %v6741_v46  ;;  %6827 = vmatpush1.msra.mxu1 %v13059_v41  ;;  %v11291_v46 = vld [vmem:[#allocation14 + $0x200] ss:$8 sps:$4 sm:$0xff]  }
0x166b   :  { %6807 = vmatmul.mubr.f32.vlgmr.msra.gmra.mrb[40].mxu0 %v6740_v21  ;;  %6890 = vmatprep.mubr.f32.mxu1 %v12041_v7 }
0x166c   :  { %6904 = vmatpush1.msra.mxu0 %v13059_v41  ;;  %6967 = vmatprep.mubr.f32.mxu0 %v12041_v7 }
0x166d   :  { %10258 = vmatprep.subr.bf16.mxu1 %v12405_v61  ;;  %10290 = vmatprep.subr.bf16.mxu0 %v12405_v61 }
0x173c   :  { %v9797_v0 = vpop.f32.mrb[64].mxu1 }
0x173d   :  { %v9798_v13 = vpop.f32.mrb[65].mxu1 }
0x173e   :  { %v9799_v4 = vadd.f32 %v9798_v13, %v9797_v0  ;;  %v9832_v24 = vpop.f32.mrb[40].mxu0  ;;  %v11296_v0 = vld [vmem:[#allocation14 + $0x214] ss:$8 sps:$4 sm:$0xff]   ;;  %v11294_v13 = vld [vmem:[#allocation14 + $0x210] ss:$8 sps:$4 sm:$0xff]  }
0x173f   :  { %v9833_v23 = vpop.f32.mrb[41].mxu0 }
0x1740   :  { %v9834_v20 = vadd.f32 %v9833_v23, %v9832_v24  ;;  %v6739_v48 = vmul.f32 0.17677669, %v9799_v4  ;;  %v11299_v4 = vld [vmem:[#allocation14 + $0x224] ss:$8 sps:$4 sm:$0xff]   ;;  %v11297_v24 = vld [vmem:[#allocation14 + $0x220] ss:$8 sps:$4 sm:$0xff]  }
0x1741   :  { %v11302_v23 = vld [vmem:[#allocation14 + $0x234] ss:$8 sps:$4 sm:$0xff]  }
0x1742   :  { %v6812_v54 = vmul.f32 0.17677669, %v9834_v20  ;;  %v11300_v20 = vld [vmem:[#allocation14 + $0x230] ss:$8 sps:$4 sm:$0xff]  }
0x1744   :  { %v6813_v53 = vmax.f32 %v6739_v48, %v6812_v54 }
0x1746   :  { %v6814_v47 = vsub.f32 %v6739_v48, %v6813_v53  ;;  %v6817_v25 = vsub.f32 %v6812_v54, %v6813_v53  ;;  %v11305_v48 = vld [vmem:[#allocation14 + $0x244] ss:$8 sps:$4 sm:$0xff]   ;;  %v11303_v54 = vld [vmem:[#allocation14 + $0x240] ss:$8 sps:$4 sm:$0xff]   ;;  %v11308_v53 = vld [vmem:[#allocation14 + $0x254] ss:$8 sps:$4 sm:$0xff]  }
0x1748   :  { %v6815_v45 = vmul.f32 1.442695, %v6814_v47  ;;  %v6818_v10 = vmul.f32 1.442695, %v6817_v25  ;;  %v11306_v47 = vld [vmem:[#allocation14 + $0x250] ss:$8 sps:$4 sm:$0xff]  }
0x1749   :  { %v11311_v25 = vld [vmem:[#allocation14 + $0x264] ss:$8 sps:$4 sm:$0xff]  }
0x174a   :  { %11571 = vpow2.f32 %v6815_v45  ;;  %v11309_v45 = vld [vmem:[#allocation14 + $0x260] ss:$8 sps:$4 sm:$0xff]  }
0x174b   :  { %11573 = vpow2.f32 %v6818_v10  ;;  %v11314_v10 = vld [vmem:[#allocation14 + $0x274] ss:$8 sps:$4 sm:$0xff]  }
0x1754   :  { %v11572_v3 = vpop.eup %11571 }
0x1755   :  { %v11574_v60 = vpop.eup %11573 }
0x1756   :  { %v6820_v6 = vadd.f32 %v11574_v60, %v11572_v3 }
0x1758   :  { %11575 = vrcp.f32 %v6820_v6  ;;  %v11315_v6 = vld [vmem:[#allocation14 + $0x280] ss:$8 sps:$4 sm:$0xff]  }
0x1762   :  { %v11576_v61 = vpop.eup %11575 }
0x1763   :  { %v6822_v49 = vmul.f32 %v11576_v61, %v11572_v3  ;;  %v6899_v5 = vmul.f32 %v11576_v61, %v11574_v60  ;;  %v11312_v3 = vld [vmem:[#allocation14 + $0x270] ss:$8 sps:$4 sm:$0xff]   ;;  %v11317_v60 = vld [vmem:[#allocation14 + $0x284] ss:$8 sps:$4 sm:$0xff]   ;;  %v11320_v61 = vld [vmem:[#allocation14 + $0x294] ss:$8 sps:$4 sm:$0xff]  }
0x1765   :  { %9321 = vmatmul.mubr.msk.f32.vlgmr.msra.gmra.mrb[66].mxu1 %vm1339_vm2, %v6822_v49  ;;  %9322 = vmatmul.mubr.msk.f32.vlgmr.msra.gmra.mrb[42].mxu0 %vm1339_vm2, %v6899_v5  ;;  %v11318_v49 = vld [vmem:[#allocation14 + $0x290] ss:$8 sps:$4 sm:$0xff]   ;;  %v11323_v5 = vld [vmem:[#allocation14 + $0x2a4] ss:$8 sps:$4 sm:$0xff]  }
0x1766   :  { %10260 = vmatpush3.bf16.msra.mxu1 %v12422_v18  ;;  %10292 = vmatpush3.bf16.msra.mxu0 %v12422_v18  ;;  %v11293_v18 = vld [vmem:[#allocation14 + $0x204] ss:$8 sps:$4 sm:$0xff]  }
0x1767   :  { %7044 = vmatprep.mubr.f32.mxu1 %v6979_v52  ;;  %7117 = vmatprep.mubr.f32.mxu0 %v7052_v36 }
0x1768   :  { %10262 = vmatprep.subr.bf16.mxu1 %v12424_v19  ;;  %10294 = vmatprep.subr.bf16.mxu0 %v12424_v19  ;;  %v6047_v19 = vrot.slane %v13037_v57, %v12568_v9 }
0x176a   :  { %10264 = vmatpush3.bf16.msra.mxu1 %v12429_v26  ;;  %10296 = vmatpush3.bf16.msra.mxu0 %v12429_v26  ;;  %v6051_v26 = vrot.slane %v13037_v57, %v12571_v11 }
0x176b   :  { %10266 = vmatprep.subr.bf16.mxu1 %v12432_v27  ;;  %10298 = vmatprep.subr.bf16.mxu0 %v12432_v27  ;;  %v13112_v27 = vadd.f32 %v13039_v17, %v6047_v19 }
0x176e   :  { %10268 = vmatpush3.bf16.msra.mxu1 %v12435_v34  ;;  %10300 = vmatpush3.bf16.msra.mxu0 %v12435_v34  ;;  %v13115_v34 = vadd.f32 %v13047_v22, %v6047_v19  ;;  %v11326_v19 = vld [vmem:[#allocation14 + $0x2b4] ss:$8 sps:$4 sm:$0xff]  }
0x176f   :  { %10270 = vmatprep.subr.bf16.mxu1 %v12438_v35  ;;  %10302 = vmatprep.subr.bf16.mxu0 %v12438_v35  ;;  %v13118_v35 = vadd.f32 %v13043_v14, %v6051_v26 }
0x1772   :  { %10272 = vmatpush3.bf16.msra.mxu1 %v12441_v42  ;;  %10304 = vmatpush3.bf16.msra.mxu0 %v12441_v42  ;;  %v13121_v42 = vadd.f32 %v13049_v28, %v6051_v26  ;;  %v11324_v26 = vld [vmem:[#allocation14 + $0x2b0] ss:$8 sps:$4 sm:$0xff]  }
0x1773   :  { %10274 = vmatprep.subr.bf16.mxu1 %v12444_v43  ;;  %10306 = vmatprep.subr.bf16.mxu0 %v12444_v43 }
0x1776   :  { %10276 = vmatpush3.bf16.msra.mxu1 %v12447_v50  ;;  %10308 = vmatpush3.bf16.msra.mxu0 %v12447_v50 }
0x1777   :  { %10278 = vmatprep.subr.bf16.mxu1 %v12450_v51  ;;  %10310 = vmatprep.subr.bf16.mxu0 %v12450_v51 }
0x177a   :  { %10280 = vmatpush3.bf16.msra.mxu1 %v12453_v58  ;;  %10312 = vmatpush3.bf16.msra.mxu0 %v12453_v58 }
0x177b   :  { %10282 = vmatprep.subr.bf16.mxu1 %v12456_v59  ;;  %10314 = vmatprep.subr.bf16.mxu0 %v12456_v59 }
0x177e   :  { %10284 = vmatpush3.bf16.msra.mxu1 %v12459_v1  ;;  %10316 = vmatpush3.bf16.msra.mxu0 %v12459_v1 }
0x177f   :  { %10286 = vmatprep.subr.bf16.mxu1 %v12465_v32  ;;  %10318 = vmatprep.subr.bf16.mxu0 %v12465_v32 }
0x1782   :  { %10288 = vmatpush3.bf16.msra.mxu1 %v12467_v37  ;;  %10320 = vmatpush3.bf16.msra.mxu0 %v12467_v37 }
0x1783   :  { %7137 = vmatprep.subr.mxu1 %v13016_v56  ;;  %7214 = vmatprep.subr.mxu0 %v13016_v56 }
0x1785   :  { %7045 = vmatmul.mubr.f32.vlgmr.msra.gmra.mrb[68].mxu1 %v13055_v33  ;;  %7118 = vmatmul.mubr.f32.vlgmr.msra.gmra.mrb[44].mxu0 %v13057_v63 }
0x1786   :  { %7138 = vmatpush1.msra.mxu1 %v13059_v41  ;;  %7215 = vmatpush1.msra.mxu0 %v13059_v41 }
0x1787   :  { %7201 = vmatprep.mubr.f32.mxu1 %v12041_v7  ;;  %7278 = vmatprep.mubr.f32.mxu0 %v12041_v7 }
0x1788   :  { %7497 = vmatprep.subr.bf16.mxu1 %v11293_v18  ;;  %v11321_v18 = vld [vmem:[#allocation14 + $0x2a0] ss:$8 sps:$4 sm:$0xff]  }
0x1838   :  { %v6892_v7 = vpop.f32.mrb[66].mxu1  ;;  %v6969_v43 = vpop.f32.mrb[42].mxu0 }
0x1839   :  { %v6897_v50 = vmul.f32 %v6892_v7, %v13112_v27  ;;  %v6974_v51 = vmul.f32 %v6969_v43, %v13115_v34  ;;  %v6894_v58 = vpop.f32.mrb[67].mxu1  ;;  %v6971_v59 = vpop.f32.mrb[43].mxu0  ;;  %v11329_v7 = vld [vmem:[#allocation14 + $0x2c4] ss:$8 sps:$4 sm:$0xff]   ;;  %v11327_v43 = vld [vmem:[#allocation14 + $0x2c0] ss:$8 sps:$4 sm:$0xff]  }
0x183a   :  { %v6898_v1 = vmul.f32 %v6894_v58, %v13118_v35  ;;  %v6975_v32 = vmul.f32 %v6971_v59, %v13121_v42  ;;  %v11335_v58 = vld [vmem:[#allocation14 + $0x2e4] ss:$8 sps:$4 sm:$0xff]   ;;  %v11333_v59 = vld [vmem:[#allocation14 + $0x2e0] ss:$8 sps:$4 sm:$0xff]  }
0x183b   :  { %v13127_v37 = vadd.f32 %v6974_v51, %v6897_v50  ;;  %v11332_v50 = vld [vmem:[#allocation14 + $0x2d4] ss:$8 sps:$4 sm:$0xff]   ;;  %v11330_v51 = vld [vmem:[#allocation14 + $0x2d0] ss:$8 sps:$4 sm:$0xff]  }
0x183c   :  { %v13129_v9 = vadd.f32 %v6975_v32, %v6898_v1  ;;  %v11338_v1 = vld [vmem:[#allocation14 + $0x2f4] ss:$8 sps:$4 sm:$0xff]   ;;  %v11336_v32 = vld [vmem:[#allocation14 + $0x2f0] ss:$8 sps:$4 sm:$0xff]  }
0x1858   :  { %v9867_v11 = vpop.f32.mrb[68].mxu1  ;;  %v9902_v56 = vpop.f32.mrb[44].mxu0 }
0x1859   :  { %v9868_v57 = vpop.f32.mrb[69].mxu1  ;;  %v9903_v17 = vpop.f32.mrb[45].mxu0 }
0x185a   :  { %v9869_v14 = vadd.f32 %v9868_v57, %v9867_v11  ;;  %v9904_v22 = vadd.f32 %v9903_v17, %v9902_v56 }
0x185c   :  { %v7050_v28 = vmul.f32 0.17677669, %v9869_v14  ;;  %v7123_v8 = vmul.f32 0.17677669, %v9904_v22 }
0x185e   :  { %v7124_v31 = vmax.f32 %v7050_v28, %v7123_v8 }
0x1860   :  { %v7125_v33 = vsub.f32 %v7050_v28, %v7124_v31  ;;  %v7128_v30 = vsub.f32 %v7123_v8, %v7124_v31 }
0x1862   :  { %v7126_v2 = vmul.f32 1.442695, %v7125_v33  ;;  %v7129_v62 = vmul.f32 1.442695, %v7128_v30 }
0x1864   :  { %11577 = vpow2.f32 %v7126_v2 }
0x1865   :  { %11579 = vpow2.f32 %v7129_v62  ;;  %v7325_v62 = vld [vmem:[#allocation16 + $0x4] sm:$0x3] }
0x186e   :  { %v11578_v52 = vpop.eup %11577 }
0x186f   :  { %v11580_v29 = vpop.eup %11579 }
0x1870   :  { %v7131_v21 = vadd.f32 %v11580_v29, %v11578_v52 }
0x1872   :  { %11581 = vrcp.f32 %v7131_v21 }
0x187c   :  { %v11582_v63 = vpop.eup %11581 }
0x187d   :  { %v7133_v36 = vmul.f32 %v11582_v63, %v11578_v52  ;;  %v7210_v41 = vmul.f32 %v11582_v63, %v11580_v29  ;;  %v7330_v52 = vrot.slane %v7325_v62, %v12476_v15 }
0x187f   :  { %9323 = vmatmul.mubr.msk.f32.vlgmr.msra.gmra.mrb[70].mxu1 %vm1339_vm2, %v7133_v36  ;;  %9324 = vmatmul.mubr.msk.f32.vlgmr.msra.gmra.mrb[46].mxu0 %vm1339_vm2, %v7210_v41 }
0x1880   :  { %7498 = vmatpush1.bf16.msra.mxu1 %v11291_v46 }
0x1881   :  { %7499 = vmatprep.subr.bf16.mxu1 %v11296_v0 }
0x1884   :  { %7500 = vmatpush1.bf16.msra.mxu1 %v11294_v13 }
0x1885   :  { %7501 = vmatprep.subr.bf16.mxu1 %v11299_v4  ;;  %v11339_v4 = vld [vmem:[#allocation20 + $0x400] ss:$16 sps:$4 sm:$0xff]  }
0x1888   :  { %7502 = vmatpush1.bf16.msra.mxu1 %v11297_v24  ;;  %v11341_v24 = vld [vmem:[#allocation20 + $0x404] ss:$16 sps:$4 sm:$0xff]  }
0x1889   :  { %7503 = vmatprep.subr.bf16.mxu1 %v11302_v23  ;;  %v11342_v23 = vld [vmem:[#allocation20 + $0x408] ss:$16 sps:$4 sm:$0xff]   ;;  %8020 = vmatprep.subr.bf16.mxu0 %v11341_v24 }
0x188a   :  { %8021 = vmatpush1.bf16.msra.mxu0 %v11339_v4  ;;  %v11405_v4 = vld [vmem:[#allocation20 + $0x560] ss:$16 sps:$4 sm:$0xff]   ;;  %v11408_v24 = vld [vmem:[#allocation20 + $0x568] ss:$16 sps:$4 sm:$0xff]  }
0x188c   :  { %7504 = vmatpush1.bf16.msra.mxu1 %v11300_v20  ;;  %v11347_v20 = vld [vmem:[#allocation20 + $0x424] ss:$16 sps:$4 sm:$0xff]  }
0x188d   :  { %7505 = vmatprep.subr.bf16.mxu1 %v11305_v48  ;;  %v11350_v48 = vld [vmem:[#allocation20 + $0x42c] ss:$16 sps:$4 sm:$0xff]   ;;  %8022 = vmatprep.subr.bf16.mxu0 %v11347_v20  ;;  %v11411_v20 = vld [vmem:[#allocation20 + $0x580] ss:$16 sps:$4 sm:$0xff]  }
0x1890   :  { %7506 = vmatpush1.bf16.msra.mxu1 %v11303_v54  ;;  %v11353_v54 = vld [vmem:[#allocation20 + $0x444] ss:$16 sps:$4 sm:$0xff]  }
0x1891   :  { %7507 = vmatprep.subr.bf16.mxu1 %v11308_v53  ;;  %v11356_v53 = vld [vmem:[#allocation20 + $0x44c] ss:$16 sps:$4 sm:$0xff]  }
0x1894   :  { %7508 = vmatpush1.bf16.msra.mxu1 %v11306_v47  ;;  %v11351_v47 = vld [vmem:[#allocation20 + $0x440] ss:$16 sps:$4 sm:$0xff]  }
0x1895   :  { %7509 = vmatprep.subr.bf16.mxu1 %v11311_v25  ;;  %v11354_v25 = vld [vmem:[#allocation20 + $0x448] ss:$16 sps:$4 sm:$0xff]  }
0x1898   :  { %7510 = vmatpush1.bf16.msra.mxu1 %v11309_v45  ;;  %v11359_v45 = vld [vmem:[#allocation20 + $0x464] ss:$16 sps:$4 sm:$0xff]  }
0x1899   :  { %7511 = vmatprep.subr.bf16.mxu1 %v11314_v10  ;;  %v11362_v10 = vld [vmem:[#allocation20 + $0x46c] ss:$16 sps:$4 sm:$0xff]  }
0x189c   :  { %7512 = vmatpush1.bf16.msra.mxu1 %v11312_v3  ;;  %v11357_v3 = vld [vmem:[#allocation20 + $0x460] ss:$16 sps:$4 sm:$0xff]  }
0x189d   :  { %7513 = vmatprep.subr.bf16.mxu1 %v11317_v60  ;;  %v11360_v60 = vld [vmem:[#allocation20 + $0x468] ss:$16 sps:$4 sm:$0xff]  }
0x18a0   :  { %7514 = vmatpush1.bf16.msra.mxu1 %v11315_v6  ;;  %v11365_v6 = vld [vmem:[#allocation20 + $0x484] ss:$16 sps:$4 sm:$0xff]  }
0x18a1   :  { %7515 = vmatprep.subr.bf16.mxu1 %v11320_v61  ;;  %v11368_v61 = vld [vmem:[#allocation20 + $0x48c] ss:$16 sps:$4 sm:$0xff]  }
0x18a4   :  { %7516 = vmatpush1.bf16.msra.mxu1 %v11318_v49  ;;  %v11363_v49 = vld [vmem:[#allocation20 + $0x480] ss:$16 sps:$4 sm:$0xff]  }
0x18a5   :  { %7517 = vmatprep.subr.bf16.mxu1 %v11323_v5  ;;  %v11366_v5 = vld [vmem:[#allocation20 + $0x488] ss:$16 sps:$4 sm:$0xff]  }
0x18a8   :  { %7518 = vmatpush1.bf16.msra.mxu1 %v11321_v18  ;;  %v11371_v18 = vld [vmem:[#allocation20 + $0x4a4] ss:$16 sps:$4 sm:$0xff]  }
0x18a9   :  { %7519 = vmatprep.subr.bf16.mxu1 %v11326_v19  ;;  %v11374_v19 = vld [vmem:[#allocation20 + $0x4ac] ss:$16 sps:$4 sm:$0xff]  }
0x18ac   :  { %7520 = vmatpush1.bf16.msra.mxu1 %v11324_v26  ;;  %v11369_v26 = vld [vmem:[#allocation20 + $0x4a0] ss:$16 sps:$4 sm:$0xff]  }
0x18ad   :  { %7521 = vmatprep.subr.bf16.mxu1 %v11329_v7  ;;  %v11372_v7 = vld [vmem:[#allocation20 + $0x4a8] ss:$16 sps:$4 sm:$0xff]  }
0x18b0   :  { %7522 = vmatpush1.bf16.msra.mxu1 %v11327_v43  ;;  %v11377_v43 = vld [vmem:[#allocation20 + $0x4c4] ss:$16 sps:$4 sm:$0xff]  }
0x18b1   :  { %7523 = vmatprep.subr.bf16.mxu1 %v11332_v50  ;;  %v11380_v50 = vld [vmem:[#allocation20 + $0x4cc] ss:$16 sps:$4 sm:$0xff]  }
0x18b4   :  { %7524 = vmatpush1.bf16.msra.mxu1 %v11330_v51  ;;  %v11375_v51 = vld [vmem:[#allocation20 + $0x4c0] ss:$16 sps:$4 sm:$0xff]  }
0x18b5   :  { %7525 = vmatprep.subr.bf16.mxu1 %v11335_v58  ;;  %v11378_v58 = vld [vmem:[#allocation20 + $0x4c8] ss:$16 sps:$4 sm:$0xff]  }
0x18b8   :  { %7526 = vmatpush1.bf16.msra.mxu1 %v11333_v59  ;;  %v11383_v59 = vld [vmem:[#allocation20 + $0x4e4] ss:$16 sps:$4 sm:$0xff]  }
0x18b9   :  { %7527 = vmatprep.subr.bf16.mxu1 %v11338_v1  ;;  %v11386_v1 = vld [vmem:[#allocation20 + $0x4ec] ss:$16 sps:$4 sm:$0xff]  }
0x18bc   :  { %7528 = vmatpush1.bf16.msra.mxu1 %v11336_v32  ;;  %v11381_v32 = vld [vmem:[#allocation20 + $0x4e0] ss:$16 sps:$4 sm:$0xff]  }
0x1952   :  { %v7203_v11 = vpop.f32.mrb[70].mxu1  ;;  %v7280_v56 = vpop.f32.mrb[46].mxu0 }
0x1953   :  { %v7208_v57 = vmul.f32 %v7203_v11, %v13112_v27  ;;  %v7285_v17 = vmul.f32 %v7280_v56, %v13115_v34  ;;  %v7205_v14 = vpop.f32.mrb[71].mxu1  ;;  %v7282_v22 = vpop.f32.mrb[47].mxu0  ;;  %v7334_v27 = vrot.slane %v7325_v62, %v12482_v40  ;;  %v11384_v11 = vld [vmem:[#allocation20 + $0x4e8] ss:$16 sps:$4 sm:$0xff]   ;;  %v11389_v56 = vld [vmem:[#allocation20 + $0x504] ss:$16 sps:$4 sm:$0xff]  }
0x1954   :  { %v7209_v28 = vmul.f32 %v7205_v14, %v13118_v35  ;;  %v7286_v8 = vmul.f32 %v7282_v22, %v13121_v42  ;;  %v11390_v14 = vld [vmem:[#allocation20 + $0x508] ss:$16 sps:$4 sm:$0xff]   ;;  %v11395_v22 = vld [vmem:[#allocation20 + $0x524] ss:$16 sps:$4 sm:$0xff]  }
0x1955   :  { %v7287_v31 = vadd.f32 %v7285_v17, %v7208_v57  ;;  %v11392_v57 = vld [vmem:[#allocation20 + $0x50c] ss:$16 sps:$4 sm:$0xff]   ;;  %v11387_v17 = vld [vmem:[#allocation20 + $0x500] ss:$16 sps:$4 sm:$0xff]  }
0x1956   :  { %v7288_v33 = vadd.f32 %v7286_v8, %v7209_v28  ;;  %v11398_v28 = vld [vmem:[#allocation20 + $0x52c] ss:$16 sps:$4 sm:$0xff]   ;;  %v11393_v8 = vld [vmem:[#allocation20 + $0x520] ss:$16 sps:$4 sm:$0xff]  }
0x1957   :  { %v7289_v30 = vpack.c.bf16 %v7287_v31, %v13127_v37  ;;  %v11396_v31 = vld [vmem:[#allocation20 + $0x528] ss:$16 sps:$4 sm:$0xff]  }
0x1958   :  { %v7290_v2 = vpack.c.bf16 %v7288_v33, %v13129_v9 }
0x195a   :  { %7529 = vmatprep.mubr.bf16.mxu1 %v7290_v2 }
0x195b   :  { %7530 = vmatmul.mubr.bf16.vlgmr.msra.gmra.mrb[72].mxu1 %v7289_v30 }
0x1a2e   :  { %v7531_v34 = vpop.f32.mrb[72].mxu1 }
0x1a2f   :  { %v7532_v29 = vadd.f32 %v7531_v34, %v7330_v52  ;;  %v7533_v21 = vpop.f32.mrb[73].mxu1 }
0x1a30   :  { %v7534_v63 = vadd.f32 %v7533_v21, %v7334_v27  ;;  %v7535_v35 = vpop.f32.mrb[74].mxu1 }
0x1a31   :  { %v13142_v42 = vadd.f32 %v7532_v29, %v12989_v12  ;;  %v7536_v46 = vadd.f32 %v7535_v35, %v7330_v52  ;;  %v7537_v36 = vpop.f32.mrb[75].mxu1 }
0x1a32   :  { %v13145_v37 = vadd.f32 %v7534_v63, %v12985_v38  ;;  %v7538_v9 = vadd.f32 %v7537_v36, %v7334_v27  ;;  %v11344_v38 = vld [vmem:[#allocation20 + $0x40c] ss:$16 sps:$4 sm:$0xff]  }
0x1a33   :  { %v13148_v41 = vadd.f32 %v7536_v46, %v12991_v16  ;;  %8063 = vmatprep.subr.bf16.mxu1 %v11344_v38  ;;  %v11345_v16 = vld [vmem:[#allocation20 + $0x420] ss:$16 sps:$4 sm:$0xff]   ;;  %v11416_v38 = vld [vmem:[#allocation20 + $0x58c] ss:$16 sps:$4 sm:$0xff]  }
0x1a34   :  { %v13151_v0 = vadd.f32 %v7538_v9, %v12987_v55  ;;  %v7548_v13 = vadd.f32 %v13145_v37, %v13142_v42  ;;  %8064 = vmatpush1.bf16.msra.mxu1 %v11342_v23  ;;  %v11348_v55 = vld [vmem:[#allocation20 + $0x428] ss:$16 sps:$4 sm:$0xff]   ;;  %8023 = vmatpush1.bf16.msra.mxu0 %v11345_v16  ;;  %v11404_v9 = vld [vmem:[#allocation20 + $0x54c] ss:$16 sps:$4 sm:$0xff]   ;;  %v11413_v23 = vld [vmem:[#allocation20 + $0x584] ss:$16 sps:$4 sm:$0xff]  }
0x1a35   :  { %8065 = vmatprep.subr.bf16.mxu1 %v11350_v48  ;;  %8024 = vmatprep.subr.bf16.mxu0 %v11353_v54  ;;  %v11414_v48 = vld [vmem:[#allocation20 + $0x588] ss:$16 sps:$4 sm:$0xff]   ;;  %v11419_v16 = vld [vmem:[#allocation20 + $0x5a4] ss:$16 sps:$4 sm:$0xff]   ;;  %v11417_v54 = vld [vmem:[#allocation20 + $0x5a0] ss:$16 sps:$4 sm:$0xff]  }
0x1a36   :  { %7549 = vadd.xlane.f32.xlu1 %v7548_v13  ;;  %v7551_v12 = vadd.f32 %v13151_v0, %v13148_v41  ;;  %v11407_v13 = vld [vmem:[#allocation20 + $0x564] ss:$16 sps:$4 sm:$0xff]  }
0x1a38   :  { %7552 = vadd.xlane.f32.xlu0 %v7551_v12  ;;  %8066 = vmatpush1.bf16.msra.mxu1 %v11348_v55  ;;  %v11410_v12 = vld [vmem:[#allocation20 + $0x56c] ss:$16 sps:$4 sm:$0xff]  }
0x1a39   :  { %8067 = vmatprep.subr.bf16.mxu1 %v11356_v53  ;;  %8025 = vmatpush1.bf16.msra.mxu0 %v11351_v47  ;;  %v11422_v55 = vld [vmem:[#allocation20 + $0x5ac] ss:$16 sps:$4 sm:$0xff]   ;;  %v11420_v53 = vld [vmem:[#allocation20 + $0x5a8] ss:$16 sps:$4 sm:$0xff]   ;;  %v11425_v47 = vld [vmem:[#allocation20 + $0x5c4] ss:$16 sps:$4 sm:$0xff]  }
0x1a3a   :  { %8026 = vmatprep.subr.bf16.mxu0 %v11359_v45  ;;  %v11423_v45 = vld [vmem:[#allocation20 + $0x5c0] ss:$16 sps:$4 sm:$0xff]  }
0x1a3c   :  { %8068 = vmatpush1.bf16.msra.mxu1 %v11354_v25  ;;  %v11428_v25 = vld [vmem:[#allocation20 + $0x5cc] ss:$16 sps:$4 sm:$0xff]  }
0x1a3d   :  { %8069 = vmatprep.subr.bf16.mxu1 %v11362_v10  ;;  %8027 = vmatpush1.bf16.msra.mxu0 %v11357_v3  ;;  %v11426_v10 = vld [vmem:[#allocation20 + $0x5c8] ss:$16 sps:$4 sm:$0xff]   ;;  %v11431_v3 = vld [vmem:[#allocation20 + $0x5e4] ss:$16 sps:$4 sm:$0xff]  }
0x1a3e   :  { %8028 = vmatprep.subr.bf16.mxu0 %v11365_v6  ;;  %v11429_v6 = vld [vmem:[#allocation20 + $0x5e0] ss:$16 sps:$4 sm:$0xff]  }
0x1a40   :  { %8070 = vmatpush1.bf16.msra.mxu1 %v11360_v60  ;;  %v11434_v60 = vld [vmem:[#allocation20 + $0x5ec] ss:$16 sps:$4 sm:$0xff]  }
0x1a41   :  { %8071 = vmatprep.subr.bf16.mxu1 %v11368_v61  ;;  %8029 = vmatpush1.bf16.msra.mxu0 %v11363_v49  ;;  %v11432_v61 = vld [vmem:[#allocation20 + $0x5e8] ss:$16 sps:$4 sm:$0xff]  }
0x1a42   :  { %8030 = vmatprep.subr.bf16.mxu0 %v11371_v18  ;;  %v11437_v49 = vld [vmem:[#allocation23 + $0x404] ss:$8 sps:$4 sm:$0xff]  }
0x1a44   :  { %8072 = vmatpush1.bf16.msra.mxu1 %v11366_v5 }
0x1a45   :  { %8073 = vmatprep.subr.bf16.mxu1 %v11374_v19  ;;  %8031 = vmatpush1.bf16.msra.mxu0 %v11369_v26 }
0x1a46   :  { %8032 = vmatprep.subr.bf16.mxu0 %v11377_v43 }
0x1a48   :  { %8074 = vmatpush1.bf16.msra.mxu1 %v11372_v7 }
0x1a49   :  { %8075 = vmatprep.subr.bf16.mxu1 %v11380_v50  ;;  %8033 = vmatpush1.bf16.msra.mxu0 %v11375_v51  ;;  %v7545_v50 = vld [vmem:[#allocation17 + $0x4] sm:$0x3]  ;;  %v7547_v51 = vld [vmem:[#allocation19 + $0x4] sm:$0x3] }
0x1a4a   :  { %8034 = vmatprep.subr.bf16.mxu0 %v11383_v59  ;;  %v7588_v59 = vrot.slane %v7545_v50, %v12482_v40 }
0x1a4c   :  { %8076 = vmatpush1.bf16.msra.mxu1 %v11378_v58  ;;  %v7584_v58 = vrot.slane %v7545_v50, %v12476_v15 }
0x1a4d   :  { %8077 = vmatprep.subr.bf16.mxu1 %v11386_v1  ;;  %8035 = vmatpush1.bf16.msra.mxu0 %v11381_v32 }
0x1a4e   :  { %8036 = vmatprep.subr.bf16.mxu0 %v11389_v56 }
0x1a50   :  { %8078 = vmatpush1.bf16.msra.mxu1 %v11384_v11 }
0x1a51   :  { %8079 = vmatprep.subr.bf16.mxu1 %v11392_v57  ;;  %8037 = vmatpush1.bf16.msra.mxu0 %v11387_v17  ;;  %v7599_v57 = vrot.slane %v7547_v51, %v12476_v15  ;;  %v7603_v17 = vrot.slane %v7547_v51, %v12482_v40 }
0x1a52   :  { %8038 = vmatprep.subr.bf16.mxu0 %v11395_v22 }
0x1a54   :  { %8080 = vmatpush1.bf16.msra.mxu1 %v11390_v14 }
0x1a55   :  { %8081 = vmatprep.subr.bf16.mxu1 %v11398_v28  ;;  %8039 = vmatpush1.bf16.msra.mxu0 %v11393_v8 }
0x1a58   :  { %8082 = vmatpush1.bf16.msra.mxu1 %v11396_v31 }
0x1a59   :  { %8083 = vmatprep.subr.bf16.mxu1 %v11404_v9  ;;  %v11447_v9 = vld [vmem:[#allocation23 + $0x440] ss:$8 sps:$4 sm:$0xff]  }
0x1ac3   :  { %v7550_v33 = vpop.xlane.xlu1 %7549 }
0x1ac4   :  { %v7554_v30 = vmul.f32 0.00390625, %v7550_v33 }
0x1ac5   :  { %v7553_v2 = vpop.xlane.xlu0 %7552 }
0x1ac6   :  { %v13158_v62 = vsub.f32 %v13142_v42, %v7554_v30  ;;  %v13161_v52 = vsub.f32 %v13145_v37, %v7554_v30  ;;  %v7555_v27 = vmul.f32 0.00390625, %v7553_v2  ;;  %v11401_v37 = vld [vmem:[#allocation20 + $0x544] ss:$16 sps:$4 sm:$0xff]  }
0x1ac7   :  { %8040 = vmatprep.subr.bf16.mxu0 %v11401_v37  ;;  %v11449_v37 = vld [vmem:[#allocation23 + $0x444] ss:$8 sps:$4 sm:$0xff]  }
0x1ac8   :  { %v13164_v34 = vsub.f32 %v13148_v41, %v7555_v27  ;;  %v13167_v29 = vsub.f32 %v13151_v0, %v7555_v27  ;;  %v7560_v21 = vmul.f32 %v13158_v62, %v13158_v62  ;;  %v7561_v63 = vmul.f32 %v13161_v52, %v13161_v52  ;;  %v11399_v41 = vld [vmem:[#allocation20 + $0x540] ss:$16 sps:$4 sm:$0xff]   ;;  %v11402_v0 = vld [vmem:[#allocation20 + $0x548] ss:$16 sps:$4 sm:$0xff]  }
0x1ac9   :  { %8041 = vmatpush1.bf16.msra.mxu0 %v11399_v41  ;;  %8084 = vmatpush1.bf16.msra.mxu1 %v11402_v0  ;;  %v11452_v41 = vld [vmem:[#allocation23 + $0x454] ss:$8 sps:$4 sm:$0xff]   ;;  %v11450_v0 = vld [vmem:[#allocation23 + $0x450] ss:$8 sps:$4 sm:$0xff]  }
0x1aca   :  { %v7564_v35 = vadd.f32 %v7561_v63, %v7560_v21  ;;  %v7562_v42 = vmul.f32 %v13164_v34, %v13164_v34  ;;  %v7563_v46 = vmul.f32 %v13167_v29, %v13167_v29  ;;  %8042 = vmatprep.subr.bf16.mxu0 %v11407_v13  ;;  %8085 = vmatprep.subr.bf16.mxu1 %v11410_v12  ;;  %v11435_v21 = vld [vmem:[#allocation23 + $0x400] ss:$8 sps:$4 sm:$0xff]   ;;  %v11438_v63 = vld [vmem:[#allocation23 + $0x410] ss:$8 sps:$4 sm:$0xff]   ;;  %v11455_v13 = vld [vmem:[#allocation23 + $0x464] ss:$8 sps:$4 sm:$0xff]  }
0x1acb   :  { %v11453_v12 = vld [vmem:[#allocation23 + $0x460] ss:$8 sps:$4 sm:$0xff]  }
0x1acc   :  { %7565 = vadd.xlane.f32.xlu1 %v7564_v35  ;;  %v7567_v36 = vadd.f32 %v7563_v46, %v7562_v42  ;;  %v11443_v35 = vld [vmem:[#allocation23 + $0x424] ss:$8 sps:$4 sm:$0xff]   ;;  %v11441_v42 = vld [vmem:[#allocation23 + $0x420] ss:$8 sps:$4 sm:$0xff]   ;;  %v11446_v46 = vld [vmem:[#allocation23 + $0x434] ss:$8 sps:$4 sm:$0xff]  }
0x1acd   :  { %8043 = vmatpush1.bf16.msra.mxu0 %v11405_v4  ;;  %8086 = vmatpush1.bf16.msra.mxu1 %v11408_v24  ;;  %v11458_v4 = vld [vmem:[#allocation23 + $0x474] ss:$8 sps:$4 sm:$0xff]   ;;  %v11456_v24 = vld [vmem:[#allocation23 + $0x470] ss:$8 sps:$4 sm:$0xff]  }
0x1ace   :  { %7568 = vadd.xlane.f32.xlu0 %v7567_v36  ;;  %8044 = vmatprep.subr.bf16.mxu0 %v11413_v23  ;;  %v11444_v36 = vld [vmem:[#allocation23 + $0x430] ss:$8 sps:$4 sm:$0xff]   ;;  %v11461_v23 = vld [vmem:[#allocation23 + $0x484] ss:$8 sps:$4 sm:$0xff]  }
0x1acf   :  { %8087 = vmatprep.subr.bf16.mxu1 %v11416_v38  ;;  %v11459_v38 = vld [vmem:[#allocation23 + $0x480] ss:$8 sps:$4 sm:$0xff]  }
0x1ad1   :  { %8045 = vmatpush1.bf16.msra.mxu0 %v11411_v20  ;;  %8088 = vmatpush1.bf16.msra.mxu1 %v11414_v48  ;;  %v11464_v20 = vld [vmem:[#allocation23 + $0x494] ss:$8 sps:$4 sm:$0xff]   ;;  %v11462_v48 = vld [vmem:[#allocation23 + $0x490] ss:$8 sps:$4 sm:$0xff]  }
0x1ad2   :  { %8046 = vmatprep.subr.bf16.mxu0 %v11419_v16  ;;  %8089 = vmatprep.subr.bf16.mxu1 %v11422_v55  ;;  %v11467_v16 = vld [vmem:[#allocation23 + $0x4a4] ss:$8 sps:$4 sm:$0xff]   ;;  %v11465_v55 = vld [vmem:[#allocation23 + $0x4a0] ss:$8 sps:$4 sm:$0xff]  }
0x1ad5   :  { %8047 = vmatpush1.bf16.msra.mxu0 %v11417_v54  ;;  %8090 = vmatpush1.bf16.msra.mxu1 %v11420_v53  ;;  %v11470_v54 = vld [vmem:[#allocation23 + $0x4b4] ss:$8 sps:$4 sm:$0xff]   ;;  %v11468_v53 = vld [vmem:[#allocation23 + $0x4b0] ss:$8 sps:$4 sm:$0xff]  }
0x1ad6   :  { %8048 = vmatprep.subr.bf16.mxu0 %v11425_v47  ;;  %8091 = vmatprep.subr.bf16.mxu1 %v11428_v25  ;;  %v11473_v47 = vld [vmem:[#allocation23 + $0x4c4] ss:$8 sps:$4 sm:$0xff]   ;;  %v11471_v25 = vld [vmem:[#allocation23 + $0x4c0] ss:$8 sps:$4 sm:$0xff]  }
0x1ad9   :  { %8049 = vmatpush1.bf16.msra.mxu0 %v11423_v45  ;;  %8092 = vmatpush1.bf16.msra.mxu1 %v11426_v10  ;;  %v11476_v45 = vld [vmem:[#allocation23 + $0x4d4] ss:$8 sps:$4 sm:$0xff]   ;;  %v11474_v10 = vld [vmem:[#allocation23 + $0x4d0] ss:$8 sps:$4 sm:$0xff]  }
0x1ada   :  { %8050 = vmatprep.subr.bf16.mxu0 %v11431_v3  ;;  %8093 = vmatprep.subr.bf16.mxu1 %v11434_v60  ;;  %v11479_v3 = vld [vmem:[#allocation23 + $0x4e4] ss:$8 sps:$4 sm:$0xff]   ;;  %v11477_v60 = vld [vmem:[#allocation23 + $0x4e0] ss:$8 sps:$4 sm:$0xff]  }
0x1add   :  { %8051 = vmatpush1.bf16.msra.mxu0 %v11429_v6  ;;  %8094 = vmatpush1.bf16.msra.mxu1 %v11432_v61  ;;  %v11482_v6 = vld [vmem:[#allocation23 + $0x4f4] ss:$8 sps:$4 sm:$0xff]   ;;  %v11480_v61 = vld [vmem:[#allocation23 + $0x4f0] ss:$8 sps:$4 sm:$0xff]  }
0x1ade   :  { %8516 = vmatprep.subr.bf16.mxu0 %v11437_v49  ;;  %v11485_v49 = vld [vmem:[#allocation23 + $0x504] ss:$8 sps:$4 sm:$0xff]  }
0x1b59   :  { %v7566_v5 = vpop.xlane.xlu1 %7565 }
0x1b5a   :  { %v7570_v18 = vmul.f32 0.00390625, %v7566_v5  ;;  %v7678_v5 = vld [vmem:[#allocation22 + $0x8] sm:$0xf] }
0x1b5b   :  { %v7569_v19 = vpop.xlane.xlu0 %7568 }
0x1b5c   :  { %v7572_v26 = vadd.f32 1e-05, %v7570_v18  ;;  %v7571_v7 = vmul.f32 0.00390625, %v7569_v19  ;;  %v7683_v18 = vrot.slane %v7678_v5, %v12476_v15  ;;  %v7691_v19 = vrot.slane %v7678_v5, %v12479_v39 }
0x1b5e   :  { %11583 = vrsqrt.f32 %v7572_v26  ;;  %v7573_v43 = vadd.f32 1e-05, %v7571_v7  ;;  %v7687_v26 = vrot.slane %v7678_v5, %v12482_v40  ;;  %v7695_v7 = vrot.slane %v7678_v5, %v12487_v44  ;;  %v11524_v5 = vld [vmem:[#allocation23 + $0x5d4] ss:$8 sps:$4 sm:$0xff]  }
0x1b60   :  { %11585 = vrsqrt.f32 %v7573_v43 }
0x1b68   :  { %v11584_v1 = vpop.eup %11583 }
0x1b69   :  { %v7576_v32 = vmul.f32 %v11584_v1, %v13158_v62  ;;  %v7577_v11 = vmul.f32 %v11584_v1, %v13161_v52 }
0x1b6a   :  { %v11586_v56 = vpop.eup %11585 }
0x1b6b   :  { %v7578_v14 = vmul.f32 %v11586_v56, %v13164_v34  ;;  %v7579_v22 = vmul.f32 %v11586_v56, %v13167_v29  ;;  %v7592_v28 = vmul.f32 %v7588_v59, %v7577_v11  ;;  %v7591_v8 = vmul.f32 %v7584_v58, %v7576_v32  ;;  %v11440_v29 = vld [vmem:[#allocation23 + $0x414] ss:$8 sps:$4 sm:$0xff]  }
0x1b6d   :  { %v7594_v31 = vmul.f32 %v7588_v59, %v7579_v22  ;;  %v7593_v33 = vmul.f32 %v7584_v58, %v7578_v14  ;;  %v13185_v30 = vadd.f32 %v7603_v17, %v7592_v28  ;;  %v13189_v62 = vadd.f32 %v7599_v57, %v7591_v8 }
0x1b6f   :  { %v13187_v2 = vadd.f32 %v7603_v17, %v7594_v31  ;;  %v13191_v52 = vadd.f32 %v7599_v57, %v7593_v33 }
0x1b71   :  { %v7611_v27 = vpack.c.bf16 %v13187_v2, %v13185_v30  ;;  %v7610_v34 = vpack.c.bf16 %v13191_v52, %v13189_v62 }
0x1b73   :  { %8052 = vmatprep.mubr.bf16.mxu0 %v7611_v27  ;;  %8095 = vmatprep.mubr.bf16.mxu1 %v7611_v27 }
0x1b74   :  { %8053 = vmatmul.mubr.bf16.vlgmr.msra.gmra.mrb[48].mxu0 %v7610_v34  ;;  %8096 = vmatmul.mubr.bf16.vlgmr.msra.gmra.mrb[76].mxu1 %v7610_v34 }
0x1b75   :  { %8517 = vmatpush1.bf16.msra.mxu0 %v11435_v21 }
0x1b76   :  { %8518 = vmatprep.subr.bf16.mxu0 %v11440_v29 }
0x1b79   :  { %8519 = vmatpush1.bf16.msra.mxu0 %v11438_v63 }
0x1b7a   :  { %8520 = vmatprep.subr.bf16.mxu0 %v11443_v35 }
0x1b7d   :  { %8521 = vmatpush1.bf16.msra.mxu0 %v11441_v42 }
0x1b7e   :  { %8522 = vmatprep.subr.bf16.mxu0 %v11446_v46 }
0x1b81   :  { %8523 = vmatpush1.bf16.msra.mxu0 %v11444_v36 }
0x1b82   :  { %8524 = vmatprep.subr.bf16.mxu0 %v11449_v37  ;;  %v11483_v37 = vld [vmem:[#allocation23 + $0x500] ss:$8 sps:$4 sm:$0xff]  }
0x1b85   :  { %8525 = vmatpush1.bf16.msra.mxu0 %v11447_v9  ;;  %v11488_v9 = vld [vmem:[#allocation23 + $0x514] ss:$8 sps:$4 sm:$0xff]  }
0x1b86   :  { %8526 = vmatprep.subr.bf16.mxu0 %v11452_v41  ;;  %v11486_v41 = vld [vmem:[#allocation23 + $0x510] ss:$8 sps:$4 sm:$0xff]  }
0x1b89   :  { %8527 = vmatpush1.bf16.msra.mxu0 %v11450_v0  ;;  %v11491_v0 = vld [vmem:[#allocation23 + $0x524] ss:$8 sps:$4 sm:$0xff]  }
0x1b8a   :  { %8528 = vmatprep.subr.bf16.mxu0 %v11455_v13  ;;  %v11489_v13 = vld [vmem:[#allocation23 + $0x520] ss:$8 sps:$4 sm:$0xff]  }
0x1b8d   :  { %8529 = vmatpush1.bf16.msra.mxu0 %v11453_v12  ;;  %v11494_v12 = vld [vmem:[#allocation23 + $0x534] ss:$8 sps:$4 sm:$0xff]  }
0x1b8e   :  { %8530 = vmatprep.subr.bf16.mxu0 %v11458_v4  ;;  %v11492_v4 = vld [vmem:[#allocation23 + $0x530] ss:$8 sps:$4 sm:$0xff]  }
0x1b91   :  { %8531 = vmatpush1.bf16.msra.mxu0 %v11456_v24  ;;  %v11497_v24 = vld [vmem:[#allocation23 + $0x544] ss:$8 sps:$4 sm:$0xff]  }
0x1b92   :  { %8532 = vmatprep.subr.bf16.mxu0 %v11461_v23  ;;  %v11495_v23 = vld [vmem:[#allocation23 + $0x540] ss:$8 sps:$4 sm:$0xff]  }
0x1b95   :  { %8533 = vmatpush1.bf16.msra.mxu0 %v11459_v38  ;;  %v11500_v38 = vld [vmem:[#allocation23 + $0x554] ss:$8 sps:$4 sm:$0xff]  }
0x1b96   :  { %8534 = vmatprep.subr.bf16.mxu0 %v11464_v20  ;;  %v11498_v20 = vld [vmem:[#allocation23 + $0x550] ss:$8 sps:$4 sm:$0xff]  }
0x1b99   :  { %8535 = vmatpush1.bf16.msra.mxu0 %v11462_v48  ;;  %v11503_v48 = vld [vmem:[#allocation23 + $0x564] ss:$8 sps:$4 sm:$0xff]  }
0x1b9a   :  { %8536 = vmatprep.subr.bf16.mxu0 %v11467_v16  ;;  %v11501_v16 = vld [vmem:[#allocation23 + $0x560] ss:$8 sps:$4 sm:$0xff]  }
0x1b9d   :  { %8537 = vmatpush1.bf16.msra.mxu0 %v11465_v55  ;;  %v11506_v55 = vld [vmem:[#allocation23 + $0x574] ss:$8 sps:$4 sm:$0xff]  }
0x1b9e   :  { %8538 = vmatprep.subr.bf16.mxu0 %v11470_v54  ;;  %v11504_v54 = vld [vmem:[#allocation23 + $0x570] ss:$8 sps:$4 sm:$0xff]  }
0x1ba1   :  { %8539 = vmatpush1.bf16.msra.mxu0 %v11468_v53  ;;  %v11509_v53 = vld [vmem:[#allocation23 + $0x584] ss:$8 sps:$4 sm:$0xff]  }
0x1ba2   :  { %8540 = vmatprep.subr.bf16.mxu0 %v11473_v47  ;;  %v11507_v47 = vld [vmem:[#allocation23 + $0x580] ss:$8 sps:$4 sm:$0xff]  }
0x1ba5   :  { %8541 = vmatpush1.bf16.msra.mxu0 %v11471_v25  ;;  %v11512_v25 = vld [vmem:[#allocation23 + $0x594] ss:$8 sps:$4 sm:$0xff]  }
0x1ba6   :  { %8542 = vmatprep.subr.bf16.mxu0 %v11476_v45  ;;  %v11510_v45 = vld [vmem:[#allocation23 + $0x590] ss:$8 sps:$4 sm:$0xff]  }
0x1ba9   :  { %8543 = vmatpush1.bf16.msra.mxu0 %v11474_v10  ;;  %v11515_v10 = vld [vmem:[#allocation23 + $0x5a4] ss:$8 sps:$4 sm:$0xff]  }
0x1baa   :  { %8544 = vmatprep.subr.bf16.mxu0 %v11479_v3  ;;  %v11513_v3 = vld [vmem:[#allocation23 + $0x5a0] ss:$8 sps:$4 sm:$0xff]  }
0x1bad   :  { %8545 = vmatpush1.bf16.msra.mxu0 %v11477_v60  ;;  %v11518_v60 = vld [vmem:[#allocation23 + $0x5b4] ss:$8 sps:$4 sm:$0xff]  }
0x1bae   :  { %8546 = vmatprep.subr.bf16.mxu0 %v11482_v6  ;;  %v11516_v6 = vld [vmem:[#allocation23 + $0x5b0] ss:$8 sps:$4 sm:$0xff]  }
0x1bb1   :  { %8547 = vmatpush1.bf16.msra.mxu0 %v11480_v61  ;;  %v11521_v61 = vld [vmem:[#allocation23 + $0x5c4] ss:$8 sps:$4 sm:$0xff]  }
0x1bb2   :  { %8559 = vmatprep.subr.bf16.mxu0 %v11485_v49  ;;  %v11519_v49 = vld [vmem:[#allocation23 + $0x5c0] ss:$8 sps:$4 sm:$0xff]  }
0x1c47   :  { %v8054_v43 = vpop.f32.mrb[48].mxu0  ;;  %v8097_v50 = vpop.f32.mrb[76].mxu1 }
0x1c48   :  { %v8055_v51 = vadd.f32 %v8054_v43, %v7683_v18  ;;  %v8098_v58 = vadd.f32 %v8097_v50, %v7691_v19  ;;  %v8056_v59 = vpop.f32.mrb[49].mxu0  ;;  %v8099_v1 = vpop.f32.mrb[77].mxu1  ;;  %v11528_v43 = vld [vmem:[#allocation23 + $0x5f0] ss:$8 sps:$4 sm:$0xff]   ;;  %v8184_v50 = vld [vmem:[#allocation25 + $0x4] sm:$0x3] }
0x1c49   :  { %v8057_v32 = vadd.f32 %v8056_v59, %v7687_v26  ;;  %v8100_v11 = vadd.f32 %v8099_v1, %v7695_v7  ;;  %v8058_v56 = vpop.f32.mrb[50].mxu0  ;;  %v8101_v57 = vpop.f32.mrb[78].mxu1 }
0x1c4a   :  { %v8059_v17 = vadd.f32 %v8058_v56, %v7683_v18  ;;  %v8102_v14 = vadd.f32 %v8101_v57, %v7691_v19  ;;  %v8060_v22 = vpop.f32.mrb[51].mxu0  ;;  %v8103_v28 = vpop.f32.mrb[79].mxu1  ;;  %v8106_v31 = vmax.f32 %v8055_v51, 0.0  ;;  %v8108_v33 = vmax.f32 %v8098_v58, 0.0  ;;  %v11522_v18 = vld [vmem:[#allocation23 + $0x5d0] ss:$8 sps:$4 sm:$0xff]  }
0x1c4b   :  { %v8061_v8 = vadd.f32 %v8060_v22, %v7687_v26  ;;  %v8104_v39 = vadd.f32 %v8103_v28, %v7695_v7  ;;  %v8107_v34 = vmax.f32 %v8057_v32, 0.0  ;;  %v8109_v21 = vmax.f32 %v8100_v11, 0.0  ;;  %v11527_v19 = vld [vmem:[#allocation23 + $0x5e4] ss:$8 sps:$4 sm:$0xff]   ;;  %v11525_v26 = vld [vmem:[#allocation23 + $0x5e0] ss:$8 sps:$4 sm:$0xff]  }
0x1c4c   :  { %v8110_v27 = vmax.f32 %v8059_v17, 0.0  ;;  %v8112_v44 = vmax.f32 %v8102_v14, 0.0  ;;  %v11530_v7 = vld [vmem:[#allocation23 + $0x5f4] ss:$8 sps:$4 sm:$0xff]   ;;  %v8189_v51 = vrot.slane %v8184_v50, %v12476_v15  ;;  %v8193_v58 = vrot.slane %v8184_v50, %v12482_v40 }
0x1c4d   :  { %v8111_v29 = vmax.f32 %v8061_v8, 0.0  ;;  %v8113_v63 = vmax.f32 %v8104_v39, 0.0 }
0x1c4e   :  { %v8114_v35 = vpack.c.bf16 %v8110_v27, %v8106_v31  ;;  %v13201_v42 = vpack.c.bf16 %v8112_v44, %v8108_v33 }
0x1c4f   :  { %v8115_v46 = vpack.c.bf16 %v8111_v29, %v8107_v34  ;;  %v8117_v36 = vpack.c.bf16 %v8113_v63, %v8109_v21 }
0x1c51   :  { %8548 = vmatprep.mubr.bf16.mxu0 %v8115_v46 }
0x1c52   :  { %8549 = vmatmul.mubr.bf16.vlgmr.msra.gmra.mrb[52].mxu0 %v8114_v35 }
0x1c53   :  { %8560 = vmatpush1.bf16.msra.mxu0 %v11483_v37  ;;  %8591 = vmatprep.mubr.bf16.mxu0 %v8117_v36 }
0x1c54   :  { %8561 = vmatprep.subr.bf16.mxu0 %v11488_v9 }
0x1c57   :  { %8562 = vmatpush1.bf16.msra.mxu0 %v11486_v41 }
0x1c58   :  { %8563 = vmatprep.subr.bf16.mxu0 %v11491_v0 }
0x1c5b   :  { %8564 = vmatpush1.bf16.msra.mxu0 %v11489_v13 }
0x1c5c   :  { %8565 = vmatprep.subr.bf16.mxu0 %v11494_v12 }
0x1c5f   :  { %8566 = vmatpush1.bf16.msra.mxu0 %v11492_v4  ;;  %v8607_v4 = vld [vmem:[#allocation26 + $0x4] sm:$0x3] }
0x1c60   :  { %8567 = vmatprep.subr.bf16.mxu0 %v11497_v24  ;;  %v8609_v24 = vld [vmem:[#allocation28 + $0x4] sm:$0x3] }
0x1c63   :  { %8568 = vmatpush1.bf16.msra.mxu0 %v11495_v23  ;;  %v8646_v23 = vrot.slane %v8607_v4, %v12476_v15 }
0x1c64   :  { %8569 = vmatprep.subr.bf16.mxu0 %v11500_v38  ;;  %v8650_v38 = vrot.slane %v8607_v4, %v12482_v40 }
0x1c67   :  { %8570 = vmatpush1.bf16.msra.mxu0 %v11498_v20 }
0x1c68   :  { %8571 = vmatprep.subr.bf16.mxu0 %v11503_v48 }
0x1c6b   :  { %8572 = vmatpush1.bf16.msra.mxu0 %v11501_v16 }
0x1c6c   :  { %8573 = vmatprep.subr.bf16.mxu0 %v11506_v55  ;;  %v8661_v55 = vrot.slane %v8609_v24, %v12476_v15 }
0x1c6f   :  { %8574 = vmatpush1.bf16.msra.mxu0 %v11504_v54  ;;  %v8665_v54 = vrot.slane %v8609_v24, %v12482_v40 }
0x1c70   :  { %8575 = vmatprep.subr.bf16.mxu0 %v11509_v53 }
0x1c73   :  { %8576 = vmatpush1.bf16.msra.mxu0 %v11507_v47 }
0x1c74   :  { %8577 = vmatprep.subr.bf16.mxu0 %v11512_v25 }
0x1c77   :  { %8578 = vmatpush1.bf16.msra.mxu0 %v11510_v45 }
0x1c78   :  { %8579 = vmatprep.subr.bf16.mxu0 %v11515_v10 }
0x1c7b   :  { %8580 = vmatpush1.bf16.msra.mxu0 %v11513_v3 }
0x1c7c   :  { %8581 = vmatprep.subr.bf16.mxu0 %v11518_v60 }
0x1c7f   :  { %8582 = vmatpush1.bf16.msra.mxu0 %v11516_v6 }
0x1c80   :  { %8583 = vmatprep.subr.bf16.mxu0 %v11521_v61 }
0x1c83   :  { %8584 = vmatpush1.bf16.msra.mxu0 %v11519_v49 }
0x1c84   :  { %8585 = vmatprep.subr.bf16.mxu0 %v11524_v5 }
0x1c87   :  { %8586 = vmatpush1.bf16.msra.mxu0 %v11522_v18 }
0x1c88   :  { %8587 = vmatprep.subr.bf16.mxu0 %v11527_v19 }
0x1c8b   :  { %8588 = vmatpush1.bf16.msra.mxu0 %v11525_v26 }
0x1c8c   :  { %8589 = vmatprep.subr.bf16.mxu0 %v11530_v7 }
0x1c8f   :  { %8590 = vmatpush1.bf16.msra.mxu0 %v11528_v43 }
0x1c92   :  { %8592 = vmatmul.mubr.bf16.vlgmr.msra.gmra.mrb[52].mxu0 %v13201_v42 }
0x1d65   :  { %v8593_v59 = vpop.f32.mrb[52].mxu0 }
0x1d66   :  { %v10329_v1 = vadd.f32 %v8593_v59, %v8189_v51  ;;  %v8595_v32 = vpop.f32.mrb[53].mxu0 }
0x1d67   :  { %v10330_v11 = vadd.f32 %v8595_v32, %v8193_v58  ;;  %v8597_v56 = vpop.f32.mrb[54].mxu0 }
0x1d68   :  { %v8602_v57 = vadd.f32 %v10329_v1, %v13189_v62  ;;  %v10331_v17 = vadd.f32 %v8597_v56, %v8189_v51  ;;  %v8599_v14 = vpop.f32.mrb[55].mxu0 }
0x1d69   :  { %v8603_v22 = vadd.f32 %v10330_v11, %v13185_v30  ;;  %v10332_v28 = vadd.f32 %v8599_v14, %v8193_v58 }
0x1d6a   :  { %v8604_v8 = vadd.f32 %v10331_v17, %v13191_v52 }
0x1d6b   :  { %v8605_v39 = vadd.f32 %v10332_v28, %v13187_v2  ;;  %v8610_v31 = vadd.f32 %v8603_v22, %v8602_v57 }
0x1d6d   :  { %8611 = vadd.xlane.f32.xlu1 %v8610_v31  ;;  %v8613_v33 = vadd.f32 %v8605_v39, %v8604_v8 }
0x1d6f   :  { %8614 = vadd.xlane.f32.xlu0 %v8613_v33 }
0x1dfa   :  { %v8612_v27 = vpop.xlane.xlu1 %8611 }
0x1dfb   :  { %v8616_v44 = vmul.f32 0.00390625, %v8612_v27 }
0x1dfc   :  { %v8615_v34 = vpop.xlane.xlu0 %8614 }
0x1dfd   :  { %v8618_v21 = vsub.f32 %v8602_v57, %v8616_v44  ;;  %v8619_v29 = vsub.f32 %v8603_v22, %v8616_v44  ;;  %v8617_v63 = vmul.f32 0.00390625, %v8615_v34 }
0x1dff   :  { %v8620_v62 = vsub.f32 %v8604_v8, %v8617_v63  ;;  %v8621_v35 = vsub.f32 %v8605_v39, %v8617_v63  ;;  %v8622_v42 = vmul.f32 %v8618_v21, %v8618_v21  ;;  %v8623_v46 = vmul.f32 %v8619_v29, %v8619_v29 }
0x1e01   :  { %v8626_v30 = vadd.f32 %v8623_v46, %v8622_v42  ;;  %v8624_v36 = vmul.f32 %v8620_v62, %v8620_v62  ;;  %v8625_v37 = vmul.f32 %v8621_v35, %v8621_v35 }
0x1e03   :  { %8627 = vadd.xlane.f32.xlu1 %v8626_v30  ;;  %v8629_v52 = vadd.f32 %v8625_v37, %v8624_v36 }
0x1e05   :  { %8630 = vadd.xlane.f32.xlu0 %v8629_v52 }
0x1e90   :  { %v8628_v2 = vpop.xlane.xlu1 %8627 }
0x1e91   :  { %v8632_v9 = vmul.f32 0.00390625, %v8628_v2 }
0x1e92   :  { %v8631_v41 = vpop.xlane.xlu0 %8630 }
0x1e93   :  { %v8634_v0 = vadd.f32 1e-05, %v8632_v9  ;;  %v8633_v13 = vmul.f32 0.00390625, %v8631_v41 }
0x1e95   :  { %11587 = vrsqrt.f32 %v8634_v0  ;;  %v8635_v12 = vadd.f32 1e-05, %v8633_v13 }
0x1e97   :  { %11589 = vrsqrt.f32 %v8635_v12 }
0x1e9f   :  { %v11588_v20 = vpop.eup %11587 }
0x1ea0   :  { %v8638_v48 = vmul.f32 %v11588_v20, %v8618_v21  ;;  %v8639_v16 = vmul.f32 %v11588_v20, %v8619_v29 }
0x1ea1   :  { %v11590_v53 = vpop.eup %11589 }
0x1ea2   :  { %v8640_v47 = vmul.f32 %v11590_v53, %v8620_v62  ;;  %v8641_v25 = vmul.f32 %v11590_v53, %v8621_v35  ;;  %v8653_v45 = vmul.f32 %v8646_v23, %v8638_v48  ;;  %v8654_v10 = vmul.f32 %v8650_v38, %v8639_v16 }
0x1ea4   :  { %v8655_v3 = vmul.f32 %v8646_v23, %v8640_v47  ;;  %v8656_v60 = vmul.f32 %v8650_v38, %v8641_v25  ;;  %v8668_v6 = vadd.f32 %v8661_v55, %v8653_v45  ;;  %v8669_v61 = vadd.f32 %v8665_v54, %v8654_v10 }
0x1ea6   :  { %v8670_v49 = vadd.f32 %v8661_v55, %v8655_v3  ;;  %v8671_v5 = vadd.f32 %v8665_v54, %v8656_v60  ;;  %8672 = vst [vmem:[#allocation29] sm:$0xff] %v8668_v6  ;;  %8673 = vst [vmem:[#allocation29 + $0x8] sm:$0xff] %v8669_v61 }
0x1ea8   :  { %8674 = vst [vmem:[#allocation29 + $0x10] sm:$0xff] %v8670_v49  ;;  %8675 = vst [vmem:[#allocation29 + $0x18] sm:$0xff] %v8671_v5 }
0x1ea9   :  { %11980 = shalt.err (!%p11977_p0)
}
0x1eaa   :  { %s13261_s0 = sld [smem:[#allocation43_spill]] }
0x1eb0   :  { %s11981_s30 = scalar_lea.hbm %s13261_s0, 512 }
0x1eb1   :  { %p11982_p1 = scmp.ne.s32.totalorder %s13261_s0, %s11981_s30  ;;  %p11985_p2 = scmp.lt.u32.totalorder %s11981_s30, %s13261_s0 }
0x1eb3   :  { %p11987_p3 = pnand %p11985_p2, %p11982_p1 }
0x1eb5   :  { %11990 = shalt.err (!%p11987_p3)
}
0x1eb6   :  { %8687 = dma.vmem_to_hbm [thread:$0]  %s8682_s19, 512, %s13261_s0, [#allocation4], %s13258_s9, %s13258_s9, %s12013_s21  }
0x1eb7   :  { %12009 = dma.done.wait [#allocation4], 512  }
0x1eb8   :  { %12010 = vsyncadd [#allocation4], 4294966784 }
0x1eb9   :  { %8691 = vsyncpa [#allocation3], 1 }
0x1eba   :  { %8692 = vsyncpa [#allocation6], 1 }
0x1ebb   :  { %8693 = vsyncpa [#allocation9], 1 }
0x1ebc   :  { %8694 = vsyncpa [#allocation12], 1 }
0x1ebd   :  { %8695 = vsyncpa [#allocation15], 1 }
0x1ebe   :  { %8696 = vsyncpa [#allocation18], 1 }
0x1ebf   :  { %8697 = vsyncpa [#allocation21], 1 }
0x1ec0   :  { %8698 = vsyncpa [#allocation24], 1 }
0x1ec1   :  { %8699 = vsyncpa [#allocation27], 1 }
0x1ec2   :  { %8700 = vsyncpa [#allocation4], 1 }

</bundles_post_ra>
